<compile_context>
chip_gen: v7x
topology: tpu7x:2x2x1
jax: 0.10.0
libtpu: 0.0.40
codegen_flags: <defaults>
</compile_context>

<pallas_src>
import jax
import jax.numpy as jnp
from jax.experimental import pallas as pl
from jax.experimental.pallas import tpu as pltpu


# -----------------------------------------------------------------------------
# Pallas kernel: whole-sequence stacked LSTM recurrence, top-layer h output.
# -----------------------------------------------------------------------------
def _make_kernel(num_layers, hidden_pad, seq_len, batch):
    Hp, T, B = hidden_pad, seq_len, batch

    def kernel(*args):
        # args: xproj_ref, whh0_ref, [wcat_l, b_l]*(L-1), out_ref
        xproj_ref = args[0]            # (T, B, 4*Hp)  layer-0 x@Wih + bias (padded)
        whh0_ref = args[1]             # (Hp, 4*Hp)
        layer_refs = args[2:-1]
        out_ref = args[-1]             # (T, B, Hp)    top-layer h per step

        # Hoist all weight / bias loads (and bias broadcasts) out of the loop.
        whh0 = whh0_ref[...]
        upper = []
        for l in range(num_layers - 1):
            wcat = layer_refs[2 * l][...]                                # (2Hp, 4Hp)
            bias = jnp.broadcast_to(layer_refs[2 * l + 1][...], (B, 4 * Hp))
            upper.append((wcat, bias))

        def cell(gates, c_prev):
            # Gate layout (permuted in the wrapper): [ i | f | o | g ].
            sig = jax.nn.sigmoid(gates[:, :3 * Hp])      # one EUP pass for i,f,o
            i_g = sig[:, 0:Hp]
            f_g = sig[:, Hp:2 * Hp]
            o_g = sig[:, 2 * Hp:3 * Hp]
            g_g = jnp.tanh(gates[:, 3 * Hp:])
            c_new = f_g * c_prev + i_g * g_g
            h_new = o_g * jnp.tanh(c_new)
            return h_new, c_new

        def step(t, carry):
            h, c = carry  # tuples of (B, Hp) per layer

            # Layer 0: x-projection (incl. combined bias) precomputed in wrapper.
            gates = xproj_ref[t] + jnp.dot(
                h[0], whh0, preferred_element_type=jnp.float32)
            h0, c0 = cell(gates, c[0])
            new_h, new_c = [h0], [c0]
            inp = h0

            # Layers 1..L-1: fused [W_ih; W_hh] matmul on concat([inp, h_l]).
            for l in range(1, num_layers):
                wcat, bias = upper[l - 1]
                xcat = jnp.concatenate([inp, h[l]], axis=1)              # (B, 2Hp)
                gates = jnp.dot(xcat, wcat,
                                preferred_element_type=jnp.float32) + bias
                hl, cl = cell(gates, c[l])
                new_h.append(hl)
                new_c.append(cl)
                inp = hl

            # Only the top-layer h is stored; the linear head runs batched
            # outside the serial recurrence.
            out_ref[t] = inp.astype(out_ref.dtype)
            return tuple(new_h), tuple(new_c)

        zeros = tuple(jnp.zeros((B, Hp), jnp.float32) for _ in range(num_layers))
        carry = (zeros, zeros)
        if T <= 16:
            # Small fixed trip-count: fully unroll for LLO scheduler visibility.
            for t in range(T):
                carry = step(t, carry)
        else:
            carry = jax.lax.fori_loop(0, T, step, carry, unroll=4)

    return kernel


# -----------------------------------------------------------------------------
# Wrapper: gate permutation + lane padding, layer-0 projection, batched head.
# -----------------------------------------------------------------------------
def deep_tvar_lstm_forward(x, params):
    """x: (seq_len, batch, input_size) f32.  params: dict of weights."""
    seq_len, batch, input_size = x.shape
    num_layers = params["num_layers"]
    H = params["hidden_dim"]
    m, order = params["m"], params["order"]
    num_A = order * m * m
    num_cov = (m * (m + 1)) // 2
    out_dim = num_A + num_cov
    Hp = ((H + 127) // 128) * 128            # lane-pad hidden dim to 128 multiple

    def perm_pad(w, rows_pad):
        """(rows, 4H) in torch order [i,f,g,o] -> (rows_pad, 4Hp) in [i,f,o,g],
        zero-padded (padded lanes of gates/bias stay exactly 0)."""
        rows = w.shape[0]
        blocks = (w[:, 0:H], w[:, H:2 * H], w[:, 3 * H:4 * H], w[:, 2 * H:3 * H])
        out = jnp.zeros((rows_pad, 4 * Hp), jnp.float32)
        for gi, blk in enumerate(blocks):
            out = out.at[:rows, gi * Hp:gi * Hp + H].set(blk)
        return out

    # Layer 0: permute/pad weights, precompute x-projection for ALL timesteps.
    wih0, whh0, b0 = params["lstm"][0]
    wih0_pp = perm_pad(wih0, wih0.shape[0])        # (input_size, 4Hp)
    b0_pp = perm_pad(b0, 1)                        # (1, 4Hp)
    whh0_pp = perm_pad(whh0, Hp)                   # (Hp, 4Hp)
    xproj = (jnp.einsum("tbi,ih->tbh", x, wih0_pp) + b0_pp[0]).astype(jnp.float32)

    flat_inputs = [xproj, whh0_pp]
    for l in range(1, num_layers):
        wih, whh, b = params["lstm"][l]
        wcat = jnp.concatenate([perm_pad(wih, Hp), perm_pad(whh, Hp)], axis=0)
        flat_inputs += [wcat, perm_pad(b, 1)]      # (2Hp, 4Hp), (1, 4Hp)

    kernel = _make_kernel(num_layers, Hp, seq_len, batch)

    # Explicit VMEM budget from the actual resident footprint (+ margin).
    out_bytes = seq_len * batch * Hp * 4
    in_bytes = sum(int(a.size) * 4 for a in flat_inputs)
    vmem_limit = int(min(64 * 1024 * 1024,
                         max(2 * (in_bytes + out_bytes) + (2 << 20), 16 << 20)))

    h_top = pl.pallas_call(
        kernel,
        out_shape=jax.ShapeDtypeStruct((seq_len, batch, Hp), jnp.float32),
        in_specs=[pl.BlockSpec(memory_space=pltpu.MemorySpace.VMEM)] * len(flat_inputs),
        out_specs=pl.BlockSpec(memory_space=pltpu.MemorySpace.VMEM),
        compiler_params=pltpu.CompilerParams(vmem_limit_bytes=vmem_limit),
    )(*flat_inputs)

    # Linear head as ONE batched matmul over all timesteps (outside the kernel).
    wlin_pad = jnp.zeros((Hp, out_dim), jnp.float32).at[:H, :].set(params["wlin"])
    curve = jnp.einsum("tbh,hd->tbd", h_top, wlin_pad) + params["blin"][0]

    A_coeffs_of_VAR_p = curve[:, :, 0:num_A]
    lower_traig_parms = curve[:, :, num_A:num_A + num_cov]
    return A_coeffs_of_VAR_p, lower_traig_parms, params["initial_var_cov"]


# -----------------------------------------------------------------------------
# Pure-JAX reference (mirrors torch.nn.LSTM + nn.Linear semantics).
# -----------------------------------------------------------------------------
def reference_forward(x, params):
    num_layers = params["num_layers"]
    H = params["hidden_dim"]
    m, order = params["m"], params["order"]
    num_A = order * m * m
    num_cov = (m * (m + 1)) // 2
    seq_len, batch, _ = x.shape

    h = [jnp.zeros((batch, H), jnp.float32) for _ in range(num_layers)]
    c = [jnp.zeros((batch, H), jnp.float32) for _ in range(num_layers)]
    outs = []
    for t in range(seq_len):
        inp = x[t]
        for l in range(num_layers):
            wih, whh, b = params["lstm"][l]
            gates = inp @ wih + h[l] @ whh + b[0]
            i_g = jax.nn.sigmoid(gates[:, 0:H])
            f_g = jax.nn.sigmoid(gates[:, H:2 * H])
            g_g = jnp.tanh(gates[:, 2 * H:3 * H])
            o_g = jax.nn.sigmoid(gates[:, 3 * H:4 * H])
            c[l] = f_g * c[l] + i_g * g_g
            h[l] = o_g * jnp.tanh(c[l])
            inp = h[l]
        outs.append(inp @ params["wlin"] + params["blin"][0])
    curve = jnp.stack(outs, axis=0)
    return (curve[:, :, :num_A], curve[:, :, num_A:num_A + num_cov],
            params["initial_var_cov"])


# -----------------------------------------------------------------------------
# Deterministic parameter construction (shapes match the PyTorch __init__).
# -----------------------------------------------------------------------------
def init_params(key, input_size, hidden_dim, num_layers, m, order):
    num_A = order * m * m
    num_cov = (m * (m + 1)) // 2
    out_dim = num_A + num_cov
    mp = m * order
    n_init = (mp * (mp + 1)) // 2

    keys = jax.random.split(key, 4 * num_layers + 3)
    scale = 1.0 / jnp.sqrt(hidden_dim)
    lstm = []
    ki = 0
    for l in range(num_layers):
        feat_in = input_size if l == 0 else hidden_dim
        # stored pre-transposed: (feat_in, 4H), (H, 4H); combined bias (1, 4H)
        wih = jax.random.uniform(keys[ki], (feat_in, 4 * hidden_dim),
                                 minval=-scale, maxval=scale, dtype=jnp.float32); ki += 1
        whh = jax.random.uniform(keys[ki], (hidden_dim, 4 * hidden_dim),
                                 minval=-scale, maxval=scale, dtype=jnp.float32); ki += 1
        b_ih = jax.random.uniform(keys[ki], (4 * hidden_dim,),
                                  minval=-scale, maxval=scale, dtype=jnp.float32); ki += 1
        b_hh = jax.random.uniform(keys[ki], (4 * hidden_dim,),
                                  minval=-scale, maxval=scale, dtype=jnp.float32); ki += 1
        lstm.append((wih, whh, (b_ih + b_hh).reshape(1, 4 * hidden_dim)))

    wlin = jax.random.uniform(keys[ki], (hidden_dim, out_dim),
                              minval=-scale, maxval=scale, dtype=jnp.float32); ki += 1
    blin = jax.random.uniform(keys[ki], (1, out_dim),
                              minval=-scale, maxval=scale, dtype=jnp.float32); ki += 1
    initial_var_cov = jax.random.normal(keys[ki], (n_init,), dtype=jnp.float32)

    return dict(lstm=lstm, wlin=wlin, blin=blin, initial_var_cov=initial_var_cov,
                num_layers=num_layers, hidden_dim=hidden_dim, m=m, order=order)


if __name__ == "__main__":
    # Small, module-consistent shapes.
    input_size = 4      # dimension of t-functions
    hidden_dim = 32
    num_layers = 2
    seq_len = 8
    batch = 2
    m = 2               # VAR dimension
    order = 2           # VAR order
    # => num_A = 8, num_cov = 3, linear out_dim = 11

    key = jax.random.PRNGKey(0)
    kp, kx = jax.random.split(key)
    params = init_params(kp, input_size, hidden_dim, num_layers, m, order)
    x = jax.random.normal(kx, (seq_len, batch, input_size), dtype=jnp.float32)

    A_k, L_k, init_k = deep_tvar_lstm_forward(x, params)
    jax.block_until_ready((A_k, L_k, init_k))

    A_r, L_r, init_r = reference_forward(x, params)

    assert A_k.shape == (seq_len, batch, order * m * m)
    assert L_k.shape == (seq_len, batch, (m * (m + 1)) // 2)
    assert init_k.shape == ((m * order) * (m * order + 1) // 2,)
    assert jnp.allclose(A_k, A_r, atol=1e-5, rtol=1e-5)
    assert jnp.allclose(L_k, L_r, atol=1e-5, rtol=1e-5)
    assert jnp.allclose(init_k, init_r)

    print("KERNEL_OK")
</pallas_src>

<mosaic_0001>
module attributes {stable_mosaic.version = 11 : i64} {
  func.func @kernel(%arg0: memref<8x2x512xf32, #tpu.memory_space<vmem>>, %arg1: memref<128x512xf32, #tpu.memory_space<vmem>>, %arg2: memref<256x512xf32, #tpu.memory_space<vmem>>, %arg3: memref<1x512xf32, #tpu.memory_space<vmem>>, %arg4: memref<8x2x128xf32, #tpu.memory_space<vmem>>) attributes {dimension_semantics = [], scalar_prefetch = 0 : i64, scratch_operands = 0 : i64, tpu.core_type = #tpu.core_type<tc>} {
    %c0 = arith.constant 0 : index
    %c0_0 = arith.constant 0 : index
    %0 = vector.load %arg1[%c0, %c0_0] : memref<128x512xf32, #tpu.memory_space<vmem>>, vector<128x512xf32>
    %c0_1 = arith.constant 0 : index
    %c0_2 = arith.constant 0 : index
    %1 = vector.load %arg2[%c0_1, %c0_2] : memref<256x512xf32, #tpu.memory_space<vmem>>, vector<256x512xf32>
    %c0_3 = arith.constant 0 : index
    %c0_4 = arith.constant 0 : index
    %2 = vector.load %arg3[%c0_3, %c0_4] : memref<1x512xf32, #tpu.memory_space<vmem>>, vector<1x512xf32>
    %3 = vector.shape_cast %2 : vector<1x512xf32> to vector<1x512xf32>
    %4 = vector.broadcast %3 : vector<1x512xf32> to vector<2x512xf32>
    %cst = arith.constant 0.000000e+00 : f32
    %5 = vector.broadcast %cst : f32 to vector<2x128xf32>
    %cst_5 = arith.constant 0.000000e+00 : f32
    %6 = vector.broadcast %cst_5 : f32 to vector<2x128xf32>
    %c0_6 = arith.constant 0 : index
    %c0_7 = arith.constant 0 : index
    %c0_8 = arith.constant 0 : index
    %7 = vector.load %arg0[%c0_6, %c0_7, %c0_8] : memref<8x2x512xf32, #tpu.memory_space<vmem>>, vector<1x2x512xf32>
    %8 = vector.shape_cast %7 : vector<1x2x512xf32> to vector<2x512xf32>
    %cst_9 = arith.constant dense<0.000000e+00> : vector<2x512xf32>
    %9 = tpu.matmul %5, %0, %cst_9 {dimension_numbers = #tpu.dot_dimension_numbers<[1], [0], [0], [1], [0, 0, 1, 1], [], []>} : vector<2x128xf32>, vector<128x512xf32>, vector<2x512xf32> -> vector<2x512xf32>
    %10 = arith.addf %8, %9 : vector<2x512xf32>
    %11 = vector.extract_strided_slice %10 {offsets = [0, 0], sizes = [2, 384], strides = [1, 1]} : vector<2x512xf32> to vector<2x384xf32>
    %12 = arith.negf %11 : vector<2x384xf32>
    %13 = math.exp %12 : vector<2x384xf32>
    %cst_10 = arith.constant 1.000000e+00 : f32
    %14 = vector.broadcast %cst_10 : f32 to vector<2x384xf32>
    %15 = arith.addf %14, %13 : vector<2x384xf32>
    %16 = arith.divf %14, %15 : vector<2x384xf32>
    %17 = vector.extract_strided_slice %16 {offsets = [0, 0], sizes = [2, 128], strides = [1, 1]} : vector<2x384xf32> to vector<2x128xf32>
    %18 = vector.extract_strided_slice %16 {offsets = [0, 128], sizes = [2, 128], strides = [1, 1]} : vector<2x384xf32> to vector<2x128xf32>
    %19 = vector.extract_strided_slice %16 {offsets = [0, 256], sizes = [2, 128], strides = [1, 1]} : vector<2x384xf32> to vector<2x128xf32>
    %20 = vector.extract_strided_slice %10 {offsets = [0, 384], sizes = [2, 128], strides = [1, 1]} : vector<2x512xf32> to vector<2x128xf32>
    %21 = math.tanh %20 : vector<2x128xf32>
    %22 = arith.mulf %18, %5 : vector<2x128xf32>
    %23 = arith.mulf %17, %21 : vector<2x128xf32>
    %24 = arith.addf %22, %23 : vector<2x128xf32>
    %25 = math.tanh %24 : vector<2x128xf32>
    %26 = arith.mulf %19, %25 : vector<2x128xf32>
    %27 = tpu.concatenate %26, %6 in 1 : vector<2x128xf32>, vector<2x128xf32> -> vector<2x256xf32>
    %cst_11 = arith.constant dense<0.000000e+00> : vector<2x512xf32>
    %28 = tpu.matmul %27, %1, %cst_11 {dimension_numbers = #tpu.dot_dimension_numbers<[1], [0], [0], [1], [0, 0, 1, 1], [], []>} : vector<2x256xf32>, vector<256x512xf32>, vector<2x512xf32> -> vector<2x512xf32>
    %29 = arith.addf %28, %4 : vector<2x512xf32>
    %30 = vector.extract_strided_slice %29 {offsets = [0, 0], sizes = [2, 384], strides = [1, 1]} : vector<2x512xf32> to vector<2x384xf32>
    %31 = arith.negf %30 : vector<2x384xf32>
    %32 = math.exp %31 : vector<2x384xf32>
    %cst_12 = arith.constant 1.000000e+00 : f32
    %33 = vector.broadcast %cst_12 : f32 to vector<2x384xf32>
    %34 = arith.addf %33, %32 : vector<2x384xf32>
    %35 = arith.divf %33, %34 : vector<2x384xf32>
    %36 = vector.extract_strided_slice %35 {offsets = [0, 0], sizes = [2, 128], strides = [1, 1]} : vector<2x384xf32> to vector<2x128xf32>
    %37 = vector.extract_strided_slice %35 {offsets = [0, 128], sizes = [2, 128], strides = [1, 1]} : vector<2x384xf32> to vector<2x128xf32>
    %38 = vector.extract_strided_slice %35 {offsets = [0, 256], sizes = [2, 128], strides = [1, 1]} : vector<2x384xf32> to vector<2x128xf32>
    %39 = vector.extract_strided_slice %29 {offsets = [0, 384], sizes = [2, 128], strides = [1, 1]} : vector<2x512xf32> to vector<2x128xf32>
    %40 = math.tanh %39 : vector<2x128xf32>
    %41 = arith.mulf %37, %6 : vector<2x128xf32>
    %42 = arith.mulf %36, %40 : vector<2x128xf32>
    %43 = arith.addf %41, %42 : vector<2x128xf32>
    %44 = math.tanh %43 : vector<2x128xf32>
    %45 = arith.mulf %38, %44 : vector<2x128xf32>
    %c0_13 = arith.constant 0 : index
    %c0_14 = arith.constant 0 : index
    %c0_15 = arith.constant 0 : index
    %46 = vector.load %arg4[%c0_13, %c0_14, %c0_15] : memref<8x2x128xf32, #tpu.memory_space<vmem>>, vector<1x2x128xf32>
    %47 = vector.shape_cast %46 : vector<1x2x128xf32> to vector<2x128xf32>
    %48 = vector.shape_cast %45 : vector<2x128xf32> to vector<1x2x128xf32>
    tpu.vector_store %arg4[%c0_13, %c0_14, %c0_15], %48 {strides = array<i32>} : memref<8x2x128xf32, #tpu.memory_space<vmem>>, vector<1x2x128xf32>,
    %c1 = arith.constant 1 : index
    %c0_16 = arith.constant 0 : index
    %c0_17 = arith.constant 0 : index
    %49 = vector.load %arg0[%c1, %c0_16, %c0_17] : memref<8x2x512xf32, #tpu.memory_space<vmem>>, vector<1x2x512xf32>
    %50 = vector.shape_cast %49 : vector<1x2x512xf32> to vector<2x512xf32>
    %cst_18 = arith.constant dense<0.000000e+00> : vector<2x512xf32>
    %51 = tpu.matmul %26, %0, %cst_18 {dimension_numbers = #tpu.dot_dimension_numbers<[1], [0], [0], [1], [0, 0, 1, 1], [], []>} : vector<2x128xf32>, vector<128x512xf32>, vector<2x512xf32> -> vector<2x512xf32>
    %52 = arith.addf %50, %51 : vector<2x512xf32>
    %53 = vector.extract_strided_slice %52 {offsets = [0, 0], sizes = [2, 384], strides = [1, 1]} : vector<2x512xf32> to vector<2x384xf32>
    %54 = arith.negf %53 : vector<2x384xf32>
    %55 = math.exp %54 : vector<2x384xf32>
    %cst_19 = arith.constant 1.000000e+00 : f32
    %56 = vector.broadcast %cst_19 : f32 to vector<2x384xf32>
    %57 = arith.addf %56, %55 : vector<2x384xf32>
    %58 = arith.divf %56, %57 : vector<2x384xf32>
    %59 = vector.extract_strided_slice %58 {offsets = [0, 0], sizes = [2, 128], strides = [1, 1]} : vector<2x384xf32> to vector<2x128xf32>
    %60 = vector.extract_strided_slice %58 {offsets = [0, 128], sizes = [2, 128], strides = [1, 1]} : vector<2x384xf32> to vector<2x128xf32>
    %61 = vector.extract_strided_slice %58 {offsets = [0, 256], sizes = [2, 128], strides = [1, 1]} : vector<2x384xf32> to vector<2x128xf32>
    %62 = vector.extract_strided_slice %52 {offsets = [0, 384], sizes = [2, 128], strides = [1, 1]} : vector<2x512xf32> to vector<2x128xf32>
    %63 = math.tanh %62 : vector<2x128xf32>
    %64 = arith.mulf %60, %24 : vector<2x128xf32>
    %65 = arith.mulf %59, %63 : vector<2x128xf32>
    %66 = arith.addf %64, %65 : vector<2x128xf32>
    %67 = math.tanh %66 : vector<2x128xf32>
    %68 = arith.mulf %61, %67 : vector<2x128xf32>
    %69 = tpu.concatenate %68, %45 in 1 : vector<2x128xf32>, vector<2x128xf32> -> vector<2x256xf32>
    %cst_20 = arith.constant dense<0.000000e+00> : vector<2x512xf32>
    %70 = tpu.matmul %69, %1, %cst_20 {dimension_numbers = #tpu.dot_dimension_numbers<[1], [0], [0], [1], [0, 0, 1, 1], [], []>} : vector<2x256xf32>, vector<256x512xf32>, vector<2x512xf32> -> vector<2x512xf32>
    %71 = arith.addf %70, %4 : vector<2x512xf32>
    %72 = vector.extract_strided_slice %71 {offsets = [0, 0], sizes = [2, 384], strides = [1, 1]} : vector<2x512xf32> to vector<2x384xf32>
    %73 = arith.negf %72 : vector<2x384xf32>
    %74 = math.exp %73 : vector<2x384xf32>
    %cst_21 = arith.constant 1.000000e+00 : f32
    %75 = vector.broadcast %cst_21 : f32 to vector<2x384xf32>
    %76 = arith.addf %75, %74 : vector<2x384xf32>
    %77 = arith.divf %75, %76 : vector<2x384xf32>
    %78 = vector.extract_strided_slice %77 {offsets = [0, 0], sizes = [2, 128], strides = [1, 1]} : vector<2x384xf32> to vector<2x128xf32>
    %79 = vector.extract_strided_slice %77 {offsets = [0, 128], sizes = [2, 128], strides = [1, 1]} : vector<2x384xf32> to vector<2x128xf32>
    %80 = vector.extract_strided_slice %77 {offsets = [0, 256], sizes = [2, 128], strides = [1, 1]} : vector<2x384xf32> to vector<2x128xf32>
    %81 = vector.extract_strided_slice %71 {offsets = [0, 384], sizes = [2, 128], strides = [1, 1]} : vector<2x512xf32> to vector<2x128xf32>
    %82 = math.tanh %81 : vector<2x128xf32>
    %83 = arith.mulf %79, %43 : vector<2x128xf32>
    %84 = arith.mulf %78, %82 : vector<2x128xf32>
    %85 = arith.addf %83, %84 : vector<2x128xf32>
    %86 = math.tanh %85 : vector<2x128xf32>
    %87 = arith.mulf %80, %86 : vector<2x128xf32>
    %c1_22 = arith.constant 1 : index
    %c0_23 = arith.constant 0 : index
    %c0_24 = arith.constant 0 : index
    %88 = vector.load %arg4[%c1_22, %c0_23, %c0_24] : memref<8x2x128xf32, #tpu.memory_space<vmem>>, vector<1x2x128xf32>
    %89 = vector.shape_cast %88 : vector<1x2x128xf32> to vector<2x128xf32>
    %90 = vector.shape_cast %87 : vector<2x128xf32> to vector<1x2x128xf32>
    tpu.vector_store %arg4[%c1_22, %c0_23, %c0_24], %90 {strides = array<i32>} : memref<8x2x128xf32, #tpu.memory_space<vmem>>, vector<1x2x128xf32>,
    %c2 = arith.constant 2 : index
    %c0_25 = arith.constant 0 : index
    %c0_26 = arith.constant 0 : index
    %91 = vector.load %arg0[%c2, %c0_25, %c0_26] : memref<8x2x512xf32, #tpu.memory_space<vmem>>, vector<1x2x512xf32>
    %92 = vector.shape_cast %91 : vector<1x2x512xf32> to vector<2x512xf32>
    %cst_27 = arith.constant dense<0.000000e+00> : vector<2x512xf32>
    %93 = tpu.matmul %68, %0, %cst_27 {dimension_numbers = #tpu.dot_dimension_numbers<[1], [0], [0], [1], [0, 0, 1, 1], [], []>} : vector<2x128xf32>, vector<128x512xf32>, vector<2x512xf32> -> vector<2x512xf32>
    %94 = arith.addf %92, %93 : vector<2x512xf32>
    %95 = vector.extract_strided_slice %94 {offsets = [0, 0], sizes = [2, 384], strides = [1, 1]} : vector<2x512xf32> to vector<2x384xf32>
    %96 = arith.negf %95 : vector<2x384xf32>
    %97 = math.exp %96 : vector<2x384xf32>
    %cst_28 = arith.constant 1.000000e+00 : f32
    %98 = vector.broadcast %cst_28 : f32 to vector<2x384xf32>
    %99 = arith.addf %98, %97 : vector<2x384xf32>
    %100 = arith.divf %98, %99 : vector<2x384xf32>
    %101 = vector.extract_strided_slice %100 {offsets = [0, 0], sizes = [2, 128], strides = [1, 1]} : vector<2x384xf32> to vector<2x128xf32>
    %102 = vector.extract_strided_slice %100 {offsets = [0, 128], sizes = [2, 128], strides = [1, 1]} : vector<2x384xf32> to vector<2x128xf32>
    %103 = vector.extract_strided_slice %100 {offsets = [0, 256], sizes = [2, 128], strides = [1, 1]} : vector<2x384xf32> to vector<2x128xf32>
    %104 = vector.extract_strided_slice %94 {offsets = [0, 384], sizes = [2, 128], strides = [1, 1]} : vector<2x512xf32> to vector<2x128xf32>
    %105 = math.tanh %104 : vector<2x128xf32>
    %106 = arith.mulf %102, %66 : vector<2x128xf32>
    %107 = arith.mulf %101, %105 : vector<2x128xf32>
    %108 = arith.addf %106, %107 : vector<2x128xf32>
    %109 = math.tanh %108 : vector<2x128xf32>
    %110 = arith.mulf %103, %109 : vector<2x128xf32>
    %111 = tpu.concatenate %110, %87 in 1 : vector<2x128xf32>, vector<2x128xf32> -> vector<2x256xf32>
    %cst_29 = arith.constant dense<0.000000e+00> : vector<2x512xf32>
    %112 = tpu.matmul %111, %1, %cst_29 {dimension_numbers = #tpu.dot_dimension_numbers<[1], [0], [0], [1], [0, 0, 1, 1], [], []>} : vector<2x256xf32>, vector<256x512xf32>, vector<2x512xf32> -> vector<2x512xf32>
    %113 = arith.addf %112, %4 : vector<2x512xf32>
    %114 = vector.extract_strided_slice %113 {offsets = [0, 0], sizes = [2, 384], strides = [1, 1]} : vector<2x512xf32> to vector<2x384xf32>
    %115 = arith.negf %114 : vector<2x384xf32>
    %116 = math.exp %115 : vector<2x384xf32>
    %cst_30 = arith.constant 1.000000e+00 : f32
    %117 = vector.broadcast %cst_30 : f32 to vector<2x384xf32>
    %118 = arith.addf %117, %116 : vector<2x384xf32>
    %119 = arith.divf %117, %118 : vector<2x384xf32>
    %120 = vector.extract_strided_slice %119 {offsets = [0, 0], sizes = [2, 128], strides = [1, 1]} : vector<2x384xf32> to vector<2x128xf32>
    %121 = vector.extract_strided_slice %119 {offsets = [0, 128], sizes = [2, 128], strides = [1, 1]} : vector<2x384xf32> to vector<2x128xf32>
    %122 = vector.extract_strided_slice %119 {offsets = [0, 256], sizes = [2, 128], strides = [1, 1]} : vector<2x384xf32> to vector<2x128xf32>
    %123 = vector.extract_strided_slice %113 {offsets = [0, 384], sizes = [2, 128], strides = [1, 1]} : vector<2x512xf32> to vector<2x128xf32>
    %124 = math.tanh %123 : vector<2x128xf32>
    %125 = arith.mulf %121, %85 : vector<2x128xf32>
    %126 = arith.mulf %120, %124 : vector<2x128xf32>
    %127 = arith.addf %125, %126 : vector<2x128xf32>
    %128 = math.tanh %127 : vector<2x128xf32>
    %129 = arith.mulf %122, %128 : vector<2x128xf32>
    %c2_31 = arith.constant 2 : index
    %c0_32 = arith.constant 0 : index
    %c0_33 = arith.constant 0 : index
    %130 = vector.load %arg4[%c2_31, %c0_32, %c0_33] : memref<8x2x128xf32, #tpu.memory_space<vmem>>, vector<1x2x128xf32>
    %131 = vector.shape_cast %130 : vector<1x2x128xf32> to vector<2x128xf32>
    %132 = vector.shape_cast %129 : vector<2x128xf32> to vector<1x2x128xf32>
    tpu.vector_store %arg4[%c2_31, %c0_32, %c0_33], %132 {strides = array<i32>} : memref<8x2x128xf32, #tpu.memory_space<vmem>>, vector<1x2x128xf32>,
    %c3 = arith.constant 3 : index
    %c0_34 = arith.constant 0 : index
    %c0_35 = arith.constant 0 : index
    %133 = vector.load %arg0[%c3, %c0_34, %c0_35] : memref<8x2x512xf32, #tpu.memory_space<vmem>>, vector<1x2x512xf32>
    %134 = vector.shape_cast %133 : vector<1x2x512xf32> to vector<2x512xf32>
    %cst_36 = arith.constant dense<0.000000e+00> : vector<2x512xf32>
    %135 = tpu.matmul %110, %0, %cst_36 {dimension_numbers = #tpu.dot_dimension_numbers<[1], [0], [0], [1], [0, 0, 1, 1], [], []>} : vector<2x128xf32>, vector<128x512xf32>, vector<2x512xf32> -> vector<2x512xf32>
    %136 = arith.addf %134, %135 : vector<2x512xf32>
    %137 = vector.extract_strided_slice %136 {offsets = [0, 0], sizes = [2, 384], strides = [1, 1]} : vector<2x512xf32> to vector<2x384xf32>
    %138 = arith.negf %137 : vector<2x384xf32>
    %139 = math.exp %138 : vector<2x384xf32>
    %cst_37 = arith.constant 1.000000e+00 : f32
    %140 = vector.broadcast %cst_37 : f32 to vector<2x384xf32>
    %141 = arith.addf %140, %139 : vector<2x384xf32>
    %142 = arith.divf %140, %141 : vector<2x384xf32>
    %143 = vector.extract_strided_slice %142 {offsets = [0, 0], sizes = [2, 128], strides = [1, 1]} : vector<2x384xf32> to vector<2x128xf32>
    %144 = vector.extract_strided_slice %142 {offsets = [0, 128], sizes = [2, 128], strides = [1, 1]} : vector<2x384xf32> to vector<2x128xf32>
    %145 = vector.extract_strided_slice %142 {offsets = [0, 256], sizes = [2, 128], strides = [1, 1]} : vector<2x384xf32> to vector<2x128xf32>
    %146 = vector.extract_strided_slice %136 {offsets = [0, 384], sizes = [2, 128], strides = [1, 1]} : vector<2x512xf32> to vector<2x128xf32>
    %147 = math.tanh %146 : vector<2x128xf32>
    %148 = arith.mulf %144, %108 : vector<2x128xf32>
    %149 = arith.mulf %143, %147 : vector<2x128xf32>
    %150 = arith.addf %148, %149 : vector<2x128xf32>
    %151 = math.tanh %150 : vector<2x128xf32>
    %152 = arith.mulf %145, %151 : vector<2x128xf32>
    %153 = tpu.concatenate %152, %129 in 1 : vector<2x128xf32>, vector<2x128xf32> -> vector<2x256xf32>
    %cst_38 = arith.constant dense<0.000000e+00> : vector<2x512xf32>
    %154 = tpu.matmul %153, %1, %cst_38 {dimension_numbers = #tpu.dot_dimension_numbers<[1], [0], [0], [1], [0, 0, 1, 1], [], []>} : vector<2x256xf32>, vector<256x512xf32>, vector<2x512xf32> -> vector<2x512xf32>
    %155 = arith.addf %154, %4 : vector<2x512xf32>
    %156 = vector.extract_strided_slice %155 {offsets = [0, 0], sizes = [2, 384], strides = [1, 1]} : vector<2x512xf32> to vector<2x384xf32>
    %157 = arith.negf %156 : vector<2x384xf32>
    %158 = math.exp %157 : vector<2x384xf32>
    %cst_39 = arith.constant 1.000000e+00 : f32
    %159 = vector.broadcast %cst_39 : f32 to vector<2x384xf32>
    %160 = arith.addf %159, %158 : vector<2x384xf32>
    %161 = arith.divf %159, %160 : vector<2x384xf32>
    %162 = vector.extract_strided_slice %161 {offsets = [0, 0], sizes = [2, 128], strides = [1, 1]} : vector<2x384xf32> to vector<2x128xf32>
    %163 = vector.extract_strided_slice %161 {offsets = [0, 128], sizes = [2, 128], strides = [1, 1]} : vector<2x384xf32> to vector<2x128xf32>
    %164 = vector.extract_strided_slice %161 {offsets = [0, 256], sizes = [2, 128], strides = [1, 1]} : vector<2x384xf32> to vector<2x128xf32>
    %165 = vector.extract_strided_slice %155 {offsets = [0, 384], sizes = [2, 128], strides = [1, 1]} : vector<2x512xf32> to vector<2x128xf32>
    %166 = math.tanh %165 : vector<2x128xf32>
    %167 = arith.mulf %163, %127 : vector<2x128xf32>
    %168 = arith.mulf %162, %166 : vector<2x128xf32>
    %169 = arith.addf %167, %168 : vector<2x128xf32>
    %170 = math.tanh %169 : vector<2x128xf32>
    %171 = arith.mulf %164, %170 : vector<2x128xf32>
    %c3_40 = arith.constant 3 : index
    %c0_41 = arith.constant 0 : index
    %c0_42 = arith.constant 0 : index
    %172 = vector.load %arg4[%c3_40, %c0_41, %c0_42] : memref<8x2x128xf32, #tpu.memory_space<vmem>>, vector<1x2x128xf32>
    %173 = vector.shape_cast %172 : vector<1x2x128xf32> to vector<2x128xf32>
    %174 = vector.shape_cast %171 : vector<2x128xf32> to vector<1x2x128xf32>
    tpu.vector_store %arg4[%c3_40, %c0_41, %c0_42], %174 {strides = array<i32>} : memref<8x2x128xf32, #tpu.memory_space<vmem>>, vector<1x2x128xf32>,
    %c4 = arith.constant 4 : index
    %c0_43 = arith.constant 0 : index
    %c0_44 = arith.constant 0 : index
    %175 = vector.load %arg0[%c4, %c0_43, %c0_44] : memref<8x2x512xf32, #tpu.memory_space<vmem>>, vector<1x2x512xf32>
    %176 = vector.shape_cast %175 : vector<1x2x512xf32> to vector<2x512xf32>
    %cst_45 = arith.constant dense<0.000000e+00> : vector<2x512xf32>
    %177 = tpu.matmul %152, %0, %cst_45 {dimension_numbers = #tpu.dot_dimension_numbers<[1], [0], [0], [1], [0, 0, 1, 1], [], []>} : vector<2x128xf32>, vector<128x512xf32>, vector<2x512xf32> -> vector<2x512xf32>
    %178 = arith.addf %176, %177 : vector<2x512xf32>
    %179 = vector.extract_strided_slice %178 {offsets = [0, 0], sizes = [2, 384], strides = [1, 1]} : vector<2x512xf32> to vector<2x384xf32>
    %180 = arith.negf %179 : vector<2x384xf32>
    %181 = math.exp %180 : vector<2x384xf32>
    %cst_46 = arith.constant 1.000000e+00 : f32
    %182 = vector.broadcast %cst_46 : f32 to vector<2x384xf32>
    %183 = arith.addf %182, %181 : vector<2x384xf32>
    %184 = arith.divf %182, %183 : vector<2x384xf32>
    %185 = vector.extract_strided_slice %184 {offsets = [0, 0], sizes = [2, 128], strides = [1, 1]} : vector<2x384xf32> to vector<2x128xf32>
    %186 = vector.extract_strided_slice %184 {offsets = [0, 128], sizes = [2, 128], strides = [1, 1]} : vector<2x384xf32> to vector<2x128xf32>
    %187 = vector.extract_strided_slice %184 {offsets = [0, 256], sizes = [2, 128], strides = [1, 1]} : vector<2x384xf32> to vector<2x128xf32>
    %188 = vector.extract_strided_slice %178 {offsets = [0, 384], sizes = [2, 128], strides = [1, 1]} : vector<2x512xf32> to vector<2x128xf32>
    %189 = math.tanh %188 : vector<2x128xf32>
    %190 = arith.mulf %186, %150 : vector<2x128xf32>
    %191 = arith.mulf %185, %189 : vector<2x128xf32>
    %192 = arith.addf %190, %191 : vector<2x128xf32>
    %193 = math.tanh %192 : vector<2x128xf32>
    %194 = arith.mulf %187, %193 : vector<2x128xf32>
    %195 = tpu.concatenate %194, %171 in 1 : vector<2x128xf32>, vector<2x128xf32> -> vector<2x256xf32>
    %cst_47 = arith.constant dense<0.000000e+00> : vector<2x512xf32>
    %196 = tpu.matmul %195, %1, %cst_47 {dimension_numbers = #tpu.dot_dimension_numbers<[1], [0], [0], [1], [0, 0, 1, 1], [], []>} : vector<2x256xf32>, vector<256x512xf32>, vector<2x512xf32> -> vector<2x512xf32>
    %197 = arith.addf %196, %4 : vector<2x512xf32>
    %198 = vector.extract_strided_slice %197 {offsets = [0, 0], sizes = [2, 384], strides = [1, 1]} : vector<2x512xf32> to vector<2x384xf32>
    %199 = arith.negf %198 : vector<2x384xf32>
    %200 = math.exp %199 : vector<2x384xf32>
    %cst_48 = arith.constant 1.000000e+00 : f32
    %201 = vector.broadcast %cst_48 : f32 to vector<2x384xf32>
    %202 = arith.addf %201, %200 : vector<2x384xf32>
    %203 = arith.divf %201, %202 : vector<2x384xf32>
    %204 = vector.extract_strided_slice %203 {offsets = [0, 0], sizes = [2, 128], strides = [1, 1]} : vector<2x384xf32> to vector<2x128xf32>
    %205 = vector.extract_strided_slice %203 {offsets = [0, 128], sizes = [2, 128], strides = [1, 1]} : vector<2x384xf32> to vector<2x128xf32>
    %206 = vector.extract_strided_slice %203 {offsets = [0, 256], sizes = [2, 128], strides = [1, 1]} : vector<2x384xf32> to vector<2x128xf32>
    %207 = vector.extract_strided_slice %197 {offsets = [0, 384], sizes = [2, 128], strides = [1, 1]} : vector<2x512xf32> to vector<2x128xf32>
    %208 = math.tanh %207 : vector<2x128xf32>
    %209 = arith.mulf %205, %169 : vector<2x128xf32>
    %210 = arith.mulf %204, %208 : vector<2x128xf32>
    %211 = arith.addf %209, %210 : vector<2x128xf32>
    %212 = math.tanh %211 : vector<2x128xf32>
    %213 = arith.mulf %206, %212 : vector<2x128xf32>
    %c4_49 = arith.constant 4 : index
    %c0_50 = arith.constant 0 : index
    %c0_51 = arith.constant 0 : index
    %214 = vector.load %arg4[%c4_49, %c0_50, %c0_51] : memref<8x2x128xf32, #tpu.memory_space<vmem>>, vector<1x2x128xf32>
    %215 = vector.shape_cast %214 : vector<1x2x128xf32> to vector<2x128xf32>
    %216 = vector.shape_cast %213 : vector<2x128xf32> to vector<1x2x128xf32>
    tpu.vector_store %arg4[%c4_49, %c0_50, %c0_51], %216 {strides = array<i32>} : memref<8x2x128xf32, #tpu.memory_space<vmem>>, vector<1x2x128xf32>,
    %c5 = arith.constant 5 : index
    %c0_52 = arith.constant 0 : index
    %c0_53 = arith.constant 0 : index
    %217 = vector.load %arg0[%c5, %c0_52, %c0_53] : memref<8x2x512xf32, #tpu.memory_space<vmem>>, vector<1x2x512xf32>
    %218 = vector.shape_cast %217 : vector<1x2x512xf32> to vector<2x512xf32>
    %cst_54 = arith.constant dense<0.000000e+00> : vector<2x512xf32>
    %219 = tpu.matmul %194, %0, %cst_54 {dimension_numbers = #tpu.dot_dimension_numbers<[1], [0], [0], [1], [0, 0, 1, 1], [], []>} : vector<2x128xf32>, vector<128x512xf32>, vector<2x512xf32> -> vector<2x512xf32>
    %220 = arith.addf %218, %219 : vector<2x512xf32>
    %221 = vector.extract_strided_slice %220 {offsets = [0, 0], sizes = [2, 384], strides = [1, 1]} : vector<2x512xf32> to vector<2x384xf32>
    %222 = arith.negf %221 : vector<2x384xf32>
    %223 = math.exp %222 : vector<2x384xf32>
    %cst_55 = arith.constant 1.000000e+00 : f32
    %224 = vector.broadcast %cst_55 : f32 to vector<2x384xf32>
    %225 = arith.addf %224, %223 : vector<2x384xf32>
    %226 = arith.divf %224, %225 : vector<2x384xf32>
    %227 = vector.extract_strided_slice %226 {offsets = [0, 0], sizes = [2, 128], strides = [1, 1]} : vector<2x384xf32> to vector<2x128xf32>
    %228 = vector.extract_strided_slice %226 {offsets = [0, 128], sizes = [2, 128], strides = [1, 1]} : vector<2x384xf32> to vector<2x128xf32>
    %229 = vector.extract_strided_slice %226 {offsets = [0, 256], sizes = [2, 128], strides = [1, 1]} : vector<2x384xf32> to vector<2x128xf32>
    %230 = vector.extract_strided_slice %220 {offsets = [0, 384], sizes = [2, 128], strides = [1, 1]} : vector<2x512xf32> to vector<2x128xf32>
    %231 = math.tanh %230 : vector<2x128xf32>
    %232 = arith.mulf %228, %192 : vector<2x128xf32>
    %233 = arith.mulf %227, %231 : vector<2x128xf32>
    %234 = arith.addf %232, %233 : vector<2x128xf32>
    %235 = math.tanh %234 : vector<2x128xf32>
    %236 = arith.mulf %229, %235 : vector<2x128xf32>
    %237 = tpu.concatenate %236, %213 in 1 : vector<2x128xf32>, vector<2x128xf32> -> vector<2x256xf32>
    %cst_56 = arith.constant dense<0.000000e+00> : vector<2x512xf32>
    %238 = tpu.matmul %237, %1, %cst_56 {dimension_numbers = #tpu.dot_dimension_numbers<[1], [0], [0], [1], [0, 0, 1, 1], [], []>} : vector<2x256xf32>, vector<256x512xf32>, vector<2x512xf32> -> vector<2x512xf32>
    %239 = arith.addf %238, %4 : vector<2x512xf32>
    %240 = vector.extract_strided_slice %239 {offsets = [0, 0], sizes = [2, 384], strides = [1, 1]} : vector<2x512xf32> to vector<2x384xf32>
    %241 = arith.negf %240 : vector<2x384xf32>
    %242 = math.exp %241 : vector<2x384xf32>
    %cst_57 = arith.constant 1.000000e+00 : f32
    %243 = vector.broadcast %cst_57 : f32 to vector<2x384xf32>
    %244 = arith.addf %243, %242 : vector<2x384xf32>
    %245 = arith.divf %243, %244 : vector<2x384xf32>
    %246 = vector.extract_strided_slice %245 {offsets = [0, 0], sizes = [2, 128], strides = [1, 1]} : vector<2x384xf32> to vector<2x128xf32>
    %247 = vector.extract_strided_slice %245 {offsets = [0, 128], sizes = [2, 128], strides = [1, 1]} : vector<2x384xf32> to vector<2x128xf32>
    %248 = vector.extract_strided_slice %245 {offsets = [0, 256], sizes = [2, 128], strides = [1, 1]} : vector<2x384xf32> to vector<2x128xf32>
    %249 = vector.extract_strided_slice %239 {offsets = [0, 384], sizes = [2, 128], strides = [1, 1]} : vector<2x512xf32> to vector<2x128xf32>
    %250 = math.tanh %249 : vector<2x128xf32>
    %251 = arith.mulf %247, %211 : vector<2x128xf32>
    %252 = arith.mulf %246, %250 : vector<2x128xf32>
    %253 = arith.addf %251, %252 : vector<2x128xf32>
    %254 = math.tanh %253 : vector<2x128xf32>
    %255 = arith.mulf %248, %254 : vector<2x128xf32>
    %c5_58 = arith.constant 5 : index
    %c0_59 = arith.constant 0 : index
    %c0_60 = arith.constant 0 : index
    %256 = vector.load %arg4[%c5_58, %c0_59, %c0_60] : memref<8x2x128xf32, #tpu.memory_space<vmem>>, vector<1x2x128xf32>
    %257 = vector.shape_cast %256 : vector<1x2x128xf32> to vector<2x128xf32>
    %258 = vector.shape_cast %255 : vector<2x128xf32> to vector<1x2x128xf32>
    tpu.vector_store %arg4[%c5_58, %c0_59, %c0_60], %258 {strides = array<i32>} : memref<8x2x128xf32, #tpu.memory_space<vmem>>, vector<1x2x128xf32>,
    %c6 = arith.constant 6 : index
    %c0_61 = arith.constant 0 : index
    %c0_62 = arith.constant 0 : index
    %259 = vector.load %arg0[%c6, %c0_61, %c0_62] : memref<8x2x512xf32, #tpu.memory_space<vmem>>, vector<1x2x512xf32>
    %260 = vector.shape_cast %259 : vector<1x2x512xf32> to vector<2x512xf32>
    %cst_63 = arith.constant dense<0.000000e+00> : vector<2x512xf32>
    %261 = tpu.matmul %236, %0, %cst_63 {dimension_numbers = #tpu.dot_dimension_numbers<[1], [0], [0], [1], [0, 0, 1, 1], [], []>} : vector<2x128xf32>, vector<128x512xf32>, vector<2x512xf32> -> vector<2x512xf32>
    %262 = arith.addf %260, %261 : vector<2x512xf32>
    %263 = vector.extract_strided_slice %262 {offsets = [0, 0], sizes = [2, 384], strides = [1, 1]} : vector<2x512xf32> to vector<2x384xf32>
    %264 = arith.negf %263 : vector<2x384xf32>
    %265 = math.exp %264 : vector<2x384xf32>
    %cst_64 = arith.constant 1.000000e+00 : f32
    %266 = vector.broadcast %cst_64 : f32 to vector<2x384xf32>
    %267 = arith.addf %266, %265 : vector<2x384xf32>
    %268 = arith.divf %266, %267 : vector<2x384xf32>
    %269 = vector.extract_strided_slice %268 {offsets = [0, 0], sizes = [2, 128], strides = [1, 1]} : vector<2x384xf32> to vector<2x128xf32>
    %270 = vector.extract_strided_slice %268 {offsets = [0, 128], sizes = [2, 128], strides = [1, 1]} : vector<2x384xf32> to vector<2x128xf32>
    %271 = vector.extract_strided_slice %268 {offsets = [0, 256], sizes = [2, 128], strides = [1, 1]} : vector<2x384xf32> to vector<2x128xf32>
    %272 = vector.extract_strided_slice %262 {offsets = [0, 384], sizes = [2, 128], strides = [1, 1]} : vector<2x512xf32> to vector<2x128xf32>
    %273 = math.tanh %272 : vector<2x128xf32>
    %274 = arith.mulf %270, %234 : vector<2x128xf32>
    %275 = arith.mulf %269, %273 : vector<2x128xf32>
    %276 = arith.addf %274, %275 : vector<2x128xf32>
    %277 = math.tanh %276 : vector<2x128xf32>
    %278 = arith.mulf %271, %277 : vector<2x128xf32>
    %279 = tpu.concatenate %278, %255 in 1 : vector<2x128xf32>, vector<2x128xf32> -> vector<2x256xf32>
    %cst_65 = arith.constant dense<0.000000e+00> : vector<2x512xf32>
    %280 = tpu.matmul %279, %1, %cst_65 {dimension_numbers = #tpu.dot_dimension_numbers<[1], [0], [0], [1], [0, 0, 1, 1], [], []>} : vector<2x256xf32>, vector<256x512xf32>, vector<2x512xf32> -> vector<2x512xf32>
    %281 = arith.addf %280, %4 : vector<2x512xf32>
    %282 = vector.extract_strided_slice %281 {offsets = [0, 0], sizes = [2, 384], strides = [1, 1]} : vector<2x512xf32> to vector<2x384xf32>
    %283 = arith.negf %282 : vector<2x384xf32>
    %284 = math.exp %283 : vector<2x384xf32>
    %cst_66 = arith.constant 1.000000e+00 : f32
    %285 = vector.broadcast %cst_66 : f32 to vector<2x384xf32>
    %286 = arith.addf %285, %284 : vector<2x384xf32>
    %287 = arith.divf %285, %286 : vector<2x384xf32>
    %288 = vector.extract_strided_slice %287 {offsets = [0, 0], sizes = [2, 128], strides = [1, 1]} : vector<2x384xf32> to vector<2x128xf32>
    %289 = vector.extract_strided_slice %287 {offsets = [0, 128], sizes = [2, 128], strides = [1, 1]} : vector<2x384xf32> to vector<2x128xf32>
    %290 = vector.extract_strided_slice %287 {offsets = [0, 256], sizes = [2, 128], strides = [1, 1]} : vector<2x384xf32> to vector<2x128xf32>
    %291 = vector.extract_strided_slice %281 {offsets = [0, 384], sizes = [2, 128], strides = [1, 1]} : vector<2x512xf32> to vector<2x128xf32>
    %292 = math.tanh %291 : vector<2x128xf32>
    %293 = arith.mulf %289, %253 : vector<2x128xf32>
    %294 = arith.mulf %288, %292 : vector<2x128xf32>
    %295 = arith.addf %293, %294 : vector<2x128xf32>
    %296 = math.tanh %295 : vector<2x128xf32>
    %297 = arith.mulf %290, %296 : vector<2x128xf32>
    %c6_67 = arith.constant 6 : index
    %c0_68 = arith.constant 0 : index
    %c0_69 = arith.constant 0 : index
    %298 = vector.load %arg4[%c6_67, %c0_68, %c0_69] : memref<8x2x128xf32, #tpu.memory_space<vmem>>, vector<1x2x128xf32>
    %299 = vector.shape_cast %298 : vector<1x2x128xf32> to vector<2x128xf32>
    %300 = vector.shape_cast %297 : vector<2x128xf32> to vector<1x2x128xf32>
    tpu.vector_store %arg4[%c6_67, %c0_68, %c0_69], %300 {strides = array<i32>} : memref<8x2x128xf32, #tpu.memory_space<vmem>>, vector<1x2x128xf32>,
    %c7 = arith.constant 7 : index
    %c0_70 = arith.constant 0 : index
    %c0_71 = arith.constant 0 : index
    %301 = vector.load %arg0[%c7, %c0_70, %c0_71] : memref<8x2x512xf32, #tpu.memory_space<vmem>>, vector<1x2x512xf32>
    %302 = vector.shape_cast %301 : vector<1x2x512xf32> to vector<2x512xf32>
    %cst_72 = arith.constant dense<0.000000e+00> : vector<2x512xf32>
    %303 = tpu.matmul %278, %0, %cst_72 {dimension_numbers = #tpu.dot_dimension_numbers<[1], [0], [0], [1], [0, 0, 1, 1], [], []>} : vector<2x128xf32>, vector<128x512xf32>, vector<2x512xf32> -> vector<2x512xf32>
    %304 = arith.addf %302, %303 : vector<2x512xf32>
    %305 = vector.extract_strided_slice %304 {offsets = [0, 0], sizes = [2, 384], strides = [1, 1]} : vector<2x512xf32> to vector<2x384xf32>
    %306 = arith.negf %305 : vector<2x384xf32>
    %307 = math.exp %306 : vector<2x384xf32>
    %cst_73 = arith.constant 1.000000e+00 : f32
    %308 = vector.broadcast %cst_73 : f32 to vector<2x384xf32>
    %309 = arith.addf %308, %307 : vector<2x384xf32>
    %310 = arith.divf %308, %309 : vector<2x384xf32>
    %311 = vector.extract_strided_slice %310 {offsets = [0, 0], sizes = [2, 128], strides = [1, 1]} : vector<2x384xf32> to vector<2x128xf32>
    %312 = vector.extract_strided_slice %310 {offsets = [0, 128], sizes = [2, 128], strides = [1, 1]} : vector<2x384xf32> to vector<2x128xf32>
    %313 = vector.extract_strided_slice %310 {offsets = [0, 256], sizes = [2, 128], strides = [1, 1]} : vector<2x384xf32> to vector<2x128xf32>
    %314 = vector.extract_strided_slice %304 {offsets = [0, 384], sizes = [2, 128], strides = [1, 1]} : vector<2x512xf32> to vector<2x128xf32>
    %315 = math.tanh %314 : vector<2x128xf32>
    %316 = arith.mulf %312, %276 : vector<2x128xf32>
    %317 = arith.mulf %311, %315 : vector<2x128xf32>
    %318 = arith.addf %316, %317 : vector<2x128xf32>
    %319 = math.tanh %318 : vector<2x128xf32>
    %320 = arith.mulf %313, %319 : vector<2x128xf32>
    %321 = tpu.concatenate %320, %297 in 1 : vector<2x128xf32>, vector<2x128xf32> -> vector<2x256xf32>
    %cst_74 = arith.constant dense<0.000000e+00> : vector<2x512xf32>
    %322 = tpu.matmul %321, %1, %cst_74 {dimension_numbers = #tpu.dot_dimension_numbers<[1], [0], [0], [1], [0, 0, 1, 1], [], []>} : vector<2x256xf32>, vector<256x512xf32>, vector<2x512xf32> -> vector<2x512xf32>
    %323 = arith.addf %322, %4 : vector<2x512xf32>
    %324 = vector.extract_strided_slice %323 {offsets = [0, 0], sizes = [2, 384], strides = [1, 1]} : vector<2x512xf32> to vector<2x384xf32>
    %325 = arith.negf %324 : vector<2x384xf32>
    %326 = math.exp %325 : vector<2x384xf32>
    %cst_75 = arith.constant 1.000000e+00 : f32
    %327 = vector.broadcast %cst_75 : f32 to vector<2x384xf32>
    %328 = arith.addf %327, %326 : vector<2x384xf32>
    %329 = arith.divf %327, %328 : vector<2x384xf32>
    %330 = vector.extract_strided_slice %329 {offsets = [0, 0], sizes = [2, 128], strides = [1, 1]} : vector<2x384xf32> to vector<2x128xf32>
    %331 = vector.extract_strided_slice %329 {offsets = [0, 128], sizes = [2, 128], strides = [1, 1]} : vector<2x384xf32> to vector<2x128xf32>
    %332 = vector.extract_strided_slice %329 {offsets = [0, 256], sizes = [2, 128], strides = [1, 1]} : vector<2x384xf32> to vector<2x128xf32>
    %333 = vector.extract_strided_slice %323 {offsets = [0, 384], sizes = [2, 128], strides = [1, 1]} : vector<2x512xf32> to vector<2x128xf32>
    %334 = math.tanh %333 : vector<2x128xf32>
    %335 = arith.mulf %331, %295 : vector<2x128xf32>
    %336 = arith.mulf %330, %334 : vector<2x128xf32>
    %337 = arith.addf %335, %336 : vector<2x128xf32>
    %338 = math.tanh %337 : vector<2x128xf32>
    %339 = arith.mulf %332, %338 : vector<2x128xf32>
    %c7_76 = arith.constant 7 : index
    %c0_77 = arith.constant 0 : index
    %c0_78 = arith.constant 0 : index
    %340 = vector.load %arg4[%c7_76, %c0_77, %c0_78] : memref<8x2x128xf32, #tpu.memory_space<vmem>>, vector<1x2x128xf32>
    %341 = vector.shape_cast %340 : vector<1x2x128xf32> to vector<2x128xf32>
    %342 = vector.shape_cast %339 : vector<2x128xf32> to vector<1x2x128xf32>
    tpu.vector_store %arg4[%c7_76, %c0_77, %c0_78], %342 {strides = array<i32>} : memref<8x2x128xf32, #tpu.memory_space<vmem>>, vector<1x2x128xf32>,
    return
  }
}

</mosaic_0001>

<bundles_post_ra>
// kernel: tpu_custom_call.1
= control target key start
LH: loop header
LB: loop body
LE: loop exit
PB: predicated region body
PF: predicated region fallthrough
CT: control target
= control target key end

     0   :  { %9 = vsyncpa [#allocation3], 0  ;;  %s6190_s0 = inlined_call_operand.hbm [shape: f32[8,2,512], index: 0, kind: input, shape index: {}]   ;;  %s6191_s1 = inlined_call_operand.hbm [shape: f32[128,512], index: 1, kind: input, shape index: {}]   ;;  %s6192_s2 = inlined_call_operand.hbm [shape: f32[256,512], index: 2, kind: input, shape index: {}]   ;;  %s6193_s3 = inlined_call_operand.vmem [shape: f32[1,512], index: 3, kind: input, shape index: {}]   ;;  %s6194_s4 = inlined_call_operand.hbm [shape: f32[8,2,128], index: 4, kind: output, shape index: {}]  }
   0x1   :  { %10 = vsyncpa [#allocation6], 0 }
   0x2   :  { %11 = vsyncpa [#allocation4], 0  ;;  %s4994_s15 = smov [#allocation5]   ;;  %s4900_s19 = scalar_lea.hbm %s6191_s1, 8192 }
   0x3   :  { %s29_s16 = sshll.u32 %s4994_s15, 4  ;;  %p4901_p0 = scmp.ne.s32.totalorder %s6191_s1, %s4900_s19  ;;  %s30_s16 = int_to_ptr.vmem [resolvable:$true] %s29_s16 }
   0x4   :  { %p4904_p1 = scmp.lt.u32.totalorder %s4900_s19, %s6191_s1 }
   0x6   :  { %p4906_p2 = pnand %p4904_p1, %p4901_p0 }
   0x8   :  { %4909 = shalt.err (!%p4906_p2)
}
   0x9   :  { %s4910_s24 = scalar_lea.vmem %s30_s16, 8192  ;;  %p4915_p4 = scmp.lt.s32.totalorder %s30_s16, %s30_s16 }
   0xa   :  { %p4911_p3 = scmp.ne.s32.totalorder %s30_s16, %s4910_s24  ;;  %p4916_p5 = scmp.lt.s32.totalorder %s4910_s24, %s4910_s24 }
   0xc   :  { %p4917_p6 = por %p4916_p5, %p4915_p4 }
   0xe   :  { %p4918_p7 = pnand %p4917_p6, %p4911_p3 }
  0x10   :  { %4921 = shalt.err (!%p4918_p7)
}
  0x11   :  { %s4995_s25 = smov 512   ;;  %s4996_s26 = smov 32  }
  0x12   :  { %35 = dma.hbm_to_vmem [thread:$0]  %s6191_s1, 8192, %s30_s16, [#allocation6], %s4995_s25, %s4995_s25, %s4996_s26  }
  0x13   :  { %s4997_s29 = smov [#allocation2]   ;;  %s4922_s7 = scalar_lea.hbm %s6190_s0, 1024 }
  0x14   :  { %s17_s30 = sshll.u32 %s4997_s29, 4  ;;  %p4923_p8 = scmp.ne.s32.totalorder %s6190_s0, %s4922_s7  ;;  %s18_s30 = int_to_ptr.vmem [resolvable:$true] %s17_s30 }
  0x15   :  { %p4926_p9 = scmp.lt.u32.totalorder %s4922_s7, %s6190_s0 }
  0x17   :  { %p4928_p10 = pnand %p4926_p9, %p4923_p8 }
  0x19   :  { %4931 = shalt.err (!%p4928_p10)
}
  0x1a   :  { %s4932_s12 = scalar_lea.vmem %s18_s30, 1024  ;;  %p4937_p12 = scmp.lt.s32.totalorder %s18_s30, %s18_s30 }
  0x1b   :  { %p4933_p11 = scmp.ne.s32.totalorder %s18_s30, %s4932_s12  ;;  %p4938_p13 = scmp.lt.s32.totalorder %s4932_s12, %s4932_s12 }
  0x1d   :  { %p4939_p0 = por %p4938_p13, %p4937_p12 }
  0x1f   :  { %p4940_p1 = pnand %p4939_p0, %p4933_p11 }
  0x21   :  { %4943 = shalt.err (!%p4940_p1)
}
  0x22   :  { %s4998_s1 = smov 128   ;;  %s4999_s13 = smov 8  }
  0x23   :  { %23 = dma.hbm_to_vmem [thread:$0]  %s6190_s0, 1024, %s18_s30, [#allocation3], %s4998_s1, %s4998_s1, %s4999_s13  }
  0x24   :  { %s5000_s16 = smov [#allocation7]   ;;  %s4944_s20 = scalar_lea.hbm %s6192_s2, 16384 }
  0x25   :  { %s41_s17 = sshll.u32 %s5000_s16, 4  ;;  %p4945_p2 = scmp.ne.s32.totalorder %s6192_s2, %s4944_s20  ;;  %s42_s17 = int_to_ptr.vmem [resolvable:$true] %s41_s17 }
  0x26   :  { %p4948_p3 = scmp.lt.u32.totalorder %s4944_s20, %s6192_s2 }
  0x28   :  { %p4950_p4 = pnand %p4948_p3, %p4945_p2 }
  0x2a   :  { %4953 = shalt.err (!%p4950_p4)
}
  0x2b   :  { %s4954_s27 = scalar_lea.vmem %s42_s17, 16384  ;;  %p4959_p6 = scmp.lt.s32.totalorder %s42_s17, %s42_s17 }
  0x2c   :  { %p4955_p5 = scmp.ne.s32.totalorder %s42_s17, %s4954_s27  ;;  %p4960_p7 = scmp.lt.s32.totalorder %s4954_s27, %s4954_s27 }
  0x2e   :  { %p4961_p8 = por %p4960_p7, %p4959_p6 }
  0x30   :  { %p4962_p9 = pnand %p4961_p8, %p4955_p5 }
  0x32   :  { %4965 = shalt.err (!%p4962_p9)
}
  0x33   :  { %47 = dma.hbm_to_vmem [thread:$0]  %s6192_s2, 16384, %s42_s17, [#allocation6], %s4995_s25, %s4995_s25, %s4996_s26  }
  0x34   :  { %4988 = dma.done.wait [#allocation3], 1024  }
  0x35   :  { %4989 = vsyncadd [#allocation3], 4294966272 }
  0x36   :  { %4990 = dma.done.wait [#allocation6], 24576  }
  0x37   :  { %4991 = vsyncadd [#allocation6], 4294942720  ;;  %v6195_v0 = vmov 0.0   ;;  %v60_v1 = vld [vmem:[#allocation5 + $0x8] sm:$0xff]  ;;  %v62_v3 = vld [vmem:[#allocation5 + $0x18] sm:$0xff] }
  0x38   :  { %338 = vmatprep.mubr.f32.mxu0 %v6195_v0  ;;  %409 = vmatprep.mubr.f32.mxu1 %v6195_v0  ;;  %v64_v2 = vld [vmem:[#allocation5 + $0x28] sm:$0xff]  ;;  %v66_v5 = vld [vmem:[#allocation5 + $0x38] sm:$0xff]  ;;  %v59_v6 = vld [vmem:[#allocation5] sm:$0xff] }
  0x39   :  { %v5074_v4 = vpack.c.bf16 %v64_v2, %v60_v1  ;;  %v63_v7 = vld [vmem:[#allocation5 + $0x20] sm:$0xff]  ;;  %v5076_v8 = vpack.c.bf16 %v66_v5, %v62_v3  ;;  %v61_v10 = vld [vmem:[#allocation5 + $0x10] sm:$0xff]  ;;  %v68_v12 = vld [vmem:[#allocation5 + $0x48] sm:$0xff] }
  0x3a   :  { %v5078_v9 = vpack.c.bf16 %v63_v7, %v59_v6  ;;  %v65_v11 = vld [vmem:[#allocation5 + $0x30] sm:$0xff]  ;;  %v72_v14 = vld [vmem:[#allocation5 + $0x68] sm:$0xff]  ;;  %v70_v15 = vld [vmem:[#allocation5 + $0x58] sm:$0xff] }
  0x3b   :  { %6313 = vst [vmem:[#allocation12_spill] sm:$0xff] %v5074_v4  ;;  %6314 = vst [vmem:[#allocation13_spill] sm:$0xff] %v5076_v8  ;;  %3162 = vmatprep.subr.bf16.mxu0 %v5074_v4  ;;  %v5081_v13 = vpack.c.bf16 %v65_v11, %v61_v10  ;;  %v74_v16 = vld [vmem:[#allocation5 + $0x78] sm:$0xff]  ;;  %3194 = vmatprep.subr.bf16.mxu1 %v5076_v8  ;;  %v5085_v17 = vpack.c.bf16 %v72_v14, %v68_v12  ;;  %v67_v19 = vld [vmem:[#allocation5 + $0x40] sm:$0xff] }
  0x3c   :  { %3164 = vmatpush1.bf16.msra.mxu0 %v5078_v9  ;;  %v5087_v18 = vpack.c.bf16 %v74_v16, %v70_v15  ;;  %v71_v20 = vld [vmem:[#allocation5 + $0x60] sm:$0xff]  ;;  %v69_v21 = vld [vmem:[#allocation5 + $0x50] sm:$0xff]  ;;  %v76_v24 = vld [vmem:[#allocation5 + $0x88] sm:$0xff] }
  0x3d   :  { %3196 = vmatpush1.bf16.msra.mxu1 %v5081_v13  ;;  %v5090_v22 = vpack.c.bf16 %v71_v20, %v67_v19  ;;  %v73_v23 = vld [vmem:[#allocation5 + $0x70] sm:$0xff]  ;;  %v80_v25 = vld [vmem:[#allocation5 + $0xa8] sm:$0xff]  ;;  %3166 = vmatprep.subr.bf16.mxu0 %v5085_v17  ;;  %v78_v28 = vld [vmem:[#allocation5 + $0x98] sm:$0xff] }
  0x3e   :  { %3198 = vmatprep.subr.bf16.mxu1 %v5087_v18  ;;  %v5094_v26 = vpack.c.bf16 %v73_v23, %v69_v21  ;;  %v5096_v27 = vpack.c.bf16 %v80_v25, %v76_v24  ;;  %v82_v29 = vld [vmem:[#allocation5 + $0xb8] sm:$0xff]  ;;  %v75_v30 = vld [vmem:[#allocation5 + $0x80] sm:$0xff]  ;;  %v77_v33 = vld [vmem:[#allocation5 + $0x90] sm:$0xff] }
  0x3f   :  { %v5098_v31 = vpack.c.bf16 %v82_v29, %v78_v28  ;;  %v79_v32 = vld [vmem:[#allocation5 + $0xa0] sm:$0xff]  ;;  %v81_v34 = vld [vmem:[#allocation5 + $0xb0] sm:$0xff]  ;;  %v84_v36 = vld [vmem:[#allocation5 + $0xc8] sm:$0xff] }
  0x40   :  { %3168 = vmatpush1.bf16.msra.mxu0 %v5090_v22  ;;  %v5101_v35 = vpack.c.bf16 %v79_v32, %v75_v30  ;;  %v88_v37 = vld [vmem:[#allocation5 + $0xe8] sm:$0xff]  ;;  %v86_v38 = vld [vmem:[#allocation5 + $0xd8] sm:$0xff]  ;;  %v5105_v39 = vpack.c.bf16 %v81_v34, %v77_v33  ;;  %v83_v42 = vld [vmem:[#allocation5 + $0xc0] sm:$0xff] }
  0x41   :  { %3200 = vmatpush1.bf16.msra.mxu1 %v5094_v26  ;;  %3170 = vmatprep.subr.bf16.mxu0 %v5096_v27  ;;  %v5107_v40 = vpack.c.bf16 %v88_v37, %v84_v36  ;;  %v90_v41 = vld [vmem:[#allocation5 + $0xf8] sm:$0xff]  ;;  %v87_v43 = vld [vmem:[#allocation5 + $0xe0] sm:$0xff]  ;;  %v85_v45 = vld [vmem:[#allocation5 + $0xd0] sm:$0xff] }
  0x42   :  { %3202 = vmatprep.subr.bf16.mxu1 %v5098_v31  ;;  %v5110_v44 = vpack.c.bf16 %v90_v41, %v86_v38  ;;  %v89_v46 = vld [vmem:[#allocation5 + $0xf0] sm:$0xff]  ;;  %v92_v47 = vld [vmem:[#allocation5 + $0x108] sm:$0xff]  ;;  %v94_v49 = vld [vmem:[#allocation5 + $0x118] sm:$0xff]  ;;  %v5113_v51 = vpack.c.bf16 %v87_v43, %v83_v42 }
  0x43   :  { %v96_v48 = vld [vmem:[#allocation5 + $0x128] sm:$0xff]  ;;  %v98_v50 = vld [vmem:[#allocation5 + $0x138] sm:$0xff]  ;;  %v5117_v52 = vpack.c.bf16 %v89_v46, %v85_v45  ;;  %v91_v54 = vld [vmem:[#allocation5 + $0x100] sm:$0xff] }
  0x44   :  { %3172 = vmatpush1.bf16.msra.mxu0 %v5101_v35  ;;  %v5119_v53 = vpack.c.bf16 %v96_v48, %v92_v47  ;;  %v95_v55 = vld [vmem:[#allocation5 + $0x120] sm:$0xff]  ;;  %v93_v56 = vld [vmem:[#allocation5 + $0x110] sm:$0xff]  ;;  %v5122_v57 = vpack.c.bf16 %v98_v50, %v94_v49  ;;  %v100_v59 = vld [vmem:[#allocation5 + $0x148] sm:$0xff] }
  0x45   :  { %3204 = vmatpush1.bf16.msra.mxu1 %v5105_v39  ;;  %3174 = vmatprep.subr.bf16.mxu0 %v5107_v40  ;;  %v97_v58 = vld [vmem:[#allocation5 + $0x130] sm:$0xff]  ;;  %v104_v60 = vld [vmem:[#allocation5 + $0x168] sm:$0xff]  ;;  %v102_v61 = vld [vmem:[#allocation5 + $0x158] sm:$0xff]  ;;  %v5125_v63 = vpack.c.bf16 %v95_v55, %v91_v54 }
  0x46   :  { %3206 = vmatprep.subr.bf16.mxu1 %v5110_v44  ;;  %v106_v62 = vld [vmem:[#allocation5 + $0x178] sm:$0xff]  ;;  %v5129_v1 = vpack.c.bf16 %v97_v58, %v93_v56  ;;  %v5131_v2 = vpack.c.bf16 %v104_v60, %v100_v59  ;;  %v99_v3 = vld [vmem:[#allocation5 + $0x140] sm:$0xff]  ;;  %v101_v6 = vld [vmem:[#allocation5 + $0x150] sm:$0xff] }
  0x47   :  { %v103_v5 = vld [vmem:[#allocation5 + $0x160] sm:$0xff]  ;;  %v5134_v7 = vpack.c.bf16 %v106_v62, %v102_v61  ;;  %v105_v10 = vld [vmem:[#allocation5 + $0x170] sm:$0xff]  ;;  %v108_v11 = vld [vmem:[#allocation5 + $0x188] sm:$0xff] }
  0x48   :  { %3176 = vmatpush1.bf16.msra.mxu0 %v5113_v51  ;;  %v112_v12 = vld [vmem:[#allocation5 + $0x1a8] sm:$0xff]  ;;  %v110_v14 = vld [vmem:[#allocation5 + $0x198] sm:$0xff]  ;;  %v5137_v16 = vpack.c.bf16 %v103_v5, %v99_v3  ;;  %v5141_v19 = vpack.c.bf16 %v105_v10, %v101_v6  ;;  %v107_v21 = vld [vmem:[#allocation5 + $0x180] sm:$0xff] }
  0x49   :  { %3208 = vmatpush1.bf16.msra.mxu1 %v5117_v52  ;;  %3178 = vmatprep.subr.bf16.mxu0 %v5119_v53  ;;  %v114_v15 = vld [vmem:[#allocation5 + $0x1b8] sm:$0xff]  ;;  %v5143_v20 = vpack.c.bf16 %v112_v12, %v108_v11  ;;  %v111_v23 = vld [vmem:[#allocation5 + $0x1a0] sm:$0xff]  ;;  %v109_v24 = vld [vmem:[#allocation5 + $0x190] sm:$0xff] }
  0x4a   :  { %3210 = vmatprep.subr.bf16.mxu1 %v5122_v57  ;;  %v5146_v25 = vpack.c.bf16 %v114_v15, %v110_v14  ;;  %v113_v28 = vld [vmem:[#allocation5 + $0x1b0] sm:$0xff]  ;;  %v116_v29 = vld [vmem:[#allocation5 + $0x1c8] sm:$0xff]  ;;  %v118_v32 = vld [vmem:[#allocation5 + $0x1d8] sm:$0xff]  ;;  %v5149_v34 = vpack.c.bf16 %v111_v23, %v107_v21 }
  0x4b   :  { %v120_v30 = vld [vmem:[#allocation5 + $0x1e8] sm:$0xff]  ;;  %v122_v33 = vld [vmem:[#allocation5 + $0x1f8] sm:$0xff]  ;;  %v5153_v36 = vpack.c.bf16 %v113_v28, %v109_v24  ;;  %v115_v38 = vld [vmem:[#allocation5 + $0x1c0] sm:$0xff] }
  0x4c   :  { %3180 = vmatpush1.bf16.msra.mxu0 %v5125_v63  ;;  %v5155_v37 = vpack.c.bf16 %v120_v30, %v116_v29  ;;  %v119_v41 = vld [vmem:[#allocation5 + $0x1e0] sm:$0xff]  ;;  %v117_v42 = vld [vmem:[#allocation5 + $0x1d0] sm:$0xff]  ;;  %v5158_v43 = vpack.c.bf16 %v122_v33, %v118_v32  ;;  %v124_v46 = vld [vmem:[#allocation7 + $0x8] sm:$0xff] }
  0x4d   :  { %3212 = vmatpush1.bf16.msra.mxu1 %v5129_v1  ;;  %3182 = vmatprep.subr.bf16.mxu0 %v5131_v2  ;;  %v121_v45 = vld [vmem:[#allocation5 + $0x1f0] sm:$0xff]  ;;  %v128_v47 = vld [vmem:[#allocation7 + $0x28] sm:$0xff]  ;;  %v126_v48 = vld [vmem:[#allocation7 + $0x18] sm:$0xff]  ;;  %v5161_v50 = vpack.c.bf16 %v119_v41, %v115_v38 }
  0x4e   :  { %3214 = vmatprep.subr.bf16.mxu1 %v5134_v7  ;;  %v130_v49 = vld [vmem:[#allocation7 + $0x38] sm:$0xff]  ;;  %v5165_v54 = vpack.c.bf16 %v121_v45, %v117_v42  ;;  %v5167_v55 = vpack.c.bf16 %v128_v47, %v124_v46  ;;  %v123_v56 = vld [vmem:[#allocation7] sm:$0xff]  ;;  %v125_v59 = vld [vmem:[#allocation7 + $0x10] sm:$0xff] }
  0x4f   :  { %v127_v58 = vld [vmem:[#allocation7 + $0x20] sm:$0xff]  ;;  %v5170_v60 = vpack.c.bf16 %v130_v49, %v126_v48  ;;  %v129_v61 = vld [vmem:[#allocation7 + $0x30] sm:$0xff]  ;;  %v132_v62 = vld [vmem:[#allocation7 + $0x48] sm:$0xff] }
  0x50   :  { %3184 = vmatpush1.bf16.msra.mxu0 %v5137_v16  ;;  %v136_v3 = vld [vmem:[#allocation7 + $0x68] sm:$0xff]  ;;  %v134_v5 = vld [vmem:[#allocation7 + $0x58] sm:$0xff]  ;;  %v5173_v10 = vpack.c.bf16 %v127_v58, %v123_v56  ;;  %v5177_v11 = vpack.c.bf16 %v129_v61, %v125_v59  ;;  %v131_v14 = vld [vmem:[#allocation7 + $0x40] sm:$0xff] }
  0x51   :  { %3216 = vmatpush1.bf16.msra.mxu1 %v5141_v19  ;;  %3186 = vmatprep.subr.bf16.mxu0 %v5143_v20  ;;  %v138_v6 = vld [vmem:[#allocation7 + $0x78] sm:$0xff]  ;;  %v5179_v12 = vpack.c.bf16 %v136_v3, %v132_v62  ;;  %v135_v15 = vld [vmem:[#allocation7 + $0x60] sm:$0xff]  ;;  %v133_v21 = vld [vmem:[#allocation7 + $0x50] sm:$0xff] }
  0x52   :  { %3218 = vmatprep.subr.bf16.mxu1 %v5146_v25  ;;  %v5182_v23 = vpack.c.bf16 %v138_v6, %v134_v5  ;;  %v137_v24 = vld [vmem:[#allocation7 + $0x70] sm:$0xff]  ;;  %v140_v28 = vld [vmem:[#allocation7 + $0x88] sm:$0xff]  ;;  %v142_v30 = vld [vmem:[#allocation7 + $0x98] sm:$0xff]  ;;  %v5187_v33 = vpack.c.bf16 %v135_v15, %v131_v14 }
  0x53   :  { %v144_v29 = vld [vmem:[#allocation7 + $0xa8] sm:$0xff]  ;;  %v146_v32 = vld [vmem:[#allocation7 + $0xb8] sm:$0xff]  ;;  %v5191_v38 = vpack.c.bf16 %v137_v24, %v133_v21  ;;  %v139_v42 = vld [vmem:[#allocation7 + $0x80] sm:$0xff] }
  0x54   :  { %3188 = vmatpush1.bf16.msra.mxu0 %v5149_v34  ;;  %v5193_v41 = vpack.c.bf16 %v144_v29, %v140_v28  ;;  %v143_v45 = vld [vmem:[#allocation7 + $0xa0] sm:$0xff]  ;;  %v5196_v46 = vpack.c.bf16 %v146_v32, %v142_v30  ;;  %v141_v47 = vld [vmem:[#allocation7 + $0x90] sm:$0xff]  ;;  %v148_v58 = vld [vmem:[#allocation7 + $0xc8] sm:$0xff] }
  0x55   :  { %3220 = vmatpush1.bf16.msra.mxu1 %v5153_v36  ;;  %3190 = vmatprep.subr.bf16.mxu0 %v5155_v37  ;;  %v145_v48 = vld [vmem:[#allocation7 + $0xb0] sm:$0xff]  ;;  %v5201_v49 = vpack.c.bf16 %v143_v45, %v139_v42  ;;  %v152_v59 = vld [vmem:[#allocation7 + $0xe8] sm:$0xff]  ;;  %v150_v61 = vld [vmem:[#allocation7 + $0xd8] sm:$0xff] }
  0x56   :  { %3222 = vmatprep.subr.bf16.mxu1 %v5158_v43  ;;  %v5205_v56 = vpack.c.bf16 %v145_v48, %v141_v47  ;;  %v5210_v62 = vpack.c.bf16 %v152_v59, %v148_v58  ;;  %v154_v3 = vld [vmem:[#allocation7 + $0xf8] sm:$0xff]  ;;  %v147_v5 = vld [vmem:[#allocation7 + $0xc0] sm:$0xff]  ;;  %v149_v21 = vld [vmem:[#allocation7 + $0xd0] sm:$0xff] }
  0x57   :  { %v151_v6 = vld [vmem:[#allocation7 + $0xe0] sm:$0xff]  ;;  %v5212_v14 = vpack.c.bf16 %v154_v3, %v150_v61  ;;  %v153_v24 = vld [vmem:[#allocation7 + $0xf0] sm:$0xff]  ;;  %v156_v29 = vld [vmem:[#allocation7 + $0x108] sm:$0xff] }
  0x58   :  { %3192 = vmatpush1.bf16.msra.mxu0 %v5161_v50  ;;  %6315 = vst [vmem:[#allocation14_spill] sm:$0xff] %v5205_v56  ;;  %6316 = vst [vmem:[#allocation15_spill] sm:$0xff] %v5210_v62  ;;  %v5214_v15 = vpack.c.bf16 %v151_v6, %v147_v5  ;;  %v5217_v28 = vpack.c.bf16 %v153_v24, %v149_v21  ;;  %v160_v30 = vld [vmem:[#allocation7 + $0x128] sm:$0xff]  ;;  %v158_v32 = vld [vmem:[#allocation7 + $0x118] sm:$0xff] }
  0x59   :  { %3224 = vmatpush1.bf16.msra.mxu1 %v5165_v54  ;;  %3226 = vmatprep.subr.bf16.mxu0 %v5167_v55  ;;  %6317 = vst [vmem:[#allocation16_spill] sm:$0xff] %v5212_v14  ;;  %v5222_v42 = vpack.c.bf16 %v160_v30, %v156_v29  ;;  %v162_v45 = vld [vmem:[#allocation7 + $0x138] sm:$0xff]  ;;  %v155_v47 = vld [vmem:[#allocation7 + $0x100] sm:$0xff]  ;;  %v157_v61 = vld [vmem:[#allocation7 + $0x110] sm:$0xff] }
  0x5a   :  { %3290 = vmatprep.subr.bf16.mxu1 %v5170_v60  ;;  %6318 = vst [vmem:[#allocation17_spill] sm:$0xff] %v5214_v15  ;;  %6319 = vst [vmem:[#allocation18_spill] sm:$0xff] %v5217_v28  ;;  %v159_v48 = vld [vmem:[#allocation7 + $0x120] sm:$0xff]  ;;  %v5224_v58 = vpack.c.bf16 %v162_v45, %v158_v32  ;;  %v161_v3 = vld [vmem:[#allocation7 + $0x130] sm:$0xff] }
  0x5b   :  { %339 = vmatmul.mubr.f32.vlgmr.msra.gmra.mrb[0].mxu0 %v6195_v0  ;;  %6320 = vst [vmem:[#allocation19_spill] sm:$0xff] %v5222_v42  ;;  %v5226_v59 = vpack.c.bf16 %v159_v48, %v155_v47  ;;  %v5229_v5 = vpack.c.bf16 %v161_v3, %v157_v61  ;;  %v164_v6 = vld [vmem:[#allocation7 + $0x148] sm:$0xff]  ;;  %v166_v24 = vld [vmem:[#allocation7 + $0x158] sm:$0xff]  ;;  %v163_v32 = vld [vmem:[#allocation7 + $0x140] sm:$0xff] }
  0x5c   :  { %410 = vmatmul.mubr.f32.vlgmr.msra.gmra.mrb[0].mxu1 %v6195_v0  ;;  %3228 = vmatpush1.bf16.msra.mxu0 %v5173_v10  ;;  %6321 = vst [vmem:[#allocation20_spill] sm:$0xff] %v5224_v58  ;;  %v168_v21 = vld [vmem:[#allocation7 + $0x168] sm:$0xff]  ;;  %v170_v30 = vld [vmem:[#allocation7 + $0x178] sm:$0xff]  ;;  %v167_v45 = vld [vmem:[#allocation7 + $0x160] sm:$0xff] }
  0x5d   :  { %3292 = vmatpush1.bf16.msra.mxu1 %v5177_v11  ;;  %3230 = vmatprep.subr.bf16.mxu0 %v5179_v12  ;;  %6322 = vst [vmem:[#allocation21_spill] sm:$0xff] %v5226_v59  ;;  %6323 = vst [vmem:[#allocation22_spill] sm:$0xff] %v5229_v5  ;;  %v5234_v29 = vpack.c.bf16 %v168_v21, %v164_v6  ;;  %v5236_v47 = vpack.c.bf16 %v170_v30, %v166_v24  ;;  %v165_v61 = vld [vmem:[#allocation7 + $0x150] sm:$0xff]  ;;  %v176_v6 = vld [vmem:[#allocation7 + $0x1a8] sm:$0xff] }
  0x5e   :  { %3294 = vmatprep.subr.bf16.mxu1 %v5182_v23  ;;  %523 = vmatprep.mubr.f32.mxu0 %v6195_v0  ;;  %v5238_v48 = vpack.c.bf16 %v167_v45, %v163_v32  ;;  %v169_v3 = vld [vmem:[#allocation7 + $0x170] sm:$0xff]  ;;  %v174_v21 = vld [vmem:[#allocation7 + $0x198] sm:$0xff]  ;;  %v171_v30 = vld [vmem:[#allocation7 + $0x180] sm:$0xff] }
  0x5f   :  { %594 = vmatprep.mubr.f32.mxu1 %v6195_v0  ;;  %6324 = vst [vmem:[#allocation23_spill] sm:$0xff] %v5234_v29  ;;  %6325 = vst [vmem:[#allocation24_spill] sm:$0xff] %v5236_v47  ;;  %v5241_v0 = vpack.c.bf16 %v169_v3, %v165_v61  ;;  %v178_v24 = vld [vmem:[#allocation7 + $0x1b8] sm:$0xff]  ;;  %v175_v32 = vld [vmem:[#allocation7 + $0x1a0] sm:$0xff] }
  0x60   :  { %3232 = vmatpush1.bf16.msra.mxu0 %v5187_v33  ;;  %6326 = vst [vmem:[#allocation25_spill] sm:$0xff] %v5238_v48  ;;  %v5248_v45 = vpack.c.bf16 %v178_v24, %v174_v21  ;;  %v173_v61 = vld [vmem:[#allocation7 + $0x190] sm:$0xff]  ;;  %v186_v21 = vld [vmem:[#allocation7 + $0x1f8] sm:$0xff]  ;;  %v179_v24 = vld [vmem:[#allocation7 + $0x1c0] sm:$0xff] }
  0x61   :  { %3296 = vmatpush1.bf16.msra.mxu1 %v5191_v38  ;;  %3234 = vmatprep.subr.bf16.mxu0 %v5193_v41  ;;  %6327 = vst [vmem:[#allocation26_spill] sm:$0xff] %v5241_v0  ;;  %v177_v3 = vld [vmem:[#allocation7 + $0x1b0] sm:$0xff] }
  0x62   :  { %3298 = vmatprep.subr.bf16.mxu1 %v5196_v46  ;;  %6329 = vst [vmem:[#allocation28_spill] sm:$0xff] %v5248_v45 }
  0x64   :  { %3236 = vmatpush1.bf16.msra.mxu0 %v5201_v49 }
  0x65   :  { %3300 = vmatpush1.bf16.msra.mxu1 %v5205_v56  ;;  %3238 = vmatprep.subr.bf16.mxu0 %v5210_v62 }
  0x66   :  { %3302 = vmatprep.subr.bf16.mxu1 %v5212_v14  ;;  %v246_v14 = vld [vmem:[#allocation7 + $0x3d8] sm:$0xff] }
  0x68   :  { %3240 = vmatpush1.bf16.msra.mxu0 %v5214_v15  ;;  %v244_v15 = vld [vmem:[#allocation7 + $0x3c8] sm:$0xff] }
  0x69   :  { %3304 = vmatpush1.bf16.msra.mxu1 %v5217_v28  ;;  %3242 = vmatprep.subr.bf16.mxu0 %v5222_v42  ;;  %v230_v42 = vld [vmem:[#allocation7 + $0x358] sm:$0xff] }
  0x6a   :  { %3306 = vmatprep.subr.bf16.mxu1 %v5224_v58  ;;  %v5250_v58 = vpack.c.bf16 %v175_v32, %v171_v30  ;;  %v183_v30 = vld [vmem:[#allocation7 + $0x1e0] sm:$0xff]  ;;  %v234_v28 = vld [vmem:[#allocation7 + $0x378] sm:$0xff] }
  0x6c   :  { %3244 = vmatpush1.bf16.msra.mxu0 %v5226_v59  ;;  %6330 = vst [vmem:[#allocation29_spill] sm:$0xff] %v5250_v58 }
  0x6d   :  { %3308 = vmatpush1.bf16.msra.mxu1 %v5229_v5  ;;  %3246 = vmatprep.subr.bf16.mxu0 %v5234_v29  ;;  %v172_v5 = vld [vmem:[#allocation7 + $0x188] sm:$0xff]  ;;  %v5262_v29 = vpack.c.bf16 %v183_v30, %v179_v24  ;;  %v191_v24 = vld [vmem:[#allocation7 + $0x220] sm:$0xff] }
  0x6e   :  { %3310 = vmatprep.subr.bf16.mxu1 %v5236_v47  ;;  %v5246_v59 = vpack.c.bf16 %v176_v6, %v172_v5  ;;  %v5253_v47 = vpack.c.bf16 %v177_v3, %v173_v61  ;;  %v184_v5 = vld [vmem:[#allocation7 + $0x1e8] sm:$0xff]  ;;  %v182_v6 = vld [vmem:[#allocation7 + $0x1d8] sm:$0xff]  ;;  %v181_v61 = vld [vmem:[#allocation7 + $0x1d0] sm:$0xff] }
  0x6f   :  { %v5260_v32 = vpack.c.bf16 %v186_v21, %v182_v6  ;;  %6334 = vst [vmem:[#allocation33_spill] sm:$0xff] %v5262_v29  ;;  %v185_v3 = vld [vmem:[#allocation7 + $0x1f0] sm:$0xff]  ;;  %v194_v6 = vld [vmem:[#allocation7 + $0x238] sm:$0xff]  ;;  %v187_v21 = vld [vmem:[#allocation7 + $0x200] sm:$0xff] }
  0x70   :  { %3248 = vmatpush1.bf16.msra.mxu0 %v5238_v48  ;;  %6328 = vst [vmem:[#allocation27_spill] sm:$0xff] %v5246_v59  ;;  %6331 = vst [vmem:[#allocation30_spill] sm:$0xff] %v5253_v47 }
  0x71   :  { %3312 = vmatpush1.bf16.msra.mxu1 %v5241_v0  ;;  %3250 = vmatprep.subr.bf16.mxu0 %v5246_v59  ;;  %v180_v0 = vld [vmem:[#allocation7 + $0x1c8] sm:$0xff]  ;;  %6333 = vst [vmem:[#allocation32_spill] sm:$0xff] %v5260_v32  ;;  %v5274_v59 = vpack.c.bf16 %v191_v24, %v187_v21  ;;  %v199_v21 = vld [vmem:[#allocation7 + $0x260] sm:$0xff] }
  0x72   :  { %3314 = vmatprep.subr.bf16.mxu1 %v5248_v45  ;;  %v5258_v48 = vpack.c.bf16 %v184_v5, %v180_v0  ;;  %v5265_v45 = vpack.c.bf16 %v185_v3, %v181_v61  ;;  %v192_v0 = vld [vmem:[#allocation7 + $0x228] sm:$0xff]  ;;  %v190_v5 = vld [vmem:[#allocation7 + $0x218] sm:$0xff]  ;;  %v189_v61 = vld [vmem:[#allocation7 + $0x210] sm:$0xff] }
  0x73   :  { %v5272_v30 = vpack.c.bf16 %v194_v6, %v190_v5  ;;  %6338 = vst [vmem:[#allocation37_spill] sm:$0xff] %v5274_v59  ;;  %v193_v3 = vld [vmem:[#allocation7 + $0x230] sm:$0xff]  ;;  %v202_v5 = vld [vmem:[#allocation7 + $0x278] sm:$0xff]  ;;  %v195_v6 = vld [vmem:[#allocation7 + $0x240] sm:$0xff] }
  0x74   :  { %3252 = vmatpush1.bf16.msra.mxu0 %v5250_v58  ;;  %6332 = vst [vmem:[#allocation31_spill] sm:$0xff] %v5258_v48  ;;  %6335 = vst [vmem:[#allocation34_spill] sm:$0xff] %v5265_v45 }
  0x75   :  { %3316 = vmatpush1.bf16.msra.mxu1 %v5253_v47  ;;  %3254 = vmatprep.subr.bf16.mxu0 %v5258_v48  ;;  %v188_v47 = vld [vmem:[#allocation7 + $0x208] sm:$0xff]  ;;  %6337 = vst [vmem:[#allocation36_spill] sm:$0xff] %v5272_v30  ;;  %v5286_v48 = vpack.c.bf16 %v199_v21, %v195_v6  ;;  %v207_v6 = vld [vmem:[#allocation7 + $0x2a0] sm:$0xff] }
  0x76   :  { %3318 = vmatprep.subr.bf16.mxu1 %v5260_v32  ;;  %v5270_v58 = vpack.c.bf16 %v192_v0, %v188_v47  ;;  %v5277_v32 = vpack.c.bf16 %v193_v3, %v189_v61  ;;  %v200_v47 = vld [vmem:[#allocation7 + $0x268] sm:$0xff]  ;;  %v198_v0 = vld [vmem:[#allocation7 + $0x258] sm:$0xff]  ;;  %v197_v61 = vld [vmem:[#allocation7 + $0x250] sm:$0xff] }
  0x77   :  { %v5284_v24 = vpack.c.bf16 %v202_v5, %v198_v0  ;;  %6342 = vst [vmem:[#allocation41_spill] sm:$0xff] %v5286_v48  ;;  %v201_v3 = vld [vmem:[#allocation7 + $0x270] sm:$0xff]  ;;  %v210_v0 = vld [vmem:[#allocation7 + $0x2b8] sm:$0xff]  ;;  %v203_v5 = vld [vmem:[#allocation7 + $0x280] sm:$0xff] }
  0x78   :  { %3256 = vmatpush1.bf16.msra.mxu0 %v5262_v29  ;;  %6336 = vst [vmem:[#allocation35_spill] sm:$0xff] %v5270_v58  ;;  %6339 = vst [vmem:[#allocation38_spill] sm:$0xff] %v5277_v32 }
  0x79   :  { %3320 = vmatpush1.bf16.msra.mxu1 %v5265_v45  ;;  %3258 = vmatprep.subr.bf16.mxu0 %v5270_v58  ;;  %v196_v45 = vld [vmem:[#allocation7 + $0x248] sm:$0xff]  ;;  %6341 = vst [vmem:[#allocation40_spill] sm:$0xff] %v5284_v24  ;;  %v5298_v58 = vpack.c.bf16 %v207_v6, %v203_v5  ;;  %v215_v5 = vld [vmem:[#allocation7 + $0x2e0] sm:$0xff] }
  0x7a   :  { %3322 = vmatprep.subr.bf16.mxu1 %v5272_v30  ;;  %v5282_v29 = vpack.c.bf16 %v200_v47, %v196_v45  ;;  %v5289_v30 = vpack.c.bf16 %v201_v3, %v197_v61  ;;  %v208_v45 = vld [vmem:[#allocation7 + $0x2a8] sm:$0xff]  ;;  %v206_v47 = vld [vmem:[#allocation7 + $0x298] sm:$0xff]  ;;  %v205_v61 = vld [vmem:[#allocation7 + $0x290] sm:$0xff] }
  0x7b   :  { %v5296_v21 = vpack.c.bf16 %v210_v0, %v206_v47  ;;  %6346 = vst [vmem:[#allocation45_spill] sm:$0xff] %v5298_v58  ;;  %v209_v3 = vld [vmem:[#allocation7 + $0x2b0] sm:$0xff]  ;;  %v218_v47 = vld [vmem:[#allocation7 + $0x2f8] sm:$0xff]  ;;  %v211_v0 = vld [vmem:[#allocation7 + $0x2c0] sm:$0xff] }
  0x7c   :  { %3260 = vmatpush1.bf16.msra.mxu0 %v5274_v59  ;;  %6340 = vst [vmem:[#allocation39_spill] sm:$0xff] %v5282_v29  ;;  %6343 = vst [vmem:[#allocation42_spill] sm:$0xff] %v5289_v30 }
  0x7d   :  { %3324 = vmatpush1.bf16.msra.mxu1 %v5277_v32  ;;  %3262 = vmatprep.subr.bf16.mxu0 %v5282_v29  ;;  %v204_v32 = vld [vmem:[#allocation7 + $0x288] sm:$0xff]  ;;  %6345 = vst [vmem:[#allocation44_spill] sm:$0xff] %v5296_v21  ;;  %v5310_v29 = vpack.c.bf16 %v215_v5, %v211_v0  ;;  %v223_v0 = vld [vmem:[#allocation7 + $0x320] sm:$0xff] }
  0x7e   :  { %3326 = vmatprep.subr.bf16.mxu1 %v5284_v24  ;;  %v5294_v59 = vpack.c.bf16 %v208_v45, %v204_v32  ;;  %v5301_v24 = vpack.c.bf16 %v209_v3, %v205_v61  ;;  %v216_v32 = vld [vmem:[#allocation7 + $0x2e8] sm:$0xff]  ;;  %v214_v45 = vld [vmem:[#allocation7 + $0x2d8] sm:$0xff]  ;;  %v213_v61 = vld [vmem:[#allocation7 + $0x2d0] sm:$0xff] }
  0x7f   :  { %v5308_v6 = vpack.c.bf16 %v218_v47, %v214_v45  ;;  %6350 = vst [vmem:[#allocation49_spill] sm:$0xff] %v5310_v29  ;;  %v217_v3 = vld [vmem:[#allocation7 + $0x2f0] sm:$0xff]  ;;  %v226_v45 = vld [vmem:[#allocation7 + $0x338] sm:$0xff]  ;;  %v219_v47 = vld [vmem:[#allocation7 + $0x300] sm:$0xff] }
  0x80   :  { %3264 = vmatpush1.bf16.msra.mxu0 %v5286_v48  ;;  %6344 = vst [vmem:[#allocation43_spill] sm:$0xff] %v5294_v59  ;;  %6347 = vst [vmem:[#allocation46_spill] sm:$0xff] %v5301_v24 }
  0x81   :  { %3328 = vmatpush1.bf16.msra.mxu1 %v5289_v30  ;;  %3266 = vmatprep.subr.bf16.mxu0 %v5294_v59  ;;  %v212_v30 = vld [vmem:[#allocation7 + $0x2c8] sm:$0xff]  ;;  %6349 = vst [vmem:[#allocation48_spill] sm:$0xff] %v5308_v6  ;;  %v5322_v59 = vpack.c.bf16 %v223_v0, %v219_v47  ;;  %v229_v47 = vld [vmem:[#allocation7 + $0x350] sm:$0xff] }
  0x82   :  { %3330 = vmatprep.subr.bf16.mxu1 %v5296_v21  ;;  %v5306_v48 = vpack.c.bf16 %v216_v32, %v212_v30  ;;  %v5313_v21 = vpack.c.bf16 %v217_v3, %v213_v61  ;;  %v224_v30 = vld [vmem:[#allocation7 + $0x328] sm:$0xff]  ;;  %v222_v32 = vld [vmem:[#allocation7 + $0x318] sm:$0xff]  ;;  %v221_v61 = vld [vmem:[#allocation7 + $0x310] sm:$0xff] }
  0x83   :  { %v5320_v5 = vpack.c.bf16 %v226_v45, %v222_v32  ;;  %6354 = vst [vmem:[#allocation53_spill] sm:$0xff] %v5322_v59  ;;  %v225_v3 = vld [vmem:[#allocation7 + $0x330] sm:$0xff]  ;;  %v227_v32 = vld [vmem:[#allocation7 + $0x340] sm:$0xff] }
  0x84   :  { %3268 = vmatpush1.bf16.msra.mxu0 %v5298_v58  ;;  %6348 = vst [vmem:[#allocation47_spill] sm:$0xff] %v5306_v48  ;;  %6351 = vst [vmem:[#allocation50_spill] sm:$0xff] %v5313_v21  ;;  %v231_v45 = vld [vmem:[#allocation7 + $0x360] sm:$0xff] }
  0x85   :  { %3332 = vmatpush1.bf16.msra.mxu1 %v5301_v24  ;;  %3270 = vmatprep.subr.bf16.mxu0 %v5306_v48  ;;  %v220_v24 = vld [vmem:[#allocation7 + $0x308] sm:$0xff]  ;;  %6353 = vst [vmem:[#allocation52_spill] sm:$0xff] %v5320_v5  ;;  %v5334_v0 = vpack.c.bf16 %v231_v45, %v227_v32  ;;  %v241_v32 = vld [vmem:[#allocation7 + $0x3b0] sm:$0xff] }
  0x86   :  { %3334 = vmatprep.subr.bf16.mxu1 %v5308_v6  ;;  %v5318_v58 = vpack.c.bf16 %v224_v30, %v220_v24  ;;  %v228_v48 = vld [vmem:[#allocation7 + $0x348] sm:$0xff]  ;;  %v5331_v30 = vpack.c.bf16 %v234_v28, %v230_v42  ;;  %v238_v28 = vld [vmem:[#allocation7 + $0x398] sm:$0xff] }
  0x87   :  { %v232_v6 = vld [vmem:[#allocation7 + $0x368] sm:$0xff]  ;;  %6358 = vst [vmem:[#allocation57_spill] sm:$0xff] %v5334_v0  ;;  %v242_v42 = vld [vmem:[#allocation7 + $0x3b8] sm:$0xff] }
  0x88   :  { %3272 = vmatpush1.bf16.msra.mxu0 %v5310_v29  ;;  %6352 = vst [vmem:[#allocation51_spill] sm:$0xff] %v5318_v58  ;;  %v5325_v29 = vpack.c.bf16 %v225_v3, %v221_v61  ;;  %v5329_v24 = vpack.c.bf16 %v232_v6, %v228_v48  ;;  %6357 = vst [vmem:[#allocation56_spill] sm:$0xff] %v5331_v30  ;;  %v233_v61 = vld [vmem:[#allocation7 + $0x370] sm:$0xff]  ;;  %v236_v3 = vld [vmem:[#allocation7 + $0x388] sm:$0xff] }
  0x89   :  { %3336 = vmatpush1.bf16.msra.mxu1 %v5313_v21  ;;  %3274 = vmatprep.subr.bf16.mxu0 %v5318_v58  ;;  %v240_v58 = vld [vmem:[#allocation7 + $0x3a8] sm:$0xff]  ;;  %v235_v6 = vld [vmem:[#allocation7 + $0x380] sm:$0xff] }
  0x8a   :  { %6355 = vst [vmem:[#allocation54_spill] sm:$0xff] %v5325_v29  ;;  %3338 = vmatprep.subr.bf16.mxu1 %v5320_v5  ;;  %6356 = vst [vmem:[#allocation55_spill] sm:$0xff] %v5329_v24  ;;  %v5338_v5 = vpack.c.bf16 %v233_v61, %v229_v47  ;;  %v5340_v48 = vpack.c.bf16 %v240_v58, %v236_v3  ;;  %v239_v21 = vld [vmem:[#allocation7 + $0x3a0] sm:$0xff]  ;;  %v250_v61 = vld [vmem:[#allocation7 + $0x3f8] sm:$0xff] }
  0x8b   :  { %v5345_v45 = vpack.c.bf16 %v239_v21, %v235_v6  ;;  %v243_v3 = vld [vmem:[#allocation7 + $0x3c0] sm:$0xff]  ;;  %v245_v21 = vld [vmem:[#allocation7 + $0x3d0] sm:$0xff] }
  0x8c   :  { %3276 = vmatpush1.bf16.msra.mxu0 %v5322_v59  ;;  %6359 = vst [vmem:[#allocation58_spill] sm:$0xff] %v5338_v5  ;;  %6360 = vst [vmem:[#allocation59_spill] sm:$0xff] %v5340_v48  ;;  %v5342_v59 = vpack.c.bf16 %v242_v42, %v238_v28  ;;  %v247_v28 = vld [vmem:[#allocation7 + $0x3e0] sm:$0xff]  ;;  %v5354_v42 = vpack.c.bf16 %v250_v61, %v246_v14  ;;  %v249_v6 = vld [vmem:[#allocation7 + $0x3f0] sm:$0xff]  ;;  %v253_v14 = vlaneseq }
  0x8d   :  { %3340 = vmatpush1.bf16.msra.mxu1 %v5325_v29  ;;  %3278 = vmatprep.subr.bf16.mxu0 %v5329_v24  ;;  %v237_v29 = vld [vmem:[#allocation7 + $0x390] sm:$0xff]  ;;  %6362 = vst [vmem:[#allocation61_spill] sm:$0xff] %v5345_v45  ;;  %v248_v24 = vld [vmem:[#allocation7 + $0x3e8] sm:$0xff] }
  0x8e   :  { %3342 = vmatprep.subr.bf16.mxu1 %v5331_v30  ;;  %6361 = vst [vmem:[#allocation60_spill] sm:$0xff] %v5342_v59  ;;  %v5349_v58 = vpack.c.bf16 %v241_v32, %v237_v29  ;;  %v5351_v47 = vpack.c.bf16 %v248_v24, %v244_v15  ;;  %6365 = vst [vmem:[#allocation64_spill] sm:$0xff] %v5354_v42  ;;  %v5361_v29 = vpack.c.bf16 %v249_v6, %v245_v21  ;;  %v5002_v15 = vmov 1983009808  }
  0x8f   :  { %v423_v24 = vunpack.c.l.s4 %v5002_v15  ;;  %v5368_v32 = vshrl.u32 %v253_v14, 7 }
  0x90   :  { %3280 = vmatpush1.bf16.msra.mxu0 %v5334_v0  ;;  %6363 = vst [vmem:[#allocation62_spill] sm:$0xff] %v5349_v58  ;;  %6364 = vst [vmem:[#allocation63_spill] sm:$0xff] %v5351_v47  ;;  %v5357_v0 = vpack.c.bf16 %v247_v28, %v243_v3 }
  0x91   :  { %3344 = vmatpush1.bf16.msra.mxu1 %v5338_v5  ;;  %3282 = vmatprep.subr.bf16.mxu0 %v5340_v48  ;;  %6367 = vst [vmem:[#allocation66_spill] sm:$0xff] %v5361_v29  ;;  %6368 = vst [vmem:[#allocation67_spill] sm:$0xff] %v5368_v32  ;;  %v424_v61 = vunpack.c.0.s8 %v423_v24 }
  0x92   :  { %3346 = vmatprep.subr.bf16.mxu1 %v5342_v59  ;;  %6366 = vst [vmem:[#allocation65_spill] sm:$0xff] %v5357_v0 }
  0x93   :  { %v5371_v28 = vsub.s32 %v424_v61, %v5368_v32 }
  0x94   :  { %3284 = vmatpush1.bf16.msra.mxu0 %v5345_v45 }
  0x95   :  { %3348 = vmatpush1.bf16.msra.mxu1 %v5349_v58  ;;  %3286 = vmatprep.subr.bf16.mxu0 %v5351_v47 }
  0x96   :  { %3350 = vmatprep.subr.bf16.mxu1 %v5354_v42 }
  0x98   :  { %3288 = vmatpush1.bf16.msra.mxu0 %v5357_v0 }
  0x99   :  { %3352 = vmatpush1.bf16.msra.mxu1 %v5361_v29  ;;  %3354 = vmatprep.subr.bf16.mxu0 %v5074_v4 }
  0x9a   :  { %3386 = vmatprep.subr.bf16.mxu1 %v5076_v8  ;;  %v273_v8 = vld [vmem:[#allocation2] sm:$0xff] }
 0x12e   :  { %v340_v3 = vpop.f32.mrb[0].mxu0 }
 0x12f   :  { %v411_v21 = vpop.f32.mrb[0].mxu1  ;;  %v342_v6 = vpop.f32.mrb[1].mxu0 }
 0x130   :  { %v420_v42 = vcombine.low %v340_v3, %v342_v6  ;;  %v413_v0 = vpop.f32.mrb[1].mxu1 }
 0x131   :  { %v421_v47 = vcombine.low %v411_v21, %v413_v0  ;;  %v6376_v21 = vld [vmem:[#allocation22_spill] sm:$0xff] }
 0x132   :  { %v428_v29 = vrot.slane %v420_v42, %v5371_v28 }
 0x133   :  { %v435_v4 = vrot.slane %v421_v47, %v5371_v28 }
 0x135   :  { %v436_v58 = vcombine.low %v428_v29, %v435_v4  ;;  %v6374_v29 = vld [vmem:[#allocation20_spill] sm:$0xff] }
 0x137   :  { %v438_v45 = vadd.f32 %v436_v58, %v273_v8  ;;  %v6369_v8 = vmov 0.0   ;;  %v6373_v58 = vld [vmem:[#allocation19_spill] sm:$0xff] }
 0x139   :  { %v3129_v15 = vmul.f32 -1.442695, %v438_v45  ;;  %v446_v59 = vrot.slane %v438_v45, 6  ;;  %v6372_v45 = vld [vmem:[#allocation18_spill] sm:$0xff] }
 0x13b   :  { %4708 = vpow2.f32 %v3129_v15  ;;  %v6377_v15 = vld [vmem:[#allocation23_spill] sm:$0xff] }
 0x145   :  { %v4709_v14 = vpop.eup %4708 }
 0x146   :  { %v442_v24 = vadd.f32 1.0, %v4709_v14  ;;  %v6378_v14 = vld [vmem:[#allocation24_spill] sm:$0xff] }
 0x148   :  { %4710 = vrcp.f32 %v442_v24  ;;  %v6379_v24 = vld [vmem:[#allocation25_spill] sm:$0xff] }
 0x149   :  { %4712 = vtanh.f32 %v446_v59  ;;  %v6370_v59 = vld [vmem:[#allocation16_spill] sm:$0xff] }
 0x152   :  { %v4711_v61 = vpop.eup %4710 }
 0x153   :  { %v450_v32 = vrot.slane %v4711_v61, 2  ;;  %v4713_v48 = vpop.eup %4712  ;;  %v456_v47 = vrot.slane %v4711_v61, 4 }
 0x154   :  { %v453_v3 = vmul.f32 %v4713_v48, %v4711_v61  ;;  %v6371_v48 = vld [vmem:[#allocation17_spill] sm:$0xff]  ;;  %v6380_v61 = vld [vmem:[#allocation26_spill] sm:$0xff] }
 0x155   :  { %v452_v6 = vmul.f32 0.0, %v450_v32  ;;  %v6375_v32 = vld [vmem:[#allocation21_spill] sm:$0xff] }
 0x157   :  { %v5375_v0 = vadd.f32 %v453_v3, %v452_v6  ;;  %v6381_v3 = vld [vmem:[#allocation27_spill] sm:$0xff]  ;;  %v6382_v6 = vld [vmem:[#allocation28_spill] sm:$0xff] }
 0x159   :  { %4714 = vtanh.f32 %v5375_v0 }
 0x163   :  { %v4715_v42 = vpop.eup %4714 }
 0x164   :  { %v458_v4 = vmul.f32 %v4715_v42, %v456_v47  ;;  %v6383_v47 = vld [vmem:[#allocation29_spill] sm:$0xff]  ;;  %v6384_v42 = vld [vmem:[#allocation30_spill] sm:$0xff] }
 0x166   :  { %524 = vmatmul.mubr.f32.vlgmr.msra.gmra.mrb[2].mxu0 %v458_v4  ;;  %595 = vmatmul.mubr.f32.vlgmr.msra.gmra.mrb[2].mxu1 %v458_v4 }
 0x167   :  { %3356 = vmatpush1.bf16.msra.mxu0 %v5078_v9  ;;  %3388 = vmatpush1.bf16.msra.mxu1 %v5081_v13 }
 0x168   :  { %3358 = vmatprep.subr.bf16.mxu0 %v5085_v17  ;;  %3390 = vmatprep.subr.bf16.mxu1 %v5087_v18 }
 0x169   :  { %692 = vmatprep.mubr.f32.mxu0 %v6369_v8  ;;  %763 = vmatprep.mubr.f32.mxu1 %v6369_v8 }
 0x16b   :  { %3360 = vmatpush1.bf16.msra.mxu0 %v5090_v22  ;;  %3392 = vmatpush1.bf16.msra.mxu1 %v5094_v26 }
 0x16c   :  { %3362 = vmatprep.subr.bf16.mxu0 %v5096_v27  ;;  %3394 = vmatprep.subr.bf16.mxu1 %v5098_v31 }
 0x16f   :  { %3364 = vmatpush1.bf16.msra.mxu0 %v5101_v35  ;;  %3396 = vmatpush1.bf16.msra.mxu1 %v5105_v39 }
 0x170   :  { %3366 = vmatprep.subr.bf16.mxu0 %v5107_v40  ;;  %3398 = vmatprep.subr.bf16.mxu1 %v5110_v44 }
 0x173   :  { %3368 = vmatpush1.bf16.msra.mxu0 %v5113_v51  ;;  %3400 = vmatpush1.bf16.msra.mxu1 %v5117_v52 }
 0x174   :  { %3370 = vmatprep.subr.bf16.mxu0 %v5119_v53  ;;  %3402 = vmatprep.subr.bf16.mxu1 %v5122_v57 }
 0x177   :  { %3372 = vmatpush1.bf16.msra.mxu0 %v5125_v63  ;;  %3404 = vmatpush1.bf16.msra.mxu1 %v5129_v1 }
 0x178   :  { %3374 = vmatprep.subr.bf16.mxu0 %v5131_v2  ;;  %3406 = vmatprep.subr.bf16.mxu1 %v5134_v7 }
 0x17b   :  { %3376 = vmatpush1.bf16.msra.mxu0 %v5137_v16  ;;  %3408 = vmatpush1.bf16.msra.mxu1 %v5141_v19 }
 0x17c   :  { %3378 = vmatprep.subr.bf16.mxu0 %v5143_v20  ;;  %3410 = vmatprep.subr.bf16.mxu1 %v5146_v25 }
 0x17f   :  { %3380 = vmatpush1.bf16.msra.mxu0 %v5149_v34  ;;  %3412 = vmatpush1.bf16.msra.mxu1 %v5153_v36 }
 0x180   :  { %3382 = vmatprep.subr.bf16.mxu0 %v5155_v37  ;;  %3414 = vmatprep.subr.bf16.mxu1 %v5158_v43 }
 0x183   :  { %3384 = vmatpush1.bf16.msra.mxu0 %v5161_v50  ;;  %3416 = vmatpush1.bf16.msra.mxu1 %v5165_v54 }
 0x184   :  { %3418 = vmatprep.subr.bf16.mxu0 %v5167_v55  ;;  %3482 = vmatprep.subr.bf16.mxu1 %v5170_v60 }
 0x186   :  { %693 = vmatmul.mubr.f32.vlgmr.msra.gmra.mrb[4].mxu0 %v458_v4  ;;  %764 = vmatmul.mubr.f32.vlgmr.msra.gmra.mrb[4].mxu1 %v458_v4  ;;  %v6385_v4 = vld [vmem:[#allocation31_spill] sm:$0xff] }
 0x187   :  { %3420 = vmatpush1.bf16.msra.mxu0 %v5173_v10  ;;  %3484 = vmatpush1.bf16.msra.mxu1 %v5177_v11 }
 0x188   :  { %3422 = vmatprep.subr.bf16.mxu0 %v5179_v12  ;;  %3486 = vmatprep.subr.bf16.mxu1 %v5182_v23 }
 0x18b   :  { %3424 = vmatpush1.bf16.msra.mxu0 %v5187_v33  ;;  %3488 = vmatpush1.bf16.msra.mxu1 %v5191_v38 }
 0x18c   :  { %3426 = vmatprep.subr.bf16.mxu0 %v5193_v41  ;;  %3490 = vmatprep.subr.bf16.mxu1 %v5196_v46 }
 0x18f   :  { %3428 = vmatpush1.bf16.msra.mxu0 %v5201_v49  ;;  %3492 = vmatpush1.bf16.msra.mxu1 %v5205_v56 }
 0x190   :  { %3430 = vmatprep.subr.bf16.mxu0 %v5210_v62  ;;  %3494 = vmatprep.subr.bf16.mxu1 %v6370_v59 }
 0x193   :  { %3432 = vmatpush1.bf16.msra.mxu0 %v6371_v48  ;;  %3496 = vmatpush1.bf16.msra.mxu1 %v6372_v45 }
 0x194   :  { %3434 = vmatprep.subr.bf16.mxu0 %v6373_v58  ;;  %3498 = vmatprep.subr.bf16.mxu1 %v6374_v29 }
 0x197   :  { %3436 = vmatpush1.bf16.msra.mxu0 %v6375_v32  ;;  %3500 = vmatpush1.bf16.msra.mxu1 %v6376_v21  ;;  %v6386_v32 = vld [vmem:[#allocation32_spill] sm:$0xff]  ;;  %v6387_v21 = vld [vmem:[#allocation33_spill] sm:$0xff] }
 0x198   :  { %3438 = vmatprep.subr.bf16.mxu0 %v6377_v15  ;;  %3502 = vmatprep.subr.bf16.mxu1 %v6378_v14  ;;  %v6388_v15 = vld [vmem:[#allocation34_spill] sm:$0xff]  ;;  %v6389_v14 = vld [vmem:[#allocation35_spill] sm:$0xff] }
 0x19b   :  { %3440 = vmatpush1.bf16.msra.mxu0 %v6379_v24  ;;  %3504 = vmatpush1.bf16.msra.mxu1 %v6380_v61  ;;  %v6390_v24 = vld [vmem:[#allocation36_spill] sm:$0xff]  ;;  %v6391_v61 = vld [vmem:[#allocation37_spill] sm:$0xff] }
 0x19c   :  { %3442 = vmatprep.subr.bf16.mxu0 %v6381_v3  ;;  %3506 = vmatprep.subr.bf16.mxu1 %v6382_v6  ;;  %v6392_v3 = vld [vmem:[#allocation38_spill] sm:$0xff]  ;;  %v6393_v6 = vld [vmem:[#allocation39_spill] sm:$0xff] }
 0x19f   :  { %3444 = vmatpush1.bf16.msra.mxu0 %v6383_v47  ;;  %3508 = vmatpush1.bf16.msra.mxu1 %v6384_v42  ;;  %v6394_v47 = vld [vmem:[#allocation40_spill] sm:$0xff]  ;;  %v6395_v42 = vld [vmem:[#allocation41_spill] sm:$0xff] }
 0x1a0   :  { %3446 = vmatprep.subr.bf16.mxu0 %v6385_v4  ;;  %3510 = vmatprep.subr.bf16.mxu1 %v6386_v32  ;;  %v6396_v4 = vld [vmem:[#allocation42_spill] sm:$0xff]  ;;  %v6397_v32 = vld [vmem:[#allocation43_spill] sm:$0xff] }
 0x1a3   :  { %3448 = vmatpush1.bf16.msra.mxu0 %v6387_v21  ;;  %3512 = vmatpush1.bf16.msra.mxu1 %v6388_v15  ;;  %v6398_v21 = vld [vmem:[#allocation44_spill] sm:$0xff]  ;;  %v6399_v15 = vld [vmem:[#allocation45_spill] sm:$0xff] }
 0x1a4   :  { %3450 = vmatprep.subr.bf16.mxu0 %v6389_v14  ;;  %3514 = vmatprep.subr.bf16.mxu1 %v6390_v24  ;;  %v6400_v14 = vld [vmem:[#allocation46_spill] sm:$0xff]  ;;  %v6401_v24 = vld [vmem:[#allocation47_spill] sm:$0xff] }
 0x1a7   :  { %3452 = vmatpush1.bf16.msra.mxu0 %v6391_v61  ;;  %3516 = vmatpush1.bf16.msra.mxu1 %v6392_v3  ;;  %v6402_v61 = vld [vmem:[#allocation48_spill] sm:$0xff]  ;;  %v6403_v3 = vld [vmem:[#allocation49_spill] sm:$0xff] }
 0x1a8   :  { %3454 = vmatprep.subr.bf16.mxu0 %v6393_v6  ;;  %3518 = vmatprep.subr.bf16.mxu1 %v6394_v47  ;;  %v6404_v6 = vld [vmem:[#allocation50_spill] sm:$0xff]  ;;  %v6405_v47 = vld [vmem:[#allocation51_spill] sm:$0xff] }
 0x1ab   :  { %3456 = vmatpush1.bf16.msra.mxu0 %v6395_v42  ;;  %3520 = vmatpush1.bf16.msra.mxu1 %v6396_v4  ;;  %v6406_v42 = vld [vmem:[#allocation52_spill] sm:$0xff]  ;;  %v6407_v4 = vld [vmem:[#allocation53_spill] sm:$0xff] }
 0x1ac   :  { %3458 = vmatprep.subr.bf16.mxu0 %v6397_v32  ;;  %3522 = vmatprep.subr.bf16.mxu1 %v6398_v21  ;;  %v6408_v32 = vld [vmem:[#allocation54_spill] sm:$0xff]  ;;  %v6409_v21 = vld [vmem:[#allocation55_spill] sm:$0xff] }
 0x1af   :  { %3460 = vmatpush1.bf16.msra.mxu0 %v6399_v15  ;;  %3524 = vmatpush1.bf16.msra.mxu1 %v6400_v14  ;;  %v6410_v14 = vld [vmem:[#allocation57_spill] sm:$0xff] }
 0x1b0   :  { %3462 = vmatprep.subr.bf16.mxu0 %v6401_v24  ;;  %3526 = vmatprep.subr.bf16.mxu1 %v6402_v61  ;;  %v6411_v61 = vld [vmem:[#allocation59_spill] sm:$0xff] }
 0x1b3   :  { %3464 = vmatpush1.bf16.msra.mxu0 %v6403_v3  ;;  %3528 = vmatpush1.bf16.msra.mxu1 %v6404_v6  ;;  %v6412_v3 = vld [vmem:[#allocation60_spill] sm:$0xff]  ;;  %v6413_v6 = vld [vmem:[#allocation61_spill] sm:$0xff] }
 0x1b4   :  { %3466 = vmatprep.subr.bf16.mxu0 %v6405_v47  ;;  %3530 = vmatprep.subr.bf16.mxu1 %v6406_v42  ;;  %v6414_v47 = vld [vmem:[#allocation62_spill] sm:$0xff]  ;;  %v6415_v42 = vld [vmem:[#allocation63_spill] sm:$0xff] }
 0x1b7   :  { %3468 = vmatpush1.bf16.msra.mxu0 %v6407_v4  ;;  %3532 = vmatpush1.bf16.msra.mxu1 %v6408_v32  ;;  %v6416_v4 = vld [vmem:[#allocation64_spill] sm:$0xff]  ;;  %v6417_v32 = vld [vmem:[#allocation65_spill] sm:$0xff] }
 0x1b8   :  { %3470 = vmatprep.subr.bf16.mxu0 %v6409_v21  ;;  %3534 = vmatprep.subr.bf16.mxu1 %v5331_v30  ;;  %v6418_v21 = vld [vmem:[#allocation66_spill] sm:$0xff]  ;;  %v6419_v30 = vld [vmem:[#allocation12_spill] sm:$0xff] }
 0x1bb   :  { %3472 = vmatpush1.bf16.msra.mxu0 %v6410_v14  ;;  %3536 = vmatpush1.bf16.msra.mxu1 %v5338_v5  ;;  %v6420_v14 = vld [vmem:[#allocation13_spill] sm:$0xff]  ;;  %v6421_v5 = vld [vmem:[#allocation67_spill] sm:$0xff] }
 0x1bc   :  { %3474 = vmatprep.subr.bf16.mxu0 %v6411_v61  ;;  %3538 = vmatprep.subr.bf16.mxu1 %v6412_v3  ;;  %v255_v61 = vsub.s32 0, %v6421_v5  ;;  %v267_v45 = vsub.s32 3, %v6421_v5 }
 0x1bf   :  { %3476 = vmatpush1.bf16.msra.mxu0 %v6413_v6  ;;  %3540 = vmatpush1.bf16.msra.mxu1 %v6414_v47  ;;  %v251_v6 = vld [vmem:[%s6193_s3] sm:$0xf]  ;;  %v259_v47 = vsub.s32 1, %v6421_v5  ;;  %s5003_s3 = smov [#allocation8]  }
 0x1c0   :  { %3478 = vmatprep.subr.bf16.mxu0 %v6415_v42  ;;  %3542 = vmatprep.subr.bf16.mxu1 %v6416_v4  ;;  %v5481_v3 = vrot.slane %v251_v6, %v255_v61  ;;  %v5491_v61 = vrot.slane %v251_v6, %v267_v45  ;;  %s3116_s29 = sshll.u32 %s5003_s3, 4  ;;  %s3117_s29 = int_to_ptr.vmem [resolvable:$true] %s3116_s29 }
 0x1c1   :  { %v5483_v42 = vrot.slane %v251_v6, %v259_v47  ;;  %s4966_s30 = scalar_lea.vmem %s3117_s29, 256  ;;  %p4971_p11 = scmp.lt.s32.totalorder %s3117_s29, %s3117_s29 }
 0x1c2   :  { %6422 = vst [vmem:[#allocation67_spill] sm:$0xff] %v5481_v3  ;;  %p4967_p10 = scmp.ne.s32.totalorder %s3117_s29, %s4966_s30  ;;  %p4972_p12 = scmp.lt.s32.totalorder %s4966_s30, %s4966_s30 }
 0x1c3   :  { %3480 = vmatpush1.bf16.msra.mxu0 %v6417_v32  ;;  %3544 = vmatpush1.bf16.msra.mxu1 %v6418_v21 }
 0x1c4   :  { %3546 = vmatprep.subr.bf16.mxu0 %v6419_v30  ;;  %3578 = vmatprep.subr.bf16.mxu1 %v6420_v14  ;;  %v263_v30 = vsub.s32 2, %v6421_v5  ;;  %p4973_p13 = por %p4972_p12, %p4971_p11 }
 0x1c6   :  { %v5489_v48 = vrot.slane %v251_v6, %v263_v30  ;;  %p4974_p0 = pnand %p4973_p13, %p4967_p10 }
 0x1c8   :  { %6423 = vst [vmem:[#allocation68_spill] sm:$0xff] %v5489_v48 }
 0x239   :  { %v525_v4 = vpop.f32.mrb[2].mxu0  ;;  %v596_v32 = vpop.f32.mrb[2].mxu1 }
 0x23a   :  { %v526_v21 = vadd.f32 %v525_v4, %v5481_v3  ;;  %v527_v24 = vpop.f32.mrb[3].mxu0  ;;  %v598_v14 = vpop.f32.mrb[3].mxu1  ;;  %v597_v47 = vadd.f32 %v596_v32, %v5489_v48 }
 0x23b   :  { %v528_v15 = vadd.f32 %v527_v24, %v5483_v42  ;;  %v599_v4 = vadd.f32 %v598_v14, %v5491_v61 }
 0x23c   :  { %v3130_v29 = vmul.f32 -1.442695, %v526_v21  ;;  %v3132_v3 = vmul.f32 -1.442695, %v597_v47 }
 0x23d   :  { %v3131_v58 = vmul.f32 -1.442695, %v528_v15 }
 0x23e   :  { %4716 = vpow2.f32 %v3130_v29 }
 0x23f   :  { %4718 = vpow2.f32 %v3131_v58 }
 0x240   :  { %4720 = vtanh.f32 %v599_v4 }
 0x241   :  { %4722 = vpow2.f32 %v3132_v3  ;;  %v627_v3 = vld [vmem:[#allocation2 + $0x8] sm:$0xff] }
 0x248   :  { %v4717_v59 = vpop.eup %4716 }
 0x249   :  { %v610_v62 = vadd.f32 1.0, %v4717_v59  ;;  %v4719_v56 = vpop.eup %4718 }
 0x24a   :  { %v611_v21 = vadd.f32 1.0, %v4719_v56  ;;  %v4721_v5 = vpop.eup %4720 }
 0x24b   :  { %4724 = vrcp.f32 %v610_v62  ;;  %v4723_v29 = vpop.eup %4722 }
 0x24c   :  { %4726 = vrcp.f32 %v611_v21  ;;  %v612_v45 = vadd.f32 1.0, %v4723_v29 }
 0x24e   :  { %4728 = vrcp.f32 %v612_v45 }
 0x255   :  { %v4725_v30 = vpop.eup %4724 }
 0x256   :  { %v621_v15 = vmul.f32 %v4725_v30, %v4721_v5  ;;  %v4727_v58 = vpop.eup %4726 }
 0x257   :  { %v620_v24 = vmul.f32 0.0, %v4727_v58 }
 0x258   :  { %v4729_v30 = vpop.eup %4728 }
 0x259   :  { %v694_v6 = vpop.f32.mrb[4].mxu0  ;;  %v765_v32 = vpop.f32.mrb[4].mxu1  ;;  %v5495_v48 = vadd.f32 %v621_v15, %v620_v24 }
 0x25a   :  { %v696_v14 = vpop.f32.mrb[5].mxu0  ;;  %v767_v47 = vpop.f32.mrb[5].mxu1 }
 0x25b   :  { %v774_v59 = vcombine.low %v694_v6, %v696_v14  ;;  %v775_v4 = vcombine.low %v765_v32, %v767_v47  ;;  %4730 = vtanh.f32 %v5495_v48 }
 0x25d   :  { %v782_v56 = vrot.slane %v774_v59, %v5371_v28  ;;  %v789_v62 = vrot.slane %v775_v4, %v5371_v28 }
 0x25f   :  { %v790_v21 = vcombine.low %v782_v56, %v789_v62 }
 0x261   :  { %v792_v5 = vadd.f32 %v790_v21, %v627_v3 }
 0x263   :  { %v3133_v29 = vmul.f32 -1.442695, %v792_v5  ;;  %v800_v6 = vrot.slane %v792_v5, 6  ;;  %v6425_v5 = vld [vmem:[#allocation15_spill] sm:$0xff] }
 0x265   :  { %4732 = vpow2.f32 %v3133_v29  ;;  %v4731_v58 = vpop.eup %4730  ;;  %v6426_v29 = vld [vmem:[#allocation16_spill] sm:$0xff] }
 0x266   :  { %v624_v15 = vmul.f32 %v4731_v58, %v4729_v30  ;;  %v6427_v30 = vld [vmem:[#allocation17_spill] sm:$0xff]  ;;  %v6428_v58 = vld [vmem:[#allocation18_spill] sm:$0xff] }
 0x268   :  { %625 = vst [vmem:[#allocation8] sm:$0x3] %v624_v15  ;;  %877 = vmatprep.mubr.f32.mxu0 %v624_v15  ;;  %948 = vmatprep.mubr.f32.mxu1 %v624_v15  ;;  %v6429_v15 = vld [vmem:[#allocation19_spill] sm:$0xff] }
 0x26f   :  { %v4733_v45 = vpop.eup %4732 }
 0x270   :  { %v796_v24 = vadd.f32 1.0, %v4733_v45  ;;  %v6430_v45 = vld [vmem:[#allocation20_spill] sm:$0xff] }
 0x272   :  { %4734 = vrcp.f32 %v796_v24  ;;  %v6431_v24 = vld [vmem:[#allocation21_spill] sm:$0xff] }
 0x273   :  { %4736 = vtanh.f32 %v800_v6  ;;  %v6432_v6 = vld [vmem:[#allocation22_spill] sm:$0xff] }
 0x27c   :  { %v4735_v32 = vpop.eup %4734 }
 0x27d   :  { %v804_v14 = vrot.slane %v4735_v32, 2  ;;  %v4737_v47 = vpop.eup %4736  ;;  %v810_v62 = vrot.slane %v4735_v32, 4 }
 0x27e   :  { %v807_v59 = vmul.f32 %v4737_v47, %v4735_v32  ;;  %v6433_v32 = vld [vmem:[#allocation23_spill] sm:$0xff]  ;;  %v6435_v47 = vld [vmem:[#allocation25_spill] sm:$0xff] }
 0x27f   :  { %v806_v4 = vmul.f32 %v804_v14, %v5375_v0  ;;  %v6424_v0 = vld [vmem:[#allocation14_spill] sm:$0xff]  ;;  %v6434_v14 = vld [vmem:[#allocation24_spill] sm:$0xff] }
 0x281   :  { %v5501_v56 = vadd.f32 %v807_v59, %v806_v4  ;;  %v6436_v59 = vld [vmem:[#allocation26_spill] sm:$0xff]  ;;  %v6437_v4 = vld [vmem:[#allocation27_spill] sm:$0xff] }
 0x283   :  { %4738 = vtanh.f32 %v5501_v56 }
 0x28d   :  { %v4739_v3 = vpop.eup %4738 }
 0x28e   :  { %v812_v21 = vmul.f32 %v4739_v3, %v810_v62  ;;  %v6438_v62 = vld [vmem:[#allocation28_spill] sm:$0xff]  ;;  %v6439_v3 = vld [vmem:[#allocation29_spill] sm:$0xff] }
 0x290   :  { %878 = vmatmul.mubr.f32.vlgmr.msra.gmra.mrb[6].mxu0 %v812_v21  ;;  %949 = vmatmul.mubr.f32.vlgmr.msra.gmra.mrb[6].mxu1 %v812_v21 }
 0x291   :  { %3548 = vmatpush1.bf16.msra.mxu0 %v5078_v9  ;;  %3580 = vmatpush1.bf16.msra.mxu1 %v5081_v13 }
 0x292   :  { %3550 = vmatprep.subr.bf16.mxu0 %v5085_v17  ;;  %3582 = vmatprep.subr.bf16.mxu1 %v5087_v18 }
 0x293   :  { %1047 = vmatprep.mubr.f32.mxu0 %v6369_v8  ;;  %1118 = vmatprep.mubr.f32.mxu1 %v6369_v8 }
 0x295   :  { %3552 = vmatpush1.bf16.msra.mxu0 %v5090_v22  ;;  %3584 = vmatpush1.bf16.msra.mxu1 %v5094_v26 }
 0x296   :  { %3554 = vmatprep.subr.bf16.mxu0 %v5096_v27  ;;  %3586 = vmatprep.subr.bf16.mxu1 %v5098_v31 }
 0x299   :  { %3556 = vmatpush1.bf16.msra.mxu0 %v5101_v35  ;;  %3588 = vmatpush1.bf16.msra.mxu1 %v5105_v39 }
 0x29a   :  { %3558 = vmatprep.subr.bf16.mxu0 %v5107_v40  ;;  %3590 = vmatprep.subr.bf16.mxu1 %v5110_v44 }
 0x29d   :  { %3560 = vmatpush1.bf16.msra.mxu0 %v5113_v51  ;;  %3592 = vmatpush1.bf16.msra.mxu1 %v5117_v52 }
 0x29e   :  { %3562 = vmatprep.subr.bf16.mxu0 %v5119_v53  ;;  %3594 = vmatprep.subr.bf16.mxu1 %v5122_v57 }
 0x2a1   :  { %3564 = vmatpush1.bf16.msra.mxu0 %v5125_v63  ;;  %3596 = vmatpush1.bf16.msra.mxu1 %v5129_v1 }
 0x2a2   :  { %3566 = vmatprep.subr.bf16.mxu0 %v5131_v2  ;;  %3598 = vmatprep.subr.bf16.mxu1 %v5134_v7 }
 0x2a5   :  { %3568 = vmatpush1.bf16.msra.mxu0 %v5137_v16  ;;  %3600 = vmatpush1.bf16.msra.mxu1 %v5141_v19 }
 0x2a6   :  { %3570 = vmatprep.subr.bf16.mxu0 %v5143_v20  ;;  %3602 = vmatprep.subr.bf16.mxu1 %v5146_v25 }
 0x2a9   :  { %3572 = vmatpush1.bf16.msra.mxu0 %v5149_v34  ;;  %3604 = vmatpush1.bf16.msra.mxu1 %v5153_v36 }
 0x2aa   :  { %3574 = vmatprep.subr.bf16.mxu0 %v5155_v37  ;;  %3606 = vmatprep.subr.bf16.mxu1 %v5158_v43 }
 0x2ad   :  { %3576 = vmatpush1.bf16.msra.mxu0 %v5161_v50  ;;  %3608 = vmatpush1.bf16.msra.mxu1 %v5165_v54 }
 0x2ae   :  { %3610 = vmatprep.subr.bf16.mxu0 %v5167_v55  ;;  %3674 = vmatprep.subr.bf16.mxu1 %v5170_v60 }
 0x2b0   :  { %1048 = vmatmul.mubr.f32.vlgmr.msra.gmra.mrb[8].mxu0 %v812_v21  ;;  %1119 = vmatmul.mubr.f32.vlgmr.msra.gmra.mrb[8].mxu1 %v812_v21  ;;  %v6440_v21 = vld [vmem:[#allocation30_spill] sm:$0xff] }
 0x2b1   :  { %3612 = vmatpush1.bf16.msra.mxu0 %v5173_v10  ;;  %3676 = vmatpush1.bf16.msra.mxu1 %v5177_v11 }
 0x2b2   :  { %3614 = vmatprep.subr.bf16.mxu0 %v5179_v12  ;;  %3678 = vmatprep.subr.bf16.mxu1 %v5182_v23 }
 0x2b5   :  { %3616 = vmatpush1.bf16.msra.mxu0 %v5187_v33  ;;  %3680 = vmatpush1.bf16.msra.mxu1 %v5191_v38 }
 0x2b6   :  { %3618 = vmatprep.subr.bf16.mxu0 %v5193_v41  ;;  %3682 = vmatprep.subr.bf16.mxu1 %v5196_v46 }
 0x2b9   :  { %3620 = vmatpush1.bf16.msra.mxu0 %v5201_v49  ;;  %3684 = vmatpush1.bf16.msra.mxu1 %v6424_v0 }
 0x2ba   :  { %3622 = vmatprep.subr.bf16.mxu0 %v6425_v5  ;;  %3686 = vmatprep.subr.bf16.mxu1 %v6426_v29 }
 0x2bd   :  { %3624 = vmatpush1.bf16.msra.mxu0 %v6427_v30  ;;  %3688 = vmatpush1.bf16.msra.mxu1 %v6428_v58 }
 0x2be   :  { %3626 = vmatprep.subr.bf16.mxu0 %v6429_v15  ;;  %3690 = vmatprep.subr.bf16.mxu1 %v6430_v45  ;;  %v6441_v45 = vld [vmem:[#allocation31_spill] sm:$0xff] }
 0x2bf   :  { %v6479_v15 = vld [vmem:[#allocation67_spill] sm:$0xff] }
 0x2c1   :  { %3628 = vmatpush1.bf16.msra.mxu0 %v6431_v24  ;;  %3692 = vmatpush1.bf16.msra.mxu1 %v6432_v6  ;;  %v6442_v24 = vld [vmem:[#allocation32_spill] sm:$0xff]  ;;  %v6443_v6 = vld [vmem:[#allocation33_spill] sm:$0xff] }
 0x2c2   :  { %3630 = vmatprep.subr.bf16.mxu0 %v6433_v32  ;;  %3694 = vmatprep.subr.bf16.mxu1 %v6434_v14  ;;  %v6444_v32 = vld [vmem:[#allocation34_spill] sm:$0xff]  ;;  %v6445_v14 = vld [vmem:[#allocation35_spill] sm:$0xff] }
 0x2c5   :  { %3632 = vmatpush1.bf16.msra.mxu0 %v6435_v47  ;;  %3696 = vmatpush1.bf16.msra.mxu1 %v6436_v59  ;;  %v6446_v47 = vld [vmem:[#allocation36_spill] sm:$0xff]  ;;  %v6447_v59 = vld [vmem:[#allocation37_spill] sm:$0xff] }
 0x2c6   :  { %3634 = vmatprep.subr.bf16.mxu0 %v6437_v4  ;;  %3698 = vmatprep.subr.bf16.mxu1 %v6438_v62  ;;  %v6448_v4 = vld [vmem:[#allocation38_spill] sm:$0xff]  ;;  %v6449_v62 = vld [vmem:[#allocation39_spill] sm:$0xff] }
 0x2c9   :  { %3636 = vmatpush1.bf16.msra.mxu0 %v6439_v3  ;;  %3700 = vmatpush1.bf16.msra.mxu1 %v6440_v21  ;;  %v6450_v3 = vld [vmem:[#allocation40_spill] sm:$0xff]  ;;  %v6451_v21 = vld [vmem:[#allocation41_spill] sm:$0xff] }
 0x2ca   :  { %3638 = vmatprep.subr.bf16.mxu0 %v6441_v45  ;;  %3702 = vmatprep.subr.bf16.mxu1 %v6442_v24  ;;  %v6452_v45 = vld [vmem:[#allocation42_spill] sm:$0xff]  ;;  %v6453_v24 = vld [vmem:[#allocation43_spill] sm:$0xff] }
 0x2cd   :  { %3640 = vmatpush1.bf16.msra.mxu0 %v6443_v6  ;;  %3704 = vmatpush1.bf16.msra.mxu1 %v6444_v32  ;;  %v6454_v6 = vld [vmem:[#allocation44_spill] sm:$0xff]  ;;  %v6455_v32 = vld [vmem:[#allocation45_spill] sm:$0xff] }
 0x2ce   :  { %3642 = vmatprep.subr.bf16.mxu0 %v6445_v14  ;;  %3706 = vmatprep.subr.bf16.mxu1 %v6446_v47  ;;  %v6456_v14 = vld [vmem:[#allocation46_spill] sm:$0xff]  ;;  %v6457_v47 = vld [vmem:[#allocation47_spill] sm:$0xff] }
 0x2d1   :  { %3644 = vmatpush1.bf16.msra.mxu0 %v6447_v59  ;;  %3708 = vmatpush1.bf16.msra.mxu1 %v6448_v4  ;;  %v6458_v59 = vld [vmem:[#allocation48_spill] sm:$0xff]  ;;  %v6459_v4 = vld [vmem:[#allocation49_spill] sm:$0xff] }
 0x2d2   :  { %3646 = vmatprep.subr.bf16.mxu0 %v6449_v62  ;;  %3710 = vmatprep.subr.bf16.mxu1 %v6450_v3  ;;  %v6460_v62 = vld [vmem:[#allocation50_spill] sm:$0xff]  ;;  %v6461_v3 = vld [vmem:[#allocation51_spill] sm:$0xff] }
 0x2d5   :  { %3648 = vmatpush1.bf16.msra.mxu0 %v6451_v21  ;;  %3712 = vmatpush1.bf16.msra.mxu1 %v6452_v45  ;;  %v6462_v21 = vld [vmem:[#allocation52_spill] sm:$0xff]  ;;  %v6463_v45 = vld [vmem:[#allocation53_spill] sm:$0xff] }
 0x2d6   :  { %3650 = vmatprep.subr.bf16.mxu0 %v6453_v24  ;;  %3714 = vmatprep.subr.bf16.mxu1 %v6454_v6  ;;  %v6464_v24 = vld [vmem:[#allocation54_spill] sm:$0xff]  ;;  %v6465_v6 = vld [vmem:[#allocation55_spill] sm:$0xff] }
 0x2d9   :  { %3652 = vmatpush1.bf16.msra.mxu0 %v6455_v32  ;;  %3716 = vmatpush1.bf16.msra.mxu1 %v6456_v14  ;;  %v6466_v32 = vld [vmem:[#allocation56_spill] sm:$0xff]  ;;  %v6467_v14 = vld [vmem:[#allocation57_spill] sm:$0xff] }
 0x2da   :  { %3654 = vmatprep.subr.bf16.mxu0 %v6457_v47  ;;  %3718 = vmatprep.subr.bf16.mxu1 %v6458_v59  ;;  %v6468_v47 = vld [vmem:[#allocation58_spill] sm:$0xff]  ;;  %v6469_v59 = vld [vmem:[#allocation59_spill] sm:$0xff] }
 0x2dd   :  { %3656 = vmatpush1.bf16.msra.mxu0 %v6459_v4  ;;  %3720 = vmatpush1.bf16.msra.mxu1 %v6460_v62  ;;  %v6470_v4 = vld [vmem:[#allocation60_spill] sm:$0xff]  ;;  %v6471_v62 = vld [vmem:[#allocation61_spill] sm:$0xff] }
 0x2de   :  { %3658 = vmatprep.subr.bf16.mxu0 %v6461_v3  ;;  %3722 = vmatprep.subr.bf16.mxu1 %v6462_v21  ;;  %v6472_v3 = vld [vmem:[#allocation62_spill] sm:$0xff]  ;;  %v6473_v21 = vld [vmem:[#allocation63_spill] sm:$0xff] }
 0x2e1   :  { %3660 = vmatpush1.bf16.msra.mxu0 %v6463_v45  ;;  %3724 = vmatpush1.bf16.msra.mxu1 %v6464_v24  ;;  %v6474_v45 = vld [vmem:[#allocation64_spill] sm:$0xff]  ;;  %v6475_v24 = vld [vmem:[#allocation65_spill] sm:$0xff] }
 0x2e2   :  { %3662 = vmatprep.subr.bf16.mxu0 %v6465_v6  ;;  %3726 = vmatprep.subr.bf16.mxu1 %v6466_v32  ;;  %v6476_v6 = vld [vmem:[#allocation66_spill] sm:$0xff]  ;;  %v6477_v32 = vld [vmem:[#allocation12_spill] sm:$0xff] }
 0x2e5   :  { %3664 = vmatpush1.bf16.msra.mxu0 %v6467_v14  ;;  %3728 = vmatpush1.bf16.msra.mxu1 %v6468_v47  ;;  %v6478_v14 = vld [vmem:[#allocation13_spill] sm:$0xff] }
 0x2e6   :  { %3666 = vmatprep.subr.bf16.mxu0 %v6469_v59  ;;  %3730 = vmatprep.subr.bf16.mxu1 %v6470_v4 }
 0x2e9   :  { %3668 = vmatpush1.bf16.msra.mxu0 %v6471_v62  ;;  %3732 = vmatpush1.bf16.msra.mxu1 %v6472_v3 }
 0x2ea   :  { %3670 = vmatprep.subr.bf16.mxu0 %v6473_v21  ;;  %3734 = vmatprep.subr.bf16.mxu1 %v6474_v45  ;;  %v6480_v45 = vld [vmem:[#allocation68_spill] sm:$0xff] }
 0x2ed   :  { %3672 = vmatpush1.bf16.msra.mxu0 %v6475_v24  ;;  %3736 = vmatpush1.bf16.msra.mxu1 %v6476_v6 }
 0x2ee   :  { %3738 = vmatprep.subr.bf16.mxu0 %v6477_v32  ;;  %3770 = vmatprep.subr.bf16.mxu1 %v6478_v14 }
 0x363   :  { %v879_v47 = vpop.f32.mrb[6].mxu0  ;;  %v950_v59 = vpop.f32.mrb[6].mxu1 }
 0x364   :  { %v880_v4 = vadd.f32 %v879_v47, %v6479_v15  ;;  %v881_v58 = vpop.f32.mrb[7].mxu0  ;;  %v952_v62 = vpop.f32.mrb[7].mxu1  ;;  %v951_v24 = vadd.f32 %v950_v59, %v6480_v45 }
 0x365   :  { %v882_v3 = vadd.f32 %v881_v58, %v5483_v42  ;;  %v953_v6 = vadd.f32 %v952_v62, %v5491_v61 }
 0x366   :  { %v3134_v30 = vmul.f32 -1.442695, %v880_v4  ;;  %v3136_v29 = vmul.f32 -1.442695, %v951_v24 }
 0x367   :  { %v3135_v21 = vmul.f32 -1.442695, %v882_v3 }
 0x368   :  { %4740 = vpow2.f32 %v3134_v30 }
 0x369   :  { %4742 = vpow2.f32 %v3135_v21 }
 0x36a   :  { %4744 = vtanh.f32 %v953_v6 }
 0x36b   :  { %4746 = vpow2.f32 %v3136_v29 }
 0x372   :  { %v4741_v32 = vpop.eup %4740 }
 0x373   :  { %v964_v5 = vadd.f32 1.0, %v4741_v32  ;;  %v4743_v14 = vpop.eup %4742 }
 0x374   :  { %v965_v47 = vadd.f32 1.0, %v4743_v14  ;;  %v4745_v15 = vpop.eup %4744 }
 0x375   :  { %4748 = vrcp.f32 %v964_v5  ;;  %v4747_v0 = vpop.eup %4746 }
 0x376   :  { %4750 = vrcp.f32 %v965_v47  ;;  %v966_v30 = vadd.f32 1.0, %v4747_v0 }
 0x378   :  { %4752 = vrcp.f32 %v966_v30 }
 0x37f   :  { %v4749_v58 = vpop.eup %4748 }
 0x380   :  { %v975_v4 = vmul.f32 %v4749_v58, %v4745_v15  ;;  %v4751_v3 = vpop.eup %4750  ;;  %v982_v15 = vld [vmem:[#allocation2 + $0x10] sm:$0xff] }
 0x381   :  { %v974_v21 = vmul.f32 %v4751_v3, %v5495_v48 }
 0x382   :  { %v4753_v48 = vpop.eup %4752 }
 0x383   :  { %v1049_v59 = vpop.f32.mrb[8].mxu0  ;;  %v1120_v45 = vpop.f32.mrb[8].mxu1  ;;  %v5607_v62 = vadd.f32 %v975_v4, %v974_v21 }
 0x384   :  { %v1051_v24 = vpop.f32.mrb[9].mxu0  ;;  %v1122_v32 = vpop.f32.mrb[9].mxu1 }
 0x385   :  { %v1129_v6 = vcombine.low %v1049_v59, %v1051_v24  ;;  %v1130_v29 = vcombine.low %v1120_v45, %v1122_v32  ;;  %4754 = vtanh.f32 %v5607_v62 }
 0x387   :  { %v1137_v5 = vrot.slane %v1129_v6, %v5371_v28  ;;  %v1144_v14 = vrot.slane %v1130_v29, %v5371_v28 }
 0x389   :  { %v1145_v47 = vcombine.low %v1137_v5, %v1144_v14 }
 0x38b   :  { %v1147_v0 = vadd.f32 %v1145_v47, %v982_v15 }
 0x38d   :  { %v3137_v58 = vmul.f32 -1.442695, %v1147_v0  ;;  %v1155_v45 = vrot.slane %v1147_v0, 6  ;;  %v6482_v0 = vld [vmem:[#allocation15_spill] sm:$0xff] }
 0x38f   :  { %4756 = vpow2.f32 %v3137_v58  ;;  %v4755_v3 = vpop.eup %4754  ;;  %v6483_v58 = vld [vmem:[#allocation16_spill] sm:$0xff] }
 0x390   :  { %v978_v4 = vmul.f32 %v4755_v3, %v4753_v48  ;;  %v6484_v48 = vld [vmem:[#allocation17_spill] sm:$0xff]  ;;  %v6485_v3 = vld [vmem:[#allocation18_spill] sm:$0xff] }
 0x392   :  { %980 = vst [vmem:[#allocation8 + $0x2] sm:$0x3] %v978_v4  ;;  %1232 = vmatprep.mubr.f32.mxu0 %v978_v4  ;;  %1303 = vmatprep.mubr.f32.mxu1 %v978_v4  ;;  %v6486_v4 = vld [vmem:[#allocation19_spill] sm:$0xff] }
 0x399   :  { %v4757_v30 = vpop.eup %4756 }
 0x39a   :  { %v1151_v21 = vadd.f32 1.0, %v4757_v30  ;;  %v6487_v30 = vld [vmem:[#allocation20_spill] sm:$0xff] }
 0x39c   :  { %4758 = vrcp.f32 %v1151_v21  ;;  %v6488_v21 = vld [vmem:[#allocation21_spill] sm:$0xff] }
 0x39d   :  { %4760 = vtanh.f32 %v1155_v45  ;;  %v6489_v45 = vld [vmem:[#allocation22_spill] sm:$0xff] }
 0x3a6   :  { %v4759_v59 = vpop.eup %4758 }
 0x3a7   :  { %v1159_v24 = vrot.slane %v4759_v59, 2  ;;  %v4761_v32 = vpop.eup %4760  ;;  %v1165_v14 = vrot.slane %v4759_v59, 4 }
 0x3a8   :  { %v1162_v6 = vmul.f32 %v4761_v32, %v4759_v59  ;;  %v6490_v59 = vld [vmem:[#allocation23_spill] sm:$0xff]  ;;  %v6492_v32 = vld [vmem:[#allocation25_spill] sm:$0xff] }
 0x3a9   :  { %v1161_v29 = vmul.f32 %v1159_v24, %v5501_v56  ;;  %v6481_v56 = vld [vmem:[#allocation14_spill] sm:$0xff]  ;;  %v6491_v24 = vld [vmem:[#allocation24_spill] sm:$0xff] }
 0x3ab   :  { %v5613_v5 = vadd.f32 %v1162_v6, %v1161_v29  ;;  %v6493_v6 = vld [vmem:[#allocation26_spill] sm:$0xff]  ;;  %v6494_v29 = vld [vmem:[#allocation27_spill] sm:$0xff] }
 0x3ad   :  { %4762 = vtanh.f32 %v5613_v5 }
 0x3b7   :  { %v4763_v15 = vpop.eup %4762 }
 0x3b8   :  { %v1167_v47 = vmul.f32 %v4763_v15, %v1165_v14  ;;  %v6495_v14 = vld [vmem:[#allocation28_spill] sm:$0xff]  ;;  %v6496_v15 = vld [vmem:[#allocation29_spill] sm:$0xff] }
 0x3ba   :  { %1233 = vmatmul.mubr.f32.vlgmr.msra.gmra.mrb[10].mxu0 %v1167_v47  ;;  %1304 = vmatmul.mubr.f32.vlgmr.msra.gmra.mrb[10].mxu1 %v1167_v47 }
 0x3bb   :  { %3740 = vmatpush1.bf16.msra.mxu0 %v5078_v9  ;;  %3772 = vmatpush1.bf16.msra.mxu1 %v5081_v13 }
 0x3bc   :  { %3742 = vmatprep.subr.bf16.mxu0 %v5085_v17  ;;  %3774 = vmatprep.subr.bf16.mxu1 %v5087_v18 }
 0x3bd   :  { %1402 = vmatprep.mubr.f32.mxu0 %v6369_v8  ;;  %1473 = vmatprep.mubr.f32.mxu1 %v6369_v8 }
 0x3bf   :  { %3744 = vmatpush1.bf16.msra.mxu0 %v5090_v22  ;;  %3776 = vmatpush1.bf16.msra.mxu1 %v5094_v26 }
 0x3c0   :  { %3746 = vmatprep.subr.bf16.mxu0 %v5096_v27  ;;  %3778 = vmatprep.subr.bf16.mxu1 %v5098_v31 }
 0x3c3   :  { %3748 = vmatpush1.bf16.msra.mxu0 %v5101_v35  ;;  %3780 = vmatpush1.bf16.msra.mxu1 %v5105_v39 }
 0x3c4   :  { %3750 = vmatprep.subr.bf16.mxu0 %v5107_v40  ;;  %3782 = vmatprep.subr.bf16.mxu1 %v5110_v44 }
 0x3c7   :  { %3752 = vmatpush1.bf16.msra.mxu0 %v5113_v51  ;;  %3784 = vmatpush1.bf16.msra.mxu1 %v5117_v52 }
 0x3c8   :  { %3754 = vmatprep.subr.bf16.mxu0 %v5119_v53  ;;  %3786 = vmatprep.subr.bf16.mxu1 %v5122_v57 }
 0x3cb   :  { %3756 = vmatpush1.bf16.msra.mxu0 %v5125_v63  ;;  %3788 = vmatpush1.bf16.msra.mxu1 %v5129_v1 }
 0x3cc   :  { %3758 = vmatprep.subr.bf16.mxu0 %v5131_v2  ;;  %3790 = vmatprep.subr.bf16.mxu1 %v5134_v7 }
 0x3cf   :  { %3760 = vmatpush1.bf16.msra.mxu0 %v5137_v16  ;;  %3792 = vmatpush1.bf16.msra.mxu1 %v5141_v19 }
 0x3d0   :  { %3762 = vmatprep.subr.bf16.mxu0 %v5143_v20  ;;  %3794 = vmatprep.subr.bf16.mxu1 %v5146_v25 }
 0x3d3   :  { %3764 = vmatpush1.bf16.msra.mxu0 %v5149_v34  ;;  %3796 = vmatpush1.bf16.msra.mxu1 %v5153_v36 }
 0x3d4   :  { %3766 = vmatprep.subr.bf16.mxu0 %v5155_v37  ;;  %3798 = vmatprep.subr.bf16.mxu1 %v5158_v43 }
 0x3d7   :  { %3768 = vmatpush1.bf16.msra.mxu0 %v5161_v50  ;;  %3800 = vmatpush1.bf16.msra.mxu1 %v5165_v54 }
 0x3d8   :  { %3802 = vmatprep.subr.bf16.mxu0 %v5167_v55  ;;  %3866 = vmatprep.subr.bf16.mxu1 %v5170_v60 }
 0x3da   :  { %1403 = vmatmul.mubr.f32.vlgmr.msra.gmra.mrb[12].mxu0 %v1167_v47  ;;  %1474 = vmatmul.mubr.f32.vlgmr.msra.gmra.mrb[12].mxu1 %v1167_v47  ;;  %v6497_v47 = vld [vmem:[#allocation30_spill] sm:$0xff] }
 0x3db   :  { %3804 = vmatpush1.bf16.msra.mxu0 %v5173_v10  ;;  %3868 = vmatpush1.bf16.msra.mxu1 %v5177_v11 }
 0x3dc   :  { %3806 = vmatprep.subr.bf16.mxu0 %v5179_v12  ;;  %3870 = vmatprep.subr.bf16.mxu1 %v5182_v23 }
 0x3df   :  { %3808 = vmatpush1.bf16.msra.mxu0 %v5187_v33  ;;  %3872 = vmatpush1.bf16.msra.mxu1 %v5191_v38 }
 0x3e0   :  { %3810 = vmatprep.subr.bf16.mxu0 %v5193_v41  ;;  %3874 = vmatprep.subr.bf16.mxu1 %v5196_v46 }
 0x3e3   :  { %3812 = vmatpush1.bf16.msra.mxu0 %v5201_v49  ;;  %3876 = vmatpush1.bf16.msra.mxu1 %v6481_v56 }
 0x3e4   :  { %3814 = vmatprep.subr.bf16.mxu0 %v6482_v0  ;;  %3878 = vmatprep.subr.bf16.mxu1 %v6483_v58 }
 0x3e7   :  { %3816 = vmatpush1.bf16.msra.mxu0 %v6484_v48  ;;  %3880 = vmatpush1.bf16.msra.mxu1 %v6485_v3 }
 0x3e8   :  { %3818 = vmatprep.subr.bf16.mxu0 %v6486_v4  ;;  %3882 = vmatprep.subr.bf16.mxu1 %v6487_v30  ;;  %v6498_v30 = vld [vmem:[#allocation31_spill] sm:$0xff] }
 0x3e9   :  { %v6536_v4 = vld [vmem:[#allocation67_spill] sm:$0xff] }
 0x3eb   :  { %3820 = vmatpush1.bf16.msra.mxu0 %v6488_v21  ;;  %3884 = vmatpush1.bf16.msra.mxu1 %v6489_v45  ;;  %v6499_v21 = vld [vmem:[#allocation32_spill] sm:$0xff]  ;;  %v6500_v45 = vld [vmem:[#allocation33_spill] sm:$0xff] }
 0x3ec   :  { %3822 = vmatprep.subr.bf16.mxu0 %v6490_v59  ;;  %3886 = vmatprep.subr.bf16.mxu1 %v6491_v24  ;;  %v6501_v59 = vld [vmem:[#allocation34_spill] sm:$0xff]  ;;  %v6502_v24 = vld [vmem:[#allocation35_spill] sm:$0xff] }
 0x3ef   :  { %3824 = vmatpush1.bf16.msra.mxu0 %v6492_v32  ;;  %3888 = vmatpush1.bf16.msra.mxu1 %v6493_v6  ;;  %v6503_v32 = vld [vmem:[#allocation36_spill] sm:$0xff]  ;;  %v6504_v6 = vld [vmem:[#allocation37_spill] sm:$0xff] }
 0x3f0   :  { %3826 = vmatprep.subr.bf16.mxu0 %v6494_v29  ;;  %3890 = vmatprep.subr.bf16.mxu1 %v6495_v14  ;;  %v6505_v29 = vld [vmem:[#allocation38_spill] sm:$0xff]  ;;  %v6506_v14 = vld [vmem:[#allocation39_spill] sm:$0xff] }
 0x3f3   :  { %3828 = vmatpush1.bf16.msra.mxu0 %v6496_v15  ;;  %3892 = vmatpush1.bf16.msra.mxu1 %v6497_v47  ;;  %v6507_v15 = vld [vmem:[#allocation40_spill] sm:$0xff]  ;;  %v6508_v47 = vld [vmem:[#allocation41_spill] sm:$0xff] }
 0x3f4   :  { %3830 = vmatprep.subr.bf16.mxu0 %v6498_v30  ;;  %3894 = vmatprep.subr.bf16.mxu1 %v6499_v21  ;;  %v6509_v30 = vld [vmem:[#allocation42_spill] sm:$0xff]  ;;  %v6510_v21 = vld [vmem:[#allocation43_spill] sm:$0xff] }
 0x3f7   :  { %3832 = vmatpush1.bf16.msra.mxu0 %v6500_v45  ;;  %3896 = vmatpush1.bf16.msra.mxu1 %v6501_v59  ;;  %v6511_v45 = vld [vmem:[#allocation44_spill] sm:$0xff]  ;;  %v6512_v59 = vld [vmem:[#allocation45_spill] sm:$0xff] }
 0x3f8   :  { %3834 = vmatprep.subr.bf16.mxu0 %v6502_v24  ;;  %3898 = vmatprep.subr.bf16.mxu1 %v6503_v32  ;;  %v6513_v24 = vld [vmem:[#allocation46_spill] sm:$0xff]  ;;  %v6514_v32 = vld [vmem:[#allocation47_spill] sm:$0xff] }
 0x3fb   :  { %3836 = vmatpush1.bf16.msra.mxu0 %v6504_v6  ;;  %3900 = vmatpush1.bf16.msra.mxu1 %v6505_v29  ;;  %v6515_v6 = vld [vmem:[#allocation48_spill] sm:$0xff]  ;;  %v6516_v29 = vld [vmem:[#allocation49_spill] sm:$0xff] }
 0x3fc   :  { %3838 = vmatprep.subr.bf16.mxu0 %v6506_v14  ;;  %3902 = vmatprep.subr.bf16.mxu1 %v6507_v15  ;;  %v6517_v14 = vld [vmem:[#allocation50_spill] sm:$0xff]  ;;  %v6518_v15 = vld [vmem:[#allocation51_spill] sm:$0xff] }
 0x3ff   :  { %3840 = vmatpush1.bf16.msra.mxu0 %v6508_v47  ;;  %3904 = vmatpush1.bf16.msra.mxu1 %v6509_v30  ;;  %v6519_v47 = vld [vmem:[#allocation52_spill] sm:$0xff]  ;;  %v6520_v30 = vld [vmem:[#allocation53_spill] sm:$0xff] }
 0x400   :  { %3842 = vmatprep.subr.bf16.mxu0 %v6510_v21  ;;  %3906 = vmatprep.subr.bf16.mxu1 %v6511_v45  ;;  %v6521_v21 = vld [vmem:[#allocation54_spill] sm:$0xff]  ;;  %v6522_v45 = vld [vmem:[#allocation55_spill] sm:$0xff] }
 0x403   :  { %3844 = vmatpush1.bf16.msra.mxu0 %v6512_v59  ;;  %3908 = vmatpush1.bf16.msra.mxu1 %v6513_v24  ;;  %v6523_v59 = vld [vmem:[#allocation56_spill] sm:$0xff]  ;;  %v6524_v24 = vld [vmem:[#allocation57_spill] sm:$0xff] }
 0x404   :  { %3846 = vmatprep.subr.bf16.mxu0 %v6514_v32  ;;  %3910 = vmatprep.subr.bf16.mxu1 %v6515_v6  ;;  %v6525_v32 = vld [vmem:[#allocation58_spill] sm:$0xff]  ;;  %v6526_v6 = vld [vmem:[#allocation59_spill] sm:$0xff] }
 0x407   :  { %3848 = vmatpush1.bf16.msra.mxu0 %v6516_v29  ;;  %3912 = vmatpush1.bf16.msra.mxu1 %v6517_v14  ;;  %v6527_v29 = vld [vmem:[#allocation60_spill] sm:$0xff]  ;;  %v6528_v14 = vld [vmem:[#allocation61_spill] sm:$0xff] }
 0x408   :  { %3850 = vmatprep.subr.bf16.mxu0 %v6518_v15  ;;  %3914 = vmatprep.subr.bf16.mxu1 %v6519_v47  ;;  %v6529_v15 = vld [vmem:[#allocation62_spill] sm:$0xff]  ;;  %v6530_v47 = vld [vmem:[#allocation63_spill] sm:$0xff] }
 0x40b   :  { %3852 = vmatpush1.bf16.msra.mxu0 %v6520_v30  ;;  %3916 = vmatpush1.bf16.msra.mxu1 %v6521_v21  ;;  %v6531_v30 = vld [vmem:[#allocation64_spill] sm:$0xff]  ;;  %v6532_v21 = vld [vmem:[#allocation65_spill] sm:$0xff] }
 0x40c   :  { %3854 = vmatprep.subr.bf16.mxu0 %v6522_v45  ;;  %3918 = vmatprep.subr.bf16.mxu1 %v6523_v59  ;;  %v6533_v45 = vld [vmem:[#allocation66_spill] sm:$0xff]  ;;  %v6534_v59 = vld [vmem:[#allocation12_spill] sm:$0xff] }
 0x40f   :  { %3856 = vmatpush1.bf16.msra.mxu0 %v6524_v24  ;;  %3920 = vmatpush1.bf16.msra.mxu1 %v6525_v32  ;;  %v6535_v24 = vld [vmem:[#allocation13_spill] sm:$0xff] }
 0x410   :  { %3858 = vmatprep.subr.bf16.mxu0 %v6526_v6  ;;  %3922 = vmatprep.subr.bf16.mxu1 %v6527_v29 }
 0x413   :  { %3860 = vmatpush1.bf16.msra.mxu0 %v6528_v14  ;;  %3924 = vmatpush1.bf16.msra.mxu1 %v6529_v15 }
 0x414   :  { %3862 = vmatprep.subr.bf16.mxu0 %v6530_v47  ;;  %3926 = vmatprep.subr.bf16.mxu1 %v6531_v30  ;;  %v6537_v30 = vld [vmem:[#allocation68_spill] sm:$0xff] }
 0x417   :  { %3864 = vmatpush1.bf16.msra.mxu0 %v6532_v21  ;;  %3928 = vmatpush1.bf16.msra.mxu1 %v6533_v45 }
 0x418   :  { %3930 = vmatprep.subr.bf16.mxu0 %v6534_v59  ;;  %3962 = vmatprep.subr.bf16.mxu1 %v6535_v24 }
 0x48d   :  { %v1234_v32 = vpop.f32.mrb[10].mxu0  ;;  %v1305_v6 = vpop.f32.mrb[10].mxu1 }
 0x48e   :  { %v1235_v29 = vadd.f32 %v1234_v32, %v6536_v4  ;;  %v1236_v3 = vpop.f32.mrb[11].mxu0  ;;  %v1307_v14 = vpop.f32.mrb[11].mxu1  ;;  %v1306_v21 = vadd.f32 %v1305_v6, %v6537_v30 }
 0x48f   :  { %v1237_v15 = vadd.f32 %v1236_v3, %v5483_v42  ;;  %v1308_v45 = vadd.f32 %v1307_v14, %v5491_v61 }
 0x490   :  { %v3138_v48 = vmul.f32 -1.442695, %v1235_v29  ;;  %v3140_v58 = vmul.f32 -1.442695, %v1306_v21 }
 0x491   :  { %v3139_v47 = vmul.f32 -1.442695, %v1237_v15 }
 0x492   :  { %4764 = vpow2.f32 %v3138_v48 }
 0x493   :  { %4766 = vpow2.f32 %v3139_v47 }
 0x494   :  { %4768 = vtanh.f32 %v1308_v45 }
 0x495   :  { %4770 = vpow2.f32 %v3140_v58 }
 0x49c   :  { %v4765_v59 = vpop.eup %4764 }
 0x49d   :  { %v1319_v0 = vadd.f32 1.0, %v4765_v59  ;;  %v4767_v24 = vpop.eup %4766 }
 0x49e   :  { %v1320_v32 = vadd.f32 1.0, %v4767_v24  ;;  %v4769_v4 = vpop.eup %4768 }
 0x49f   :  { %4772 = vrcp.f32 %v1319_v0  ;;  %v4771_v56 = vpop.eup %4770 }
 0x4a0   :  { %4774 = vrcp.f32 %v1320_v32  ;;  %v1321_v48 = vadd.f32 1.0, %v4771_v56 }
 0x4a2   :  { %4776 = vrcp.f32 %v1321_v48 }
 0x4a9   :  { %v4773_v3 = vpop.eup %4772 }
 0x4aa   :  { %v1330_v29 = vmul.f32 %v4773_v3, %v4769_v4  ;;  %v4775_v15 = vpop.eup %4774  ;;  %v1337_v4 = vld [vmem:[#allocation2 + $0x18] sm:$0xff] }
 0x4ab   :  { %v1329_v47 = vmul.f32 %v4775_v15, %v5607_v62 }
 0x4ac   :  { %v4777_v62 = vpop.eup %4776 }
 0x4ad   :  { %v1404_v6 = vpop.f32.mrb[12].mxu0  ;;  %v1475_v30 = vpop.f32.mrb[12].mxu1  ;;  %v5719_v14 = vadd.f32 %v1330_v29, %v1329_v47 }
 0x4ae   :  { %v1406_v21 = vpop.f32.mrb[13].mxu0  ;;  %v1477_v59 = vpop.f32.mrb[13].mxu1 }
 0x4af   :  { %v1484_v45 = vcombine.low %v1404_v6, %v1406_v21  ;;  %v1485_v58 = vcombine.low %v1475_v30, %v1477_v59  ;;  %4778 = vtanh.f32 %v5719_v14 }
 0x4b1   :  { %v1492_v0 = vrot.slane %v1484_v45, %v5371_v28  ;;  %v1499_v24 = vrot.slane %v1485_v58, %v5371_v28 }
 0x4b3   :  { %v1500_v32 = vcombine.low %v1492_v0, %v1499_v24 }
 0x4b5   :  { %v1502_v56 = vadd.f32 %v1500_v32, %v1337_v4 }
 0x4b7   :  { %v3141_v3 = vmul.f32 -1.442695, %v1502_v56  ;;  %v1510_v30 = vrot.slane %v1502_v56, 6  ;;  %v6539_v56 = vld [vmem:[#allocation15_spill] sm:$0xff] }
 0x4b9   :  { %4780 = vpow2.f32 %v3141_v3  ;;  %v4779_v15 = vpop.eup %4778  ;;  %v6540_v3 = vld [vmem:[#allocation16_spill] sm:$0xff] }
 0x4ba   :  { %v1333_v29 = vmul.f32 %v4779_v15, %v4777_v62  ;;  %v6541_v62 = vld [vmem:[#allocation17_spill] sm:$0xff]  ;;  %v6542_v15 = vld [vmem:[#allocation18_spill] sm:$0xff] }
 0x4bc   :  { %1335 = vst [vmem:[#allocation8 + $0x4] sm:$0x3] %v1333_v29  ;;  %1587 = vmatprep.mubr.f32.mxu0 %v1333_v29  ;;  %1658 = vmatprep.mubr.f32.mxu1 %v1333_v29  ;;  %v6543_v29 = vld [vmem:[#allocation19_spill] sm:$0xff] }
 0x4c3   :  { %v4781_v48 = vpop.eup %4780 }
 0x4c4   :  { %v1506_v47 = vadd.f32 1.0, %v4781_v48  ;;  %v6544_v48 = vld [vmem:[#allocation20_spill] sm:$0xff] }
 0x4c6   :  { %4782 = vrcp.f32 %v1506_v47  ;;  %v6545_v47 = vld [vmem:[#allocation21_spill] sm:$0xff] }
 0x4c7   :  { %4784 = vtanh.f32 %v1510_v30  ;;  %v6546_v30 = vld [vmem:[#allocation22_spill] sm:$0xff] }
 0x4d0   :  { %v4783_v6 = vpop.eup %4782 }
 0x4d1   :  { %v1514_v21 = vrot.slane %v4783_v6, 2  ;;  %v4785_v59 = vpop.eup %4784  ;;  %v1520_v24 = vrot.slane %v4783_v6, 4 }
 0x4d2   :  { %v1517_v45 = vmul.f32 %v4785_v59, %v4783_v6  ;;  %v6547_v6 = vld [vmem:[#allocation23_spill] sm:$0xff]  ;;  %v6549_v59 = vld [vmem:[#allocation25_spill] sm:$0xff] }
 0x4d3   :  { %v1516_v58 = vmul.f32 %v1514_v21, %v5613_v5  ;;  %v6538_v5 = vld [vmem:[#allocation14_spill] sm:$0xff]  ;;  %v6548_v21 = vld [vmem:[#allocation24_spill] sm:$0xff] }
 0x4d5   :  { %v5725_v0 = vadd.f32 %v1517_v45, %v1516_v58  ;;  %v6550_v45 = vld [vmem:[#allocation26_spill] sm:$0xff]  ;;  %v6551_v58 = vld [vmem:[#allocation27_spill] sm:$0xff] }
 0x4d7   :  { %4786 = vtanh.f32 %v5725_v0 }
 0x4e1   :  { %v4787_v4 = vpop.eup %4786 }
 0x4e2   :  { %v1522_v32 = vmul.f32 %v4787_v4, %v1520_v24  ;;  %v6552_v24 = vld [vmem:[#allocation28_spill] sm:$0xff]  ;;  %v6553_v4 = vld [vmem:[#allocation29_spill] sm:$0xff] }
 0x4e4   :  { %1588 = vmatmul.mubr.f32.vlgmr.msra.gmra.mrb[14].mxu0 %v1522_v32  ;;  %1659 = vmatmul.mubr.f32.vlgmr.msra.gmra.mrb[14].mxu1 %v1522_v32 }
 0x4e5   :  { %3932 = vmatpush1.bf16.msra.mxu0 %v5078_v9  ;;  %3964 = vmatpush1.bf16.msra.mxu1 %v5081_v13 }
 0x4e6   :  { %3934 = vmatprep.subr.bf16.mxu0 %v5085_v17  ;;  %3966 = vmatprep.subr.bf16.mxu1 %v5087_v18 }
 0x4e7   :  { %1757 = vmatprep.mubr.f32.mxu0 %v6369_v8  ;;  %1828 = vmatprep.mubr.f32.mxu1 %v6369_v8 }
 0x4e9   :  { %3936 = vmatpush1.bf16.msra.mxu0 %v5090_v22  ;;  %3968 = vmatpush1.bf16.msra.mxu1 %v5094_v26 }
 0x4ea   :  { %3938 = vmatprep.subr.bf16.mxu0 %v5096_v27  ;;  %3970 = vmatprep.subr.bf16.mxu1 %v5098_v31 }
 0x4ed   :  { %3940 = vmatpush1.bf16.msra.mxu0 %v5101_v35  ;;  %3972 = vmatpush1.bf16.msra.mxu1 %v5105_v39 }
 0x4ee   :  { %3942 = vmatprep.subr.bf16.mxu0 %v5107_v40  ;;  %3974 = vmatprep.subr.bf16.mxu1 %v5110_v44 }
 0x4f1   :  { %3944 = vmatpush1.bf16.msra.mxu0 %v5113_v51  ;;  %3976 = vmatpush1.bf16.msra.mxu1 %v5117_v52 }
 0x4f2   :  { %3946 = vmatprep.subr.bf16.mxu0 %v5119_v53  ;;  %3978 = vmatprep.subr.bf16.mxu1 %v5122_v57 }
 0x4f5   :  { %3948 = vmatpush1.bf16.msra.mxu0 %v5125_v63  ;;  %3980 = vmatpush1.bf16.msra.mxu1 %v5129_v1 }
 0x4f6   :  { %3950 = vmatprep.subr.bf16.mxu0 %v5131_v2  ;;  %3982 = vmatprep.subr.bf16.mxu1 %v5134_v7 }
 0x4f9   :  { %3952 = vmatpush1.bf16.msra.mxu0 %v5137_v16  ;;  %3984 = vmatpush1.bf16.msra.mxu1 %v5141_v19 }
 0x4fa   :  { %3954 = vmatprep.subr.bf16.mxu0 %v5143_v20  ;;  %3986 = vmatprep.subr.bf16.mxu1 %v5146_v25 }
 0x4fd   :  { %3956 = vmatpush1.bf16.msra.mxu0 %v5149_v34  ;;  %3988 = vmatpush1.bf16.msra.mxu1 %v5153_v36 }
 0x4fe   :  { %3958 = vmatprep.subr.bf16.mxu0 %v5155_v37  ;;  %3990 = vmatprep.subr.bf16.mxu1 %v5158_v43 }
 0x501   :  { %3960 = vmatpush1.bf16.msra.mxu0 %v5161_v50  ;;  %3992 = vmatpush1.bf16.msra.mxu1 %v5165_v54 }
 0x502   :  { %3994 = vmatprep.subr.bf16.mxu0 %v5167_v55  ;;  %4058 = vmatprep.subr.bf16.mxu1 %v5170_v60 }
 0x504   :  { %1758 = vmatmul.mubr.f32.vlgmr.msra.gmra.mrb[16].mxu0 %v1522_v32  ;;  %1829 = vmatmul.mubr.f32.vlgmr.msra.gmra.mrb[16].mxu1 %v1522_v32  ;;  %v6554_v32 = vld [vmem:[#allocation30_spill] sm:$0xff] }
 0x505   :  { %3996 = vmatpush1.bf16.msra.mxu0 %v5173_v10  ;;  %4060 = vmatpush1.bf16.msra.mxu1 %v5177_v11 }
 0x506   :  { %3998 = vmatprep.subr.bf16.mxu0 %v5179_v12  ;;  %4062 = vmatprep.subr.bf16.mxu1 %v5182_v23 }
 0x509   :  { %4000 = vmatpush1.bf16.msra.mxu0 %v5187_v33  ;;  %4064 = vmatpush1.bf16.msra.mxu1 %v5191_v38 }
 0x50a   :  { %4002 = vmatprep.subr.bf16.mxu0 %v5193_v41  ;;  %4066 = vmatprep.subr.bf16.mxu1 %v5196_v46 }
 0x50d   :  { %4004 = vmatpush1.bf16.msra.mxu0 %v5201_v49  ;;  %4068 = vmatpush1.bf16.msra.mxu1 %v6538_v5 }
 0x50e   :  { %4006 = vmatprep.subr.bf16.mxu0 %v6539_v56  ;;  %4070 = vmatprep.subr.bf16.mxu1 %v6540_v3 }
 0x511   :  { %4008 = vmatpush1.bf16.msra.mxu0 %v6541_v62  ;;  %4072 = vmatpush1.bf16.msra.mxu1 %v6542_v15 }
 0x512   :  { %4010 = vmatprep.subr.bf16.mxu0 %v6543_v29  ;;  %4074 = vmatprep.subr.bf16.mxu1 %v6544_v48  ;;  %v6555_v48 = vld [vmem:[#allocation31_spill] sm:$0xff] }
 0x513   :  { %v6593_v29 = vld [vmem:[#allocation67_spill] sm:$0xff] }
 0x515   :  { %4012 = vmatpush1.bf16.msra.mxu0 %v6545_v47  ;;  %4076 = vmatpush1.bf16.msra.mxu1 %v6546_v30  ;;  %v6556_v47 = vld [vmem:[#allocation32_spill] sm:$0xff]  ;;  %v6557_v30 = vld [vmem:[#allocation33_spill] sm:$0xff] }
 0x516   :  { %4014 = vmatprep.subr.bf16.mxu0 %v6547_v6  ;;  %4078 = vmatprep.subr.bf16.mxu1 %v6548_v21  ;;  %v6558_v6 = vld [vmem:[#allocation34_spill] sm:$0xff]  ;;  %v6559_v21 = vld [vmem:[#allocation35_spill] sm:$0xff] }
 0x519   :  { %4016 = vmatpush1.bf16.msra.mxu0 %v6549_v59  ;;  %4080 = vmatpush1.bf16.msra.mxu1 %v6550_v45  ;;  %v6560_v59 = vld [vmem:[#allocation36_spill] sm:$0xff]  ;;  %v6561_v45 = vld [vmem:[#allocation37_spill] sm:$0xff] }
 0x51a   :  { %4018 = vmatprep.subr.bf16.mxu0 %v6551_v58  ;;  %4082 = vmatprep.subr.bf16.mxu1 %v6552_v24  ;;  %v6562_v58 = vld [vmem:[#allocation38_spill] sm:$0xff]  ;;  %v6563_v24 = vld [vmem:[#allocation39_spill] sm:$0xff] }
 0x51d   :  { %4020 = vmatpush1.bf16.msra.mxu0 %v6553_v4  ;;  %4084 = vmatpush1.bf16.msra.mxu1 %v6554_v32  ;;  %v6564_v4 = vld [vmem:[#allocation40_spill] sm:$0xff]  ;;  %v6565_v32 = vld [vmem:[#allocation41_spill] sm:$0xff] }
 0x51e   :  { %4022 = vmatprep.subr.bf16.mxu0 %v6555_v48  ;;  %4086 = vmatprep.subr.bf16.mxu1 %v6556_v47  ;;  %v6566_v48 = vld [vmem:[#allocation42_spill] sm:$0xff]  ;;  %v6567_v47 = vld [vmem:[#allocation43_spill] sm:$0xff] }
 0x521   :  { %4024 = vmatpush1.bf16.msra.mxu0 %v6557_v30  ;;  %4088 = vmatpush1.bf16.msra.mxu1 %v6558_v6  ;;  %v6568_v30 = vld [vmem:[#allocation44_spill] sm:$0xff]  ;;  %v6569_v6 = vld [vmem:[#allocation45_spill] sm:$0xff] }
 0x522   :  { %4026 = vmatprep.subr.bf16.mxu0 %v6559_v21  ;;  %4090 = vmatprep.subr.bf16.mxu1 %v6560_v59  ;;  %v6570_v21 = vld [vmem:[#allocation46_spill] sm:$0xff]  ;;  %v6571_v59 = vld [vmem:[#allocation47_spill] sm:$0xff] }
 0x525   :  { %4028 = vmatpush1.bf16.msra.mxu0 %v6561_v45  ;;  %4092 = vmatpush1.bf16.msra.mxu1 %v6562_v58  ;;  %v6572_v45 = vld [vmem:[#allocation48_spill] sm:$0xff]  ;;  %v6573_v58 = vld [vmem:[#allocation49_spill] sm:$0xff] }
 0x526   :  { %4030 = vmatprep.subr.bf16.mxu0 %v6563_v24  ;;  %4094 = vmatprep.subr.bf16.mxu1 %v6564_v4  ;;  %v6574_v24 = vld [vmem:[#allocation50_spill] sm:$0xff]  ;;  %v6575_v4 = vld [vmem:[#allocation51_spill] sm:$0xff] }
 0x529   :  { %4032 = vmatpush1.bf16.msra.mxu0 %v6565_v32  ;;  %4096 = vmatpush1.bf16.msra.mxu1 %v6566_v48  ;;  %v6576_v32 = vld [vmem:[#allocation52_spill] sm:$0xff]  ;;  %v6577_v48 = vld [vmem:[#allocation53_spill] sm:$0xff] }
 0x52a   :  { %4034 = vmatprep.subr.bf16.mxu0 %v6567_v47  ;;  %4098 = vmatprep.subr.bf16.mxu1 %v6568_v30  ;;  %v6578_v47 = vld [vmem:[#allocation54_spill] sm:$0xff]  ;;  %v6579_v30 = vld [vmem:[#allocation55_spill] sm:$0xff] }
 0x52d   :  { %4036 = vmatpush1.bf16.msra.mxu0 %v6569_v6  ;;  %4100 = vmatpush1.bf16.msra.mxu1 %v6570_v21  ;;  %v6580_v6 = vld [vmem:[#allocation56_spill] sm:$0xff]  ;;  %v6581_v21 = vld [vmem:[#allocation57_spill] sm:$0xff] }
 0x52e   :  { %4038 = vmatprep.subr.bf16.mxu0 %v6571_v59  ;;  %4102 = vmatprep.subr.bf16.mxu1 %v6572_v45  ;;  %v6582_v59 = vld [vmem:[#allocation58_spill] sm:$0xff]  ;;  %v6583_v45 = vld [vmem:[#allocation59_spill] sm:$0xff] }
 0x531   :  { %4040 = vmatpush1.bf16.msra.mxu0 %v6573_v58  ;;  %4104 = vmatpush1.bf16.msra.mxu1 %v6574_v24  ;;  %v6584_v58 = vld [vmem:[#allocation60_spill] sm:$0xff]  ;;  %v6585_v24 = vld [vmem:[#allocation61_spill] sm:$0xff] }
 0x532   :  { %4042 = vmatprep.subr.bf16.mxu0 %v6575_v4  ;;  %4106 = vmatprep.subr.bf16.mxu1 %v6576_v32  ;;  %v6586_v4 = vld [vmem:[#allocation62_spill] sm:$0xff]  ;;  %v6587_v32 = vld [vmem:[#allocation63_spill] sm:$0xff] }
 0x535   :  { %4044 = vmatpush1.bf16.msra.mxu0 %v6577_v48  ;;  %4108 = vmatpush1.bf16.msra.mxu1 %v6578_v47  ;;  %v6588_v48 = vld [vmem:[#allocation64_spill] sm:$0xff]  ;;  %v6589_v47 = vld [vmem:[#allocation65_spill] sm:$0xff] }
 0x536   :  { %4046 = vmatprep.subr.bf16.mxu0 %v6579_v30  ;;  %4110 = vmatprep.subr.bf16.mxu1 %v6580_v6  ;;  %v6590_v30 = vld [vmem:[#allocation66_spill] sm:$0xff]  ;;  %v6591_v6 = vld [vmem:[#allocation12_spill] sm:$0xff] }
 0x539   :  { %4048 = vmatpush1.bf16.msra.mxu0 %v6581_v21  ;;  %4112 = vmatpush1.bf16.msra.mxu1 %v6582_v59  ;;  %v6592_v21 = vld [vmem:[#allocation13_spill] sm:$0xff] }
 0x53a   :  { %4050 = vmatprep.subr.bf16.mxu0 %v6583_v45  ;;  %4114 = vmatprep.subr.bf16.mxu1 %v6584_v58 }
 0x53d   :  { %4052 = vmatpush1.bf16.msra.mxu0 %v6585_v24  ;;  %4116 = vmatpush1.bf16.msra.mxu1 %v6586_v4 }
 0x53e   :  { %4054 = vmatprep.subr.bf16.mxu0 %v6587_v32  ;;  %4118 = vmatprep.subr.bf16.mxu1 %v6588_v48  ;;  %v6594_v48 = vld [vmem:[#allocation68_spill] sm:$0xff] }
 0x541   :  { %4056 = vmatpush1.bf16.msra.mxu0 %v6589_v47  ;;  %4120 = vmatpush1.bf16.msra.mxu1 %v6590_v30 }
 0x542   :  { %4122 = vmatprep.subr.bf16.mxu0 %v6591_v6  ;;  %4154 = vmatprep.subr.bf16.mxu1 %v6592_v21 }
 0x5b7   :  { %v1589_v59 = vpop.f32.mrb[14].mxu0  ;;  %v1660_v45 = vpop.f32.mrb[14].mxu1 }
 0x5b8   :  { %v1590_v58 = vadd.f32 %v1589_v59, %v6593_v29  ;;  %v1591_v15 = vpop.f32.mrb[15].mxu0  ;;  %v1662_v24 = vpop.f32.mrb[15].mxu1  ;;  %v1661_v47 = vadd.f32 %v1660_v45, %v6594_v48 }
 0x5b9   :  { %v1592_v4 = vadd.f32 %v1591_v15, %v5483_v42  ;;  %v1663_v30 = vadd.f32 %v1662_v24, %v5491_v61 }
 0x5ba   :  { %v3142_v62 = vmul.f32 -1.442695, %v1590_v58  ;;  %v3144_v3 = vmul.f32 -1.442695, %v1661_v47 }
 0x5bb   :  { %v3143_v32 = vmul.f32 -1.442695, %v1592_v4 }
 0x5bc   :  { %4788 = vpow2.f32 %v3142_v62 }
 0x5bd   :  { %4790 = vpow2.f32 %v3143_v32 }
 0x5be   :  { %4792 = vtanh.f32 %v1663_v30 }
 0x5bf   :  { %4794 = vpow2.f32 %v3144_v3 }
 0x5c6   :  { %v4789_v6 = vpop.eup %4788 }
 0x5c7   :  { %v1674_v56 = vadd.f32 1.0, %v4789_v6  ;;  %v4791_v21 = vpop.eup %4790 }
 0x5c8   :  { %v1675_v59 = vadd.f32 1.0, %v4791_v21  ;;  %v4793_v29 = vpop.eup %4792 }
 0x5c9   :  { %4796 = vrcp.f32 %v1674_v56  ;;  %v4795_v5 = vpop.eup %4794 }
 0x5ca   :  { %4798 = vrcp.f32 %v1675_v59  ;;  %v1676_v62 = vadd.f32 1.0, %v4795_v5 }
 0x5cc   :  { %4800 = vrcp.f32 %v1676_v62 }
 0x5d3   :  { %v4797_v15 = vpop.eup %4796 }
 0x5d4   :  { %v1685_v58 = vmul.f32 %v4797_v15, %v4793_v29  ;;  %v4799_v4 = vpop.eup %4798  ;;  %v1692_v29 = vld [vmem:[#allocation2 + $0x20] sm:$0xff] }
 0x5d5   :  { %v1684_v32 = vmul.f32 %v4799_v4, %v5719_v14 }
 0x5d6   :  { %v4801_v14 = vpop.eup %4800 }
 0x5d7   :  { %v1759_v45 = vpop.f32.mrb[16].mxu0  ;;  %v1830_v48 = vpop.f32.mrb[16].mxu1  ;;  %v5831_v24 = vadd.f32 %v1685_v58, %v1684_v32 }
 0x5d8   :  { %v1761_v47 = vpop.f32.mrb[17].mxu0  ;;  %v1832_v6 = vpop.f32.mrb[17].mxu1 }
 0x5d9   :  { %v1839_v30 = vcombine.low %v1759_v45, %v1761_v47  ;;  %v1840_v3 = vcombine.low %v1830_v48, %v1832_v6  ;;  %4802 = vtanh.f32 %v5831_v24 }
 0x5db   :  { %v1847_v56 = vrot.slane %v1839_v30, %v5371_v28  ;;  %v1854_v21 = vrot.slane %v1840_v3, %v5371_v28 }
 0x5dd   :  { %v1855_v59 = vcombine.low %v1847_v56, %v1854_v21 }
 0x5df   :  { %v1857_v5 = vadd.f32 %v1855_v59, %v1692_v29 }
 0x5e1   :  { %v3145_v15 = vmul.f32 -1.442695, %v1857_v5  ;;  %v1865_v48 = vrot.slane %v1857_v5, 6  ;;  %v6596_v5 = vld [vmem:[#allocation15_spill] sm:$0xff] }
 0x5e3   :  { %4804 = vpow2.f32 %v3145_v15  ;;  %v4803_v4 = vpop.eup %4802  ;;  %v6597_v15 = vld [vmem:[#allocation16_spill] sm:$0xff] }
 0x5e4   :  { %v1688_v58 = vmul.f32 %v4803_v4, %v4801_v14  ;;  %v6598_v14 = vld [vmem:[#allocation17_spill] sm:$0xff]  ;;  %v6599_v4 = vld [vmem:[#allocation18_spill] sm:$0xff] }
 0x5e6   :  { %1690 = vst [vmem:[#allocation8 + $0x6] sm:$0x3] %v1688_v58  ;;  %1942 = vmatprep.mubr.f32.mxu0 %v1688_v58  ;;  %2013 = vmatprep.mubr.f32.mxu1 %v1688_v58  ;;  %v6600_v58 = vld [vmem:[#allocation19_spill] sm:$0xff] }
 0x5ed   :  { %v4805_v62 = vpop.eup %4804 }
 0x5ee   :  { %v1861_v32 = vadd.f32 1.0, %v4805_v62  ;;  %v6601_v62 = vld [vmem:[#allocation20_spill] sm:$0xff] }
 0x5f0   :  { %4806 = vrcp.f32 %v1861_v32  ;;  %v6602_v32 = vld [vmem:[#allocation21_spill] sm:$0xff] }
 0x5f1   :  { %4808 = vtanh.f32 %v1865_v48  ;;  %v6603_v48 = vld [vmem:[#allocation22_spill] sm:$0xff] }
 0x5fa   :  { %v4807_v45 = vpop.eup %4806 }
 0x5fb   :  { %v1869_v47 = vrot.slane %v4807_v45, 2  ;;  %v4809_v6 = vpop.eup %4808  ;;  %v1875_v21 = vrot.slane %v4807_v45, 4 }
 0x5fc   :  { %v1872_v30 = vmul.f32 %v4809_v6, %v4807_v45  ;;  %v6604_v45 = vld [vmem:[#allocation23_spill] sm:$0xff]  ;;  %v6606_v6 = vld [vmem:[#allocation25_spill] sm:$0xff] }
 0x5fd   :  { %v1871_v3 = vmul.f32 %v1869_v47, %v5725_v0  ;;  %v6595_v0 = vld [vmem:[#allocation14_spill] sm:$0xff]  ;;  %v6605_v47 = vld [vmem:[#allocation24_spill] sm:$0xff] }
 0x5ff   :  { %v5837_v56 = vadd.f32 %v1872_v30, %v1871_v3  ;;  %v6607_v30 = vld [vmem:[#allocation26_spill] sm:$0xff]  ;;  %v6608_v3 = vld [vmem:[#allocation27_spill] sm:$0xff] }
 0x601   :  { %4810 = vtanh.f32 %v5837_v56 }
 0x60b   :  { %v4811_v29 = vpop.eup %4810 }
 0x60c   :  { %v1877_v59 = vmul.f32 %v4811_v29, %v1875_v21  ;;  %v6609_v21 = vld [vmem:[#allocation28_spill] sm:$0xff]  ;;  %v6610_v29 = vld [vmem:[#allocation29_spill] sm:$0xff] }
 0x60e   :  { %1943 = vmatmul.mubr.f32.vlgmr.msra.gmra.mrb[18].mxu0 %v1877_v59  ;;  %2014 = vmatmul.mubr.f32.vlgmr.msra.gmra.mrb[18].mxu1 %v1877_v59 }
 0x60f   :  { %4124 = vmatpush1.bf16.msra.mxu0 %v5078_v9  ;;  %4156 = vmatpush1.bf16.msra.mxu1 %v5081_v13 }
 0x610   :  { %4126 = vmatprep.subr.bf16.mxu0 %v5085_v17  ;;  %4158 = vmatprep.subr.bf16.mxu1 %v5087_v18 }
 0x611   :  { %2112 = vmatprep.mubr.f32.mxu0 %v6369_v8  ;;  %2183 = vmatprep.mubr.f32.mxu1 %v6369_v8 }
 0x613   :  { %4128 = vmatpush1.bf16.msra.mxu0 %v5090_v22  ;;  %4160 = vmatpush1.bf16.msra.mxu1 %v5094_v26 }
 0x614   :  { %4130 = vmatprep.subr.bf16.mxu0 %v5096_v27  ;;  %4162 = vmatprep.subr.bf16.mxu1 %v5098_v31 }
 0x617   :  { %4132 = vmatpush1.bf16.msra.mxu0 %v5101_v35  ;;  %4164 = vmatpush1.bf16.msra.mxu1 %v5105_v39 }
 0x618   :  { %4134 = vmatprep.subr.bf16.mxu0 %v5107_v40  ;;  %4166 = vmatprep.subr.bf16.mxu1 %v5110_v44 }
 0x61b   :  { %4136 = vmatpush1.bf16.msra.mxu0 %v5113_v51  ;;  %4168 = vmatpush1.bf16.msra.mxu1 %v5117_v52 }
 0x61c   :  { %4138 = vmatprep.subr.bf16.mxu0 %v5119_v53  ;;  %4170 = vmatprep.subr.bf16.mxu1 %v5122_v57 }
 0x61f   :  { %4140 = vmatpush1.bf16.msra.mxu0 %v5125_v63  ;;  %4172 = vmatpush1.bf16.msra.mxu1 %v5129_v1 }
 0x620   :  { %4142 = vmatprep.subr.bf16.mxu0 %v5131_v2  ;;  %4174 = vmatprep.subr.bf16.mxu1 %v5134_v7 }
 0x623   :  { %4144 = vmatpush1.bf16.msra.mxu0 %v5137_v16  ;;  %4176 = vmatpush1.bf16.msra.mxu1 %v5141_v19 }
 0x624   :  { %4146 = vmatprep.subr.bf16.mxu0 %v5143_v20  ;;  %4178 = vmatprep.subr.bf16.mxu1 %v5146_v25 }
 0x627   :  { %4148 = vmatpush1.bf16.msra.mxu0 %v5149_v34  ;;  %4180 = vmatpush1.bf16.msra.mxu1 %v5153_v36 }
 0x628   :  { %4150 = vmatprep.subr.bf16.mxu0 %v5155_v37  ;;  %4182 = vmatprep.subr.bf16.mxu1 %v5158_v43 }
 0x62b   :  { %4152 = vmatpush1.bf16.msra.mxu0 %v5161_v50  ;;  %4184 = vmatpush1.bf16.msra.mxu1 %v5165_v54 }
 0x62c   :  { %4186 = vmatprep.subr.bf16.mxu0 %v5167_v55  ;;  %4250 = vmatprep.subr.bf16.mxu1 %v5170_v60 }
 0x62e   :  { %2113 = vmatmul.mubr.f32.vlgmr.msra.gmra.mrb[20].mxu0 %v1877_v59  ;;  %2184 = vmatmul.mubr.f32.vlgmr.msra.gmra.mrb[20].mxu1 %v1877_v59  ;;  %v6611_v59 = vld [vmem:[#allocation30_spill] sm:$0xff] }
 0x62f   :  { %4188 = vmatpush1.bf16.msra.mxu0 %v5173_v10  ;;  %4252 = vmatpush1.bf16.msra.mxu1 %v5177_v11 }
 0x630   :  { %4190 = vmatprep.subr.bf16.mxu0 %v5179_v12  ;;  %4254 = vmatprep.subr.bf16.mxu1 %v5182_v23 }
 0x633   :  { %4192 = vmatpush1.bf16.msra.mxu0 %v5187_v33  ;;  %4256 = vmatpush1.bf16.msra.mxu1 %v5191_v38 }
 0x634   :  { %4194 = vmatprep.subr.bf16.mxu0 %v5193_v41  ;;  %4258 = vmatprep.subr.bf16.mxu1 %v5196_v46 }
 0x637   :  { %4196 = vmatpush1.bf16.msra.mxu0 %v5201_v49  ;;  %4260 = vmatpush1.bf16.msra.mxu1 %v6595_v0 }
 0x638   :  { %4198 = vmatprep.subr.bf16.mxu0 %v6596_v5  ;;  %4262 = vmatprep.subr.bf16.mxu1 %v6597_v15 }
 0x63b   :  { %4200 = vmatpush1.bf16.msra.mxu0 %v6598_v14  ;;  %4264 = vmatpush1.bf16.msra.mxu1 %v6599_v4 }
 0x63c   :  { %4202 = vmatprep.subr.bf16.mxu0 %v6600_v58  ;;  %4266 = vmatprep.subr.bf16.mxu1 %v6601_v62  ;;  %v6612_v62 = vld [vmem:[#allocation31_spill] sm:$0xff] }
 0x63d   :  { %v6650_v58 = vld [vmem:[#allocation67_spill] sm:$0xff] }
 0x63f   :  { %4204 = vmatpush1.bf16.msra.mxu0 %v6602_v32  ;;  %4268 = vmatpush1.bf16.msra.mxu1 %v6603_v48  ;;  %v6613_v32 = vld [vmem:[#allocation32_spill] sm:$0xff]  ;;  %v6614_v48 = vld [vmem:[#allocation33_spill] sm:$0xff] }
 0x640   :  { %4206 = vmatprep.subr.bf16.mxu0 %v6604_v45  ;;  %4270 = vmatprep.subr.bf16.mxu1 %v6605_v47  ;;  %v6615_v45 = vld [vmem:[#allocation34_spill] sm:$0xff]  ;;  %v6616_v47 = vld [vmem:[#allocation35_spill] sm:$0xff] }
 0x643   :  { %4208 = vmatpush1.bf16.msra.mxu0 %v6606_v6  ;;  %4272 = vmatpush1.bf16.msra.mxu1 %v6607_v30  ;;  %v6617_v6 = vld [vmem:[#allocation36_spill] sm:$0xff]  ;;  %v6618_v30 = vld [vmem:[#allocation37_spill] sm:$0xff] }
 0x644   :  { %4210 = vmatprep.subr.bf16.mxu0 %v6608_v3  ;;  %4274 = vmatprep.subr.bf16.mxu1 %v6609_v21  ;;  %v6619_v3 = vld [vmem:[#allocation38_spill] sm:$0xff]  ;;  %v6620_v21 = vld [vmem:[#allocation39_spill] sm:$0xff] }
 0x647   :  { %4212 = vmatpush1.bf16.msra.mxu0 %v6610_v29  ;;  %4276 = vmatpush1.bf16.msra.mxu1 %v6611_v59  ;;  %v6621_v29 = vld [vmem:[#allocation40_spill] sm:$0xff]  ;;  %v6622_v59 = vld [vmem:[#allocation41_spill] sm:$0xff] }
 0x648   :  { %4214 = vmatprep.subr.bf16.mxu0 %v6612_v62  ;;  %4278 = vmatprep.subr.bf16.mxu1 %v6613_v32  ;;  %v6623_v62 = vld [vmem:[#allocation42_spill] sm:$0xff]  ;;  %v6624_v32 = vld [vmem:[#allocation43_spill] sm:$0xff] }
 0x64b   :  { %4216 = vmatpush1.bf16.msra.mxu0 %v6614_v48  ;;  %4280 = vmatpush1.bf16.msra.mxu1 %v6615_v45  ;;  %v6625_v48 = vld [vmem:[#allocation44_spill] sm:$0xff]  ;;  %v6626_v45 = vld [vmem:[#allocation45_spill] sm:$0xff] }
 0x64c   :  { %4218 = vmatprep.subr.bf16.mxu0 %v6616_v47  ;;  %4282 = vmatprep.subr.bf16.mxu1 %v6617_v6  ;;  %v6627_v47 = vld [vmem:[#allocation46_spill] sm:$0xff]  ;;  %v6628_v6 = vld [vmem:[#allocation47_spill] sm:$0xff] }
 0x64f   :  { %4220 = vmatpush1.bf16.msra.mxu0 %v6618_v30  ;;  %4284 = vmatpush1.bf16.msra.mxu1 %v6619_v3  ;;  %v6629_v30 = vld [vmem:[#allocation48_spill] sm:$0xff]  ;;  %v6630_v3 = vld [vmem:[#allocation49_spill] sm:$0xff] }
 0x650   :  { %4222 = vmatprep.subr.bf16.mxu0 %v6620_v21  ;;  %4286 = vmatprep.subr.bf16.mxu1 %v6621_v29  ;;  %v6631_v21 = vld [vmem:[#allocation50_spill] sm:$0xff]  ;;  %v6632_v29 = vld [vmem:[#allocation51_spill] sm:$0xff] }
 0x653   :  { %4224 = vmatpush1.bf16.msra.mxu0 %v6622_v59  ;;  %4288 = vmatpush1.bf16.msra.mxu1 %v6623_v62  ;;  %v6633_v59 = vld [vmem:[#allocation52_spill] sm:$0xff]  ;;  %v6634_v62 = vld [vmem:[#allocation53_spill] sm:$0xff] }
 0x654   :  { %4226 = vmatprep.subr.bf16.mxu0 %v6624_v32  ;;  %4290 = vmatprep.subr.bf16.mxu1 %v6625_v48  ;;  %v6635_v32 = vld [vmem:[#allocation54_spill] sm:$0xff]  ;;  %v6636_v48 = vld [vmem:[#allocation55_spill] sm:$0xff] }
 0x657   :  { %4228 = vmatpush1.bf16.msra.mxu0 %v6626_v45  ;;  %4292 = vmatpush1.bf16.msra.mxu1 %v6627_v47  ;;  %v6637_v45 = vld [vmem:[#allocation56_spill] sm:$0xff]  ;;  %v6638_v47 = vld [vmem:[#allocation57_spill] sm:$0xff] }
 0x658   :  { %4230 = vmatprep.subr.bf16.mxu0 %v6628_v6  ;;  %4294 = vmatprep.subr.bf16.mxu1 %v6629_v30  ;;  %v6639_v6 = vld [vmem:[#allocation58_spill] sm:$0xff]  ;;  %v6640_v30 = vld [vmem:[#allocation59_spill] sm:$0xff] }
 0x65b   :  { %4232 = vmatpush1.bf16.msra.mxu0 %v6630_v3  ;;  %4296 = vmatpush1.bf16.msra.mxu1 %v6631_v21  ;;  %v6641_v3 = vld [vmem:[#allocation60_spill] sm:$0xff]  ;;  %v6642_v21 = vld [vmem:[#allocation61_spill] sm:$0xff] }
 0x65c   :  { %4234 = vmatprep.subr.bf16.mxu0 %v6632_v29  ;;  %4298 = vmatprep.subr.bf16.mxu1 %v6633_v59  ;;  %v6643_v29 = vld [vmem:[#allocation62_spill] sm:$0xff]  ;;  %v6644_v59 = vld [vmem:[#allocation63_spill] sm:$0xff] }
 0x65f   :  { %4236 = vmatpush1.bf16.msra.mxu0 %v6634_v62  ;;  %4300 = vmatpush1.bf16.msra.mxu1 %v6635_v32  ;;  %v6645_v62 = vld [vmem:[#allocation64_spill] sm:$0xff]  ;;  %v6646_v32 = vld [vmem:[#allocation65_spill] sm:$0xff] }
 0x660   :  { %4238 = vmatprep.subr.bf16.mxu0 %v6636_v48  ;;  %4302 = vmatprep.subr.bf16.mxu1 %v6637_v45  ;;  %v6647_v48 = vld [vmem:[#allocation66_spill] sm:$0xff]  ;;  %v6648_v45 = vld [vmem:[#allocation12_spill] sm:$0xff] }
 0x663   :  { %4240 = vmatpush1.bf16.msra.mxu0 %v6638_v47  ;;  %4304 = vmatpush1.bf16.msra.mxu1 %v6639_v6  ;;  %v6649_v47 = vld [vmem:[#allocation13_spill] sm:$0xff] }
 0x664   :  { %4242 = vmatprep.subr.bf16.mxu0 %v6640_v30  ;;  %4306 = vmatprep.subr.bf16.mxu1 %v6641_v3 }
 0x667   :  { %4244 = vmatpush1.bf16.msra.mxu0 %v6642_v21  ;;  %4308 = vmatpush1.bf16.msra.mxu1 %v6643_v29 }
 0x668   :  { %4246 = vmatprep.subr.bf16.mxu0 %v6644_v59  ;;  %4310 = vmatprep.subr.bf16.mxu1 %v6645_v62  ;;  %v6651_v62 = vld [vmem:[#allocation68_spill] sm:$0xff] }
 0x66b   :  { %4248 = vmatpush1.bf16.msra.mxu0 %v6646_v32  ;;  %4312 = vmatpush1.bf16.msra.mxu1 %v6647_v48 }
 0x66c   :  { %4314 = vmatprep.subr.bf16.mxu0 %v6648_v45  ;;  %4346 = vmatprep.subr.bf16.mxu1 %v6649_v47 }
 0x6e1   :  { %v1944_v6 = vpop.f32.mrb[18].mxu0  ;;  %v2015_v30 = vpop.f32.mrb[18].mxu1 }
 0x6e2   :  { %v1945_v3 = vadd.f32 %v1944_v6, %v6650_v58  ;;  %v1946_v4 = vpop.f32.mrb[19].mxu0  ;;  %v2017_v21 = vpop.f32.mrb[19].mxu1  ;;  %v2016_v32 = vadd.f32 %v2015_v30, %v6651_v62 }
 0x6e3   :  { %v1947_v29 = vadd.f32 %v1946_v4, %v5483_v42  ;;  %v2018_v48 = vadd.f32 %v2017_v21, %v5491_v61 }
 0x6e4   :  { %v3146_v14 = vmul.f32 -1.442695, %v1945_v3  ;;  %v3148_v15 = vmul.f32 -1.442695, %v2016_v32 }
 0x6e5   :  { %v3147_v59 = vmul.f32 -1.442695, %v1947_v29 }
 0x6e6   :  { %4812 = vpow2.f32 %v3146_v14 }
 0x6e7   :  { %4814 = vpow2.f32 %v3147_v59 }
 0x6e8   :  { %4816 = vtanh.f32 %v2018_v48 }
 0x6e9   :  { %4818 = vpow2.f32 %v3148_v15 }
 0x6f0   :  { %v4813_v45 = vpop.eup %4812 }
 0x6f1   :  { %v2029_v5 = vadd.f32 1.0, %v4813_v45  ;;  %v4815_v47 = vpop.eup %4814 }
 0x6f2   :  { %v2030_v6 = vadd.f32 1.0, %v4815_v47  ;;  %v4817_v58 = vpop.eup %4816 }
 0x6f3   :  { %4820 = vrcp.f32 %v2029_v5  ;;  %v4819_v0 = vpop.eup %4818 }
 0x6f4   :  { %4822 = vrcp.f32 %v2030_v6  ;;  %v2031_v14 = vadd.f32 1.0, %v4819_v0 }
 0x6f6   :  { %4824 = vrcp.f32 %v2031_v14 }
 0x6fd   :  { %v4821_v4 = vpop.eup %4820 }
 0x6fe   :  { %v2040_v3 = vmul.f32 %v4821_v4, %v4817_v58  ;;  %v4823_v29 = vpop.eup %4822  ;;  %v2047_v58 = vld [vmem:[#allocation2 + $0x28] sm:$0xff] }
 0x6ff   :  { %v2039_v59 = vmul.f32 %v4823_v29, %v5831_v24 }
 0x700   :  { %v4825_v24 = vpop.eup %4824 }
 0x701   :  { %v2114_v30 = vpop.f32.mrb[20].mxu0  ;;  %v2185_v62 = vpop.f32.mrb[20].mxu1  ;;  %v5943_v21 = vadd.f32 %v2040_v3, %v2039_v59 }
 0x702   :  { %v2116_v32 = vpop.f32.mrb[21].mxu0  ;;  %v2187_v45 = vpop.f32.mrb[21].mxu1 }
 0x703   :  { %v2194_v48 = vcombine.low %v2114_v30, %v2116_v32  ;;  %v2195_v15 = vcombine.low %v2185_v62, %v2187_v45  ;;  %4826 = vtanh.f32 %v5943_v21 }
 0x705   :  { %v2202_v5 = vrot.slane %v2194_v48, %v5371_v28  ;;  %v2209_v47 = vrot.slane %v2195_v15, %v5371_v28 }
 0x707   :  { %v2210_v6 = vcombine.low %v2202_v5, %v2209_v47 }
 0x709   :  { %v2212_v0 = vadd.f32 %v2210_v6, %v2047_v58 }
 0x70b   :  { %v3149_v4 = vmul.f32 -1.442695, %v2212_v0  ;;  %v2220_v62 = vrot.slane %v2212_v0, 6  ;;  %v6653_v0 = vld [vmem:[#allocation15_spill] sm:$0xff] }
 0x70d   :  { %4828 = vpow2.f32 %v3149_v4  ;;  %v4827_v29 = vpop.eup %4826  ;;  %v6654_v4 = vld [vmem:[#allocation16_spill] sm:$0xff] }
 0x70e   :  { %v2043_v3 = vmul.f32 %v4827_v29, %v4825_v24  ;;  %v6655_v24 = vld [vmem:[#allocation17_spill] sm:$0xff]  ;;  %v6656_v29 = vld [vmem:[#allocation18_spill] sm:$0xff] }
 0x710   :  { %2045 = vst [vmem:[#allocation8 + $0x8] sm:$0x3] %v2043_v3  ;;  %2297 = vmatprep.mubr.f32.mxu0 %v2043_v3  ;;  %2368 = vmatprep.mubr.f32.mxu1 %v2043_v3  ;;  %v6657_v3 = vld [vmem:[#allocation19_spill] sm:$0xff] }
 0x717   :  { %v4829_v14 = vpop.eup %4828 }
 0x718   :  { %v2216_v59 = vadd.f32 1.0, %v4829_v14  ;;  %v6658_v14 = vld [vmem:[#allocation20_spill] sm:$0xff] }
 0x71a   :  { %4830 = vrcp.f32 %v2216_v59  ;;  %v6659_v59 = vld [vmem:[#allocation21_spill] sm:$0xff] }
 0x71b   :  { %4832 = vtanh.f32 %v2220_v62  ;;  %v6660_v62 = vld [vmem:[#allocation22_spill] sm:$0xff] }
 0x724   :  { %v4831_v30 = vpop.eup %4830 }
 0x725   :  { %v2224_v32 = vrot.slane %v4831_v30, 2  ;;  %v4833_v45 = vpop.eup %4832  ;;  %v2230_v47 = vrot.slane %v4831_v30, 4 }
 0x726   :  { %v2227_v48 = vmul.f32 %v4833_v45, %v4831_v30  ;;  %v6661_v30 = vld [vmem:[#allocation23_spill] sm:$0xff]  ;;  %v6663_v45 = vld [vmem:[#allocation25_spill] sm:$0xff] }
 0x727   :  { %v2226_v15 = vmul.f32 %v2224_v32, %v5837_v56  ;;  %v6652_v56 = vld [vmem:[#allocation14_spill] sm:$0xff]  ;;  %v6662_v32 = vld [vmem:[#allocation24_spill] sm:$0xff] }
 0x729   :  { %v5949_v5 = vadd.f32 %v2227_v48, %v2226_v15  ;;  %v6664_v48 = vld [vmem:[#allocation26_spill] sm:$0xff]  ;;  %v6665_v15 = vld [vmem:[#allocation27_spill] sm:$0xff] }
 0x72b   :  { %4834 = vtanh.f32 %v5949_v5 }
 0x735   :  { %v4835_v58 = vpop.eup %4834 }
 0x736   :  { %v2232_v6 = vmul.f32 %v4835_v58, %v2230_v47  ;;  %v6666_v47 = vld [vmem:[#allocation28_spill] sm:$0xff]  ;;  %v6667_v58 = vld [vmem:[#allocation29_spill] sm:$0xff] }
 0x738   :  { %2298 = vmatmul.mubr.f32.vlgmr.msra.gmra.mrb[22].mxu0 %v2232_v6  ;;  %2369 = vmatmul.mubr.f32.vlgmr.msra.gmra.mrb[22].mxu1 %v2232_v6 }
 0x739   :  { %4316 = vmatpush1.bf16.msra.mxu0 %v5078_v9  ;;  %4348 = vmatpush1.bf16.msra.mxu1 %v5081_v13 }
 0x73a   :  { %4318 = vmatprep.subr.bf16.mxu0 %v5085_v17  ;;  %4350 = vmatprep.subr.bf16.mxu1 %v5087_v18 }
 0x73b   :  { %2467 = vmatprep.mubr.f32.mxu0 %v6369_v8  ;;  %2538 = vmatprep.mubr.f32.mxu1 %v6369_v8 }
 0x73d   :  { %4320 = vmatpush1.bf16.msra.mxu0 %v5090_v22  ;;  %4352 = vmatpush1.bf16.msra.mxu1 %v5094_v26 }
 0x73e   :  { %4322 = vmatprep.subr.bf16.mxu0 %v5096_v27  ;;  %4354 = vmatprep.subr.bf16.mxu1 %v5098_v31 }
 0x741   :  { %4324 = vmatpush1.bf16.msra.mxu0 %v5101_v35  ;;  %4356 = vmatpush1.bf16.msra.mxu1 %v5105_v39 }
 0x742   :  { %4326 = vmatprep.subr.bf16.mxu0 %v5107_v40  ;;  %4358 = vmatprep.subr.bf16.mxu1 %v5110_v44 }
 0x745   :  { %4328 = vmatpush1.bf16.msra.mxu0 %v5113_v51  ;;  %4360 = vmatpush1.bf16.msra.mxu1 %v5117_v52 }
 0x746   :  { %4330 = vmatprep.subr.bf16.mxu0 %v5119_v53  ;;  %4362 = vmatprep.subr.bf16.mxu1 %v5122_v57 }
 0x749   :  { %4332 = vmatpush1.bf16.msra.mxu0 %v5125_v63  ;;  %4364 = vmatpush1.bf16.msra.mxu1 %v5129_v1 }
 0x74a   :  { %4334 = vmatprep.subr.bf16.mxu0 %v5131_v2  ;;  %4366 = vmatprep.subr.bf16.mxu1 %v5134_v7 }
 0x74d   :  { %4336 = vmatpush1.bf16.msra.mxu0 %v5137_v16  ;;  %4368 = vmatpush1.bf16.msra.mxu1 %v5141_v19 }
 0x74e   :  { %4338 = vmatprep.subr.bf16.mxu0 %v5143_v20  ;;  %4370 = vmatprep.subr.bf16.mxu1 %v5146_v25 }
 0x751   :  { %4340 = vmatpush1.bf16.msra.mxu0 %v5149_v34  ;;  %4372 = vmatpush1.bf16.msra.mxu1 %v5153_v36 }
 0x752   :  { %4342 = vmatprep.subr.bf16.mxu0 %v5155_v37  ;;  %4374 = vmatprep.subr.bf16.mxu1 %v5158_v43 }
 0x755   :  { %4344 = vmatpush1.bf16.msra.mxu0 %v5161_v50  ;;  %4376 = vmatpush1.bf16.msra.mxu1 %v5165_v54 }
 0x756   :  { %4378 = vmatprep.subr.bf16.mxu0 %v5167_v55  ;;  %4442 = vmatprep.subr.bf16.mxu1 %v5170_v60 }
 0x758   :  { %2468 = vmatmul.mubr.f32.vlgmr.msra.gmra.mrb[24].mxu0 %v2232_v6  ;;  %2539 = vmatmul.mubr.f32.vlgmr.msra.gmra.mrb[24].mxu1 %v2232_v6  ;;  %v6668_v6 = vld [vmem:[#allocation30_spill] sm:$0xff] }
 0x759   :  { %4380 = vmatpush1.bf16.msra.mxu0 %v5173_v10  ;;  %4444 = vmatpush1.bf16.msra.mxu1 %v5177_v11 }
 0x75a   :  { %4382 = vmatprep.subr.bf16.mxu0 %v5179_v12  ;;  %4446 = vmatprep.subr.bf16.mxu1 %v5182_v23 }
 0x75d   :  { %4384 = vmatpush1.bf16.msra.mxu0 %v5187_v33  ;;  %4448 = vmatpush1.bf16.msra.mxu1 %v5191_v38 }
 0x75e   :  { %4386 = vmatprep.subr.bf16.mxu0 %v5193_v41  ;;  %4450 = vmatprep.subr.bf16.mxu1 %v5196_v46 }
 0x761   :  { %4388 = vmatpush1.bf16.msra.mxu0 %v5201_v49  ;;  %4452 = vmatpush1.bf16.msra.mxu1 %v6652_v56 }
 0x762   :  { %4390 = vmatprep.subr.bf16.mxu0 %v6653_v0  ;;  %4454 = vmatprep.subr.bf16.mxu1 %v6654_v4 }
 0x765   :  { %4392 = vmatpush1.bf16.msra.mxu0 %v6655_v24  ;;  %4456 = vmatpush1.bf16.msra.mxu1 %v6656_v29 }
 0x766   :  { %4394 = vmatprep.subr.bf16.mxu0 %v6657_v3  ;;  %4458 = vmatprep.subr.bf16.mxu1 %v6658_v14  ;;  %v6669_v14 = vld [vmem:[#allocation31_spill] sm:$0xff] }
 0x767   :  { %v6707_v3 = vld [vmem:[#allocation67_spill] sm:$0xff] }
 0x769   :  { %4396 = vmatpush1.bf16.msra.mxu0 %v6659_v59  ;;  %4460 = vmatpush1.bf16.msra.mxu1 %v6660_v62  ;;  %v6670_v59 = vld [vmem:[#allocation32_spill] sm:$0xff]  ;;  %v6671_v62 = vld [vmem:[#allocation33_spill] sm:$0xff] }
 0x76a   :  { %4398 = vmatprep.subr.bf16.mxu0 %v6661_v30  ;;  %4462 = vmatprep.subr.bf16.mxu1 %v6662_v32  ;;  %v6672_v30 = vld [vmem:[#allocation34_spill] sm:$0xff]  ;;  %v6673_v32 = vld [vmem:[#allocation35_spill] sm:$0xff] }
 0x76d   :  { %4400 = vmatpush1.bf16.msra.mxu0 %v6663_v45  ;;  %4464 = vmatpush1.bf16.msra.mxu1 %v6664_v48  ;;  %v6674_v45 = vld [vmem:[#allocation36_spill] sm:$0xff]  ;;  %v6675_v48 = vld [vmem:[#allocation37_spill] sm:$0xff] }
 0x76e   :  { %4402 = vmatprep.subr.bf16.mxu0 %v6665_v15  ;;  %4466 = vmatprep.subr.bf16.mxu1 %v6666_v47  ;;  %v6676_v15 = vld [vmem:[#allocation38_spill] sm:$0xff]  ;;  %v6677_v47 = vld [vmem:[#allocation39_spill] sm:$0xff] }
 0x771   :  { %4404 = vmatpush1.bf16.msra.mxu0 %v6667_v58  ;;  %4468 = vmatpush1.bf16.msra.mxu1 %v6668_v6  ;;  %v6678_v58 = vld [vmem:[#allocation40_spill] sm:$0xff]  ;;  %v6679_v6 = vld [vmem:[#allocation41_spill] sm:$0xff] }
 0x772   :  { %4406 = vmatprep.subr.bf16.mxu0 %v6669_v14  ;;  %4470 = vmatprep.subr.bf16.mxu1 %v6670_v59  ;;  %v6680_v14 = vld [vmem:[#allocation42_spill] sm:$0xff]  ;;  %v6681_v59 = vld [vmem:[#allocation43_spill] sm:$0xff] }
 0x775   :  { %4408 = vmatpush1.bf16.msra.mxu0 %v6671_v62  ;;  %4472 = vmatpush1.bf16.msra.mxu1 %v6672_v30  ;;  %v6682_v62 = vld [vmem:[#allocation44_spill] sm:$0xff]  ;;  %v6683_v30 = vld [vmem:[#allocation45_spill] sm:$0xff] }
 0x776   :  { %4410 = vmatprep.subr.bf16.mxu0 %v6673_v32  ;;  %4474 = vmatprep.subr.bf16.mxu1 %v6674_v45  ;;  %v6684_v32 = vld [vmem:[#allocation46_spill] sm:$0xff]  ;;  %v6685_v45 = vld [vmem:[#allocation47_spill] sm:$0xff] }
 0x779   :  { %4412 = vmatpush1.bf16.msra.mxu0 %v6675_v48  ;;  %4476 = vmatpush1.bf16.msra.mxu1 %v6676_v15  ;;  %v6686_v48 = vld [vmem:[#allocation48_spill] sm:$0xff]  ;;  %v6687_v15 = vld [vmem:[#allocation49_spill] sm:$0xff] }
 0x77a   :  { %4414 = vmatprep.subr.bf16.mxu0 %v6677_v47  ;;  %4478 = vmatprep.subr.bf16.mxu1 %v6678_v58  ;;  %v6688_v47 = vld [vmem:[#allocation50_spill] sm:$0xff]  ;;  %v6689_v58 = vld [vmem:[#allocation51_spill] sm:$0xff] }
 0x77d   :  { %4416 = vmatpush1.bf16.msra.mxu0 %v6679_v6  ;;  %4480 = vmatpush1.bf16.msra.mxu1 %v6680_v14  ;;  %v6690_v6 = vld [vmem:[#allocation52_spill] sm:$0xff]  ;;  %v6691_v14 = vld [vmem:[#allocation53_spill] sm:$0xff] }
 0x77e   :  { %4418 = vmatprep.subr.bf16.mxu0 %v6681_v59  ;;  %4482 = vmatprep.subr.bf16.mxu1 %v6682_v62  ;;  %v6692_v59 = vld [vmem:[#allocation54_spill] sm:$0xff]  ;;  %v6693_v62 = vld [vmem:[#allocation55_spill] sm:$0xff] }
 0x781   :  { %4420 = vmatpush1.bf16.msra.mxu0 %v6683_v30  ;;  %4484 = vmatpush1.bf16.msra.mxu1 %v6684_v32  ;;  %v6694_v30 = vld [vmem:[#allocation56_spill] sm:$0xff]  ;;  %v6695_v32 = vld [vmem:[#allocation57_spill] sm:$0xff] }
 0x782   :  { %4422 = vmatprep.subr.bf16.mxu0 %v6685_v45  ;;  %4486 = vmatprep.subr.bf16.mxu1 %v6686_v48  ;;  %v6696_v45 = vld [vmem:[#allocation58_spill] sm:$0xff]  ;;  %v6697_v48 = vld [vmem:[#allocation59_spill] sm:$0xff] }
 0x785   :  { %4424 = vmatpush1.bf16.msra.mxu0 %v6687_v15  ;;  %4488 = vmatpush1.bf16.msra.mxu1 %v6688_v47  ;;  %v6698_v15 = vld [vmem:[#allocation60_spill] sm:$0xff]  ;;  %v6699_v47 = vld [vmem:[#allocation61_spill] sm:$0xff] }
 0x786   :  { %4426 = vmatprep.subr.bf16.mxu0 %v6689_v58  ;;  %4490 = vmatprep.subr.bf16.mxu1 %v6690_v6  ;;  %v6700_v58 = vld [vmem:[#allocation62_spill] sm:$0xff]  ;;  %v6701_v6 = vld [vmem:[#allocation63_spill] sm:$0xff] }
 0x789   :  { %4428 = vmatpush1.bf16.msra.mxu0 %v6691_v14  ;;  %4492 = vmatpush1.bf16.msra.mxu1 %v6692_v59  ;;  %v6702_v14 = vld [vmem:[#allocation64_spill] sm:$0xff]  ;;  %v6703_v59 = vld [vmem:[#allocation65_spill] sm:$0xff] }
 0x78a   :  { %4430 = vmatprep.subr.bf16.mxu0 %v6693_v62  ;;  %4494 = vmatprep.subr.bf16.mxu1 %v6694_v30  ;;  %v6704_v62 = vld [vmem:[#allocation66_spill] sm:$0xff]  ;;  %v6705_v30 = vld [vmem:[#allocation12_spill] sm:$0xff] }
 0x78d   :  { %4432 = vmatpush1.bf16.msra.mxu0 %v6695_v32  ;;  %4496 = vmatpush1.bf16.msra.mxu1 %v6696_v45  ;;  %v6706_v32 = vld [vmem:[#allocation13_spill] sm:$0xff] }
 0x78e   :  { %4434 = vmatprep.subr.bf16.mxu0 %v6697_v48  ;;  %4498 = vmatprep.subr.bf16.mxu1 %v6698_v15 }
 0x791   :  { %4436 = vmatpush1.bf16.msra.mxu0 %v6699_v47  ;;  %4500 = vmatpush1.bf16.msra.mxu1 %v6700_v58 }
 0x792   :  { %4438 = vmatprep.subr.bf16.mxu0 %v6701_v6  ;;  %4502 = vmatprep.subr.bf16.mxu1 %v6702_v14  ;;  %v6708_v14 = vld [vmem:[#allocation68_spill] sm:$0xff] }
 0x795   :  { %4440 = vmatpush1.bf16.msra.mxu0 %v6703_v59  ;;  %4504 = vmatpush1.bf16.msra.mxu1 %v6704_v62 }
 0x796   :  { %4506 = vmatprep.subr.bf16.mxu0 %v6705_v30  ;;  %4538 = vmatprep.subr.bf16.mxu1 %v6706_v32 }
 0x80b   :  { %v2299_v45 = vpop.f32.mrb[22].mxu0  ;;  %v2370_v48 = vpop.f32.mrb[22].mxu1 }
 0x80c   :  { %v2300_v15 = vadd.f32 %v2299_v45, %v6707_v3  ;;  %v2301_v29 = vpop.f32.mrb[23].mxu0  ;;  %v2372_v47 = vpop.f32.mrb[23].mxu1  ;;  %v2371_v59 = vadd.f32 %v2370_v48, %v6708_v14 }
 0x80d   :  { %v2302_v58 = vadd.f32 %v2301_v29, %v5483_v42  ;;  %v2373_v62 = vadd.f32 %v2372_v47, %v5491_v61 }
 0x80e   :  { %v3150_v24 = vmul.f32 -1.442695, %v2300_v15  ;;  %v3152_v4 = vmul.f32 -1.442695, %v2371_v59 }
 0x80f   :  { %v3151_v6 = vmul.f32 -1.442695, %v2302_v58 }
 0x810   :  { %4836 = vpow2.f32 %v3150_v24 }
 0x811   :  { %4838 = vpow2.f32 %v3151_v6 }
 0x812   :  { %4840 = vtanh.f32 %v2373_v62 }
 0x813   :  { %4842 = vpow2.f32 %v3152_v4 }
 0x81a   :  { %v4837_v30 = vpop.eup %4836 }
 0x81b   :  { %v2384_v0 = vadd.f32 1.0, %v4837_v30  ;;  %v4839_v32 = vpop.eup %4838 }
 0x81c   :  { %v2385_v45 = vadd.f32 1.0, %v4839_v32  ;;  %v4841_v3 = vpop.eup %4840 }
 0x81d   :  { %4844 = vrcp.f32 %v2384_v0  ;;  %v4843_v56 = vpop.eup %4842 }
 0x81e   :  { %4846 = vrcp.f32 %v2385_v45  ;;  %v2386_v24 = vadd.f32 1.0, %v4843_v56 }
 0x820   :  { %4848 = vrcp.f32 %v2386_v24 }
 0x827   :  { %v4845_v29 = vpop.eup %4844 }
 0x828   :  { %v2395_v15 = vmul.f32 %v4845_v29, %v4841_v3  ;;  %v4847_v58 = vpop.eup %4846  ;;  %v2402_v3 = vld [vmem:[#allocation2 + $0x30] sm:$0xff] }
 0x829   :  { %v2394_v6 = vmul.f32 %v4847_v58, %v5943_v21 }
 0x82a   :  { %v4849_v21 = vpop.eup %4848 }
 0x82b   :  { %v2469_v48 = vpop.f32.mrb[24].mxu0  ;;  %v2540_v14 = vpop.f32.mrb[24].mxu1  ;;  %v6055_v47 = vadd.f32 %v2395_v15, %v2394_v6 }
 0x82c   :  { %v2471_v59 = vpop.f32.mrb[25].mxu0  ;;  %v2542_v30 = vpop.f32.mrb[25].mxu1 }
 0x82d   :  { %v2549_v62 = vcombine.low %v2469_v48, %v2471_v59  ;;  %v2550_v4 = vcombine.low %v2540_v14, %v2542_v30  ;;  %4850 = vtanh.f32 %v6055_v47 }
 0x82f   :  { %v2557_v0 = vrot.slane %v2549_v62, %v5371_v28  ;;  %v2564_v32 = vrot.slane %v2550_v4, %v5371_v28 }
 0x831   :  { %v2565_v45 = vcombine.low %v2557_v0, %v2564_v32 }
 0x833   :  { %v2567_v56 = vadd.f32 %v2565_v45, %v2402_v3 }
 0x835   :  { %v3153_v29 = vmul.f32 -1.442695, %v2567_v56  ;;  %v2575_v14 = vrot.slane %v2567_v56, 6  ;;  %v6752_v56 = vld [vmem:[#allocation57_spill] sm:$0xff] }
 0x837   :  { %4852 = vpow2.f32 %v3153_v29  ;;  %v4851_v58 = vpop.eup %4850  ;;  %v6753_v29 = vld [vmem:[#allocation58_spill] sm:$0xff] }
 0x838   :  { %v2398_v15 = vmul.f32 %v4851_v58, %v4849_v21  ;;  %v6754_v21 = vld [vmem:[#allocation59_spill] sm:$0xff]  ;;  %v6755_v58 = vld [vmem:[#allocation60_spill] sm:$0xff] }
 0x83a   :  { %2400 = vst [vmem:[#allocation8 + $0xa] sm:$0x3] %v2398_v15  ;;  %2652 = vmatprep.mubr.f32.mxu0 %v2398_v15  ;;  %2723 = vmatprep.mubr.f32.mxu1 %v2398_v15  ;;  %v6756_v15 = vld [vmem:[#allocation61_spill] sm:$0xff] }
 0x841   :  { %v4853_v24 = vpop.eup %4852 }
 0x842   :  { %v2571_v6 = vadd.f32 1.0, %v4853_v24  ;;  %v6757_v24 = vld [vmem:[#allocation62_spill] sm:$0xff] }
 0x844   :  { %4854 = vrcp.f32 %v2571_v6  ;;  %v6758_v6 = vld [vmem:[#allocation63_spill] sm:$0xff] }
 0x845   :  { %4856 = vtanh.f32 %v2575_v14  ;;  %v6759_v14 = vld [vmem:[#allocation64_spill] sm:$0xff] }
 0x84e   :  { %v4855_v48 = vpop.eup %4854 }
 0x84f   :  { %v2579_v59 = vrot.slane %v4855_v48, 2  ;;  %v4857_v30 = vpop.eup %4856  ;;  %v2585_v32 = vrot.slane %v4855_v48, 4 }
 0x850   :  { %v2582_v62 = vmul.f32 %v4857_v30, %v4855_v48  ;;  %v6760_v48 = vld [vmem:[#allocation65_spill] sm:$0xff] }
 0x851   :  { %v2581_v4 = vmul.f32 %v2579_v59, %v5949_v5  ;;  %v6751_v5 = vld [vmem:[#allocation56_spill] sm:$0xff]  ;;  %v6761_v59 = vld [vmem:[#allocation66_spill] sm:$0xff] }
 0x853   :  { %v6061_v0 = vadd.f32 %v2582_v62, %v2581_v4  ;;  %v6762_v4 = vld [vmem:[#allocation67_spill] sm:$0xff] }
 0x855   :  { %4858 = vtanh.f32 %v6061_v0 }
 0x85f   :  { %v4859_v3 = vpop.eup %4858 }
 0x860   :  { %v2587_v45 = vmul.f32 %v4859_v3, %v2585_v32 }
 0x862   :  { %2653 = vmatmul.mubr.f32.vlgmr.msra.gmra.mrb[26].mxu0 %v2587_v45  ;;  %2724 = vmatmul.mubr.f32.vlgmr.msra.gmra.mrb[26].mxu1 %v2587_v45 }
 0x863   :  { %4508 = vmatpush1.bf16.msra.mxu0 %v5078_v9  ;;  %4540 = vmatpush1.bf16.msra.mxu1 %v5081_v13  ;;  %v6709_v9 = vld [vmem:[#allocation14_spill] sm:$0xff]  ;;  %v6710_v13 = vld [vmem:[#allocation15_spill] sm:$0xff] }
 0x864   :  { %4510 = vmatprep.subr.bf16.mxu0 %v5085_v17  ;;  %4542 = vmatprep.subr.bf16.mxu1 %v5087_v18  ;;  %v6711_v17 = vld [vmem:[#allocation16_spill] sm:$0xff]  ;;  %v6712_v18 = vld [vmem:[#allocation17_spill] sm:$0xff] }
 0x865   :  { %2822 = vmatprep.mubr.f32.mxu0 %v6369_v8  ;;  %2893 = vmatprep.mubr.f32.mxu1 %v6369_v8  ;;  %v6750_v8 = vld [vmem:[#allocation55_spill] sm:$0xff] }
 0x867   :  { %4512 = vmatpush1.bf16.msra.mxu0 %v5090_v22  ;;  %4544 = vmatpush1.bf16.msra.mxu1 %v5094_v26  ;;  %v6713_v22 = vld [vmem:[#allocation18_spill] sm:$0xff]  ;;  %v6714_v26 = vld [vmem:[#allocation19_spill] sm:$0xff] }
 0x868   :  { %4514 = vmatprep.subr.bf16.mxu0 %v5096_v27  ;;  %4546 = vmatprep.subr.bf16.mxu1 %v5098_v31  ;;  %v6715_v27 = vld [vmem:[#allocation20_spill] sm:$0xff]  ;;  %v6716_v31 = vld [vmem:[#allocation21_spill] sm:$0xff] }
 0x86b   :  { %4516 = vmatpush1.bf16.msra.mxu0 %v5101_v35  ;;  %4548 = vmatpush1.bf16.msra.mxu1 %v5105_v39  ;;  %v6717_v35 = vld [vmem:[#allocation22_spill] sm:$0xff]  ;;  %v6718_v39 = vld [vmem:[#allocation23_spill] sm:$0xff] }
 0x86c   :  { %4518 = vmatprep.subr.bf16.mxu0 %v5107_v40  ;;  %4550 = vmatprep.subr.bf16.mxu1 %v5110_v44  ;;  %v6719_v40 = vld [vmem:[#allocation24_spill] sm:$0xff]  ;;  %v6720_v44 = vld [vmem:[#allocation25_spill] sm:$0xff] }
 0x86f   :  { %4520 = vmatpush1.bf16.msra.mxu0 %v5113_v51  ;;  %4552 = vmatpush1.bf16.msra.mxu1 %v5117_v52  ;;  %v6721_v51 = vld [vmem:[#allocation26_spill] sm:$0xff]  ;;  %v6722_v52 = vld [vmem:[#allocation27_spill] sm:$0xff] }
 0x870   :  { %4522 = vmatprep.subr.bf16.mxu0 %v5119_v53  ;;  %4554 = vmatprep.subr.bf16.mxu1 %v5122_v57  ;;  %v6723_v53 = vld [vmem:[#allocation28_spill] sm:$0xff]  ;;  %v6724_v57 = vld [vmem:[#allocation29_spill] sm:$0xff] }
 0x873   :  { %4524 = vmatpush1.bf16.msra.mxu0 %v5125_v63  ;;  %4556 = vmatpush1.bf16.msra.mxu1 %v5129_v1  ;;  %v6725_v63 = vld [vmem:[#allocation30_spill] sm:$0xff]  ;;  %v6726_v1 = vld [vmem:[#allocation31_spill] sm:$0xff] }
 0x874   :  { %4526 = vmatprep.subr.bf16.mxu0 %v5131_v2  ;;  %4558 = vmatprep.subr.bf16.mxu1 %v5134_v7  ;;  %v6727_v2 = vld [vmem:[#allocation32_spill] sm:$0xff]  ;;  %v6728_v7 = vld [vmem:[#allocation33_spill] sm:$0xff] }
 0x877   :  { %4528 = vmatpush1.bf16.msra.mxu0 %v5137_v16  ;;  %4560 = vmatpush1.bf16.msra.mxu1 %v5141_v19  ;;  %v6729_v16 = vld [vmem:[#allocation34_spill] sm:$0xff]  ;;  %v6730_v19 = vld [vmem:[#allocation35_spill] sm:$0xff] }
 0x878   :  { %4530 = vmatprep.subr.bf16.mxu0 %v5143_v20  ;;  %4562 = vmatprep.subr.bf16.mxu1 %v5146_v25  ;;  %v6731_v20 = vld [vmem:[#allocation36_spill] sm:$0xff]  ;;  %v6732_v25 = vld [vmem:[#allocation37_spill] sm:$0xff] }
 0x87b   :  { %4532 = vmatpush1.bf16.msra.mxu0 %v5149_v34  ;;  %4564 = vmatpush1.bf16.msra.mxu1 %v5153_v36  ;;  %v6733_v34 = vld [vmem:[#allocation38_spill] sm:$0xff]  ;;  %v6734_v36 = vld [vmem:[#allocation39_spill] sm:$0xff] }
 0x87c   :  { %4534 = vmatprep.subr.bf16.mxu0 %v5155_v37  ;;  %4566 = vmatprep.subr.bf16.mxu1 %v5158_v43  ;;  %v6735_v37 = vld [vmem:[#allocation40_spill] sm:$0xff]  ;;  %v6736_v43 = vld [vmem:[#allocation41_spill] sm:$0xff] }
 0x87f   :  { %4536 = vmatpush1.bf16.msra.mxu0 %v5161_v50  ;;  %4568 = vmatpush1.bf16.msra.mxu1 %v5165_v54  ;;  %v6737_v50 = vld [vmem:[#allocation42_spill] sm:$0xff]  ;;  %v6738_v54 = vld [vmem:[#allocation43_spill] sm:$0xff] }
 0x880   :  { %4570 = vmatprep.subr.bf16.mxu0 %v5167_v55  ;;  %4634 = vmatprep.subr.bf16.mxu1 %v5170_v60  ;;  %v6739_v55 = vld [vmem:[#allocation44_spill] sm:$0xff]  ;;  %v6740_v60 = vld [vmem:[#allocation45_spill] sm:$0xff] }
 0x882   :  { %2823 = vmatmul.mubr.f32.vlgmr.msra.gmra.mrb[28].mxu0 %v2587_v45  ;;  %2894 = vmatmul.mubr.f32.vlgmr.msra.gmra.mrb[28].mxu1 %v2587_v45 }
 0x883   :  { %4572 = vmatpush1.bf16.msra.mxu0 %v5173_v10  ;;  %4636 = vmatpush1.bf16.msra.mxu1 %v5177_v11  ;;  %v6741_v10 = vld [vmem:[#allocation46_spill] sm:$0xff]  ;;  %v6742_v11 = vld [vmem:[#allocation47_spill] sm:$0xff] }
 0x884   :  { %4574 = vmatprep.subr.bf16.mxu0 %v5179_v12  ;;  %4638 = vmatprep.subr.bf16.mxu1 %v5182_v23  ;;  %v6743_v12 = vld [vmem:[#allocation48_spill] sm:$0xff]  ;;  %v6744_v23 = vld [vmem:[#allocation49_spill] sm:$0xff] }
 0x887   :  { %4576 = vmatpush1.bf16.msra.mxu0 %v5187_v33  ;;  %4640 = vmatpush1.bf16.msra.mxu1 %v5191_v38  ;;  %v6745_v33 = vld [vmem:[#allocation50_spill] sm:$0xff]  ;;  %v6746_v38 = vld [vmem:[#allocation51_spill] sm:$0xff] }
 0x888   :  { %4578 = vmatprep.subr.bf16.mxu0 %v5193_v41  ;;  %4642 = vmatprep.subr.bf16.mxu1 %v5196_v46  ;;  %v6747_v41 = vld [vmem:[#allocation52_spill] sm:$0xff]  ;;  %v6748_v46 = vld [vmem:[#allocation53_spill] sm:$0xff] }
 0x88b   :  { %4580 = vmatpush1.bf16.msra.mxu0 %v5201_v49  ;;  %4644 = vmatpush1.bf16.msra.mxu1 %v6709_v9  ;;  %v6749_v49 = vld [vmem:[#allocation54_spill] sm:$0xff] }
 0x88c   :  { %4582 = vmatprep.subr.bf16.mxu0 %v6710_v13  ;;  %4646 = vmatprep.subr.bf16.mxu1 %v6711_v17 }
 0x88f   :  { %4584 = vmatpush1.bf16.msra.mxu0 %v6712_v18  ;;  %4648 = vmatpush1.bf16.msra.mxu1 %v6713_v22  ;;  %v6763_v18 = vld [vmem:[#allocation68_spill] sm:$0xff] }
 0x890   :  { %4586 = vmatprep.subr.bf16.mxu0 %v6714_v26  ;;  %4650 = vmatprep.subr.bf16.mxu1 %v6715_v27 }
 0x893   :  { %4588 = vmatpush1.bf16.msra.mxu0 %v6716_v31  ;;  %4652 = vmatpush1.bf16.msra.mxu1 %v6717_v35 }
 0x894   :  { %4590 = vmatprep.subr.bf16.mxu0 %v6718_v39  ;;  %4654 = vmatprep.subr.bf16.mxu1 %v6719_v40 }
 0x897   :  { %4592 = vmatpush1.bf16.msra.mxu0 %v6720_v44  ;;  %4656 = vmatpush1.bf16.msra.mxu1 %v6721_v51 }
 0x898   :  { %4594 = vmatprep.subr.bf16.mxu0 %v6722_v52  ;;  %4658 = vmatprep.subr.bf16.mxu1 %v6723_v53 }
 0x89b   :  { %4596 = vmatpush1.bf16.msra.mxu0 %v6724_v57  ;;  %4660 = vmatpush1.bf16.msra.mxu1 %v6725_v63 }
 0x89c   :  { %4598 = vmatprep.subr.bf16.mxu0 %v6726_v1  ;;  %4662 = vmatprep.subr.bf16.mxu1 %v6727_v2 }
 0x89f   :  { %4600 = vmatpush1.bf16.msra.mxu0 %v6728_v7  ;;  %4664 = vmatpush1.bf16.msra.mxu1 %v6729_v16 }
 0x8a0   :  { %4602 = vmatprep.subr.bf16.mxu0 %v6730_v19  ;;  %4666 = vmatprep.subr.bf16.mxu1 %v6731_v20 }
 0x8a3   :  { %4604 = vmatpush1.bf16.msra.mxu0 %v6732_v25  ;;  %4668 = vmatpush1.bf16.msra.mxu1 %v6733_v34 }
 0x8a4   :  { %4606 = vmatprep.subr.bf16.mxu0 %v6734_v36  ;;  %4670 = vmatprep.subr.bf16.mxu1 %v6735_v37 }
 0x8a7   :  { %4608 = vmatpush1.bf16.msra.mxu0 %v6736_v43  ;;  %4672 = vmatpush1.bf16.msra.mxu1 %v6737_v50  ;;  %v2757_v43 = vld [vmem:[#allocation2 + $0x38] sm:$0xff] }
 0x8a8   :  { %4610 = vmatprep.subr.bf16.mxu0 %v6738_v54  ;;  %4674 = vmatprep.subr.bf16.mxu1 %v6739_v55 }
 0x8ab   :  { %4612 = vmatpush1.bf16.msra.mxu0 %v6740_v60  ;;  %4676 = vmatpush1.bf16.msra.mxu1 %v6741_v10 }
 0x8ac   :  { %4614 = vmatprep.subr.bf16.mxu0 %v6742_v11  ;;  %4678 = vmatprep.subr.bf16.mxu1 %v6743_v12 }
 0x8af   :  { %4616 = vmatpush1.bf16.msra.mxu0 %v6744_v23  ;;  %4680 = vmatpush1.bf16.msra.mxu1 %v6745_v33 }
 0x8b0   :  { %4618 = vmatprep.subr.bf16.mxu0 %v6746_v38  ;;  %4682 = vmatprep.subr.bf16.mxu1 %v6747_v41 }
 0x8b3   :  { %4620 = vmatpush1.bf16.msra.mxu0 %v6748_v46  ;;  %4684 = vmatpush1.bf16.msra.mxu1 %v6749_v49 }
 0x8b4   :  { %4622 = vmatprep.subr.bf16.mxu0 %v6750_v8  ;;  %4686 = vmatprep.subr.bf16.mxu1 %v6751_v5 }
 0x8b7   :  { %4624 = vmatpush1.bf16.msra.mxu0 %v6752_v56  ;;  %4688 = vmatpush1.bf16.msra.mxu1 %v6753_v29 }
 0x8b8   :  { %4626 = vmatprep.subr.bf16.mxu0 %v6754_v21  ;;  %4690 = vmatprep.subr.bf16.mxu1 %v6755_v58 }
 0x8bb   :  { %4628 = vmatpush1.bf16.msra.mxu0 %v6756_v15  ;;  %4692 = vmatpush1.bf16.msra.mxu1 %v6757_v24 }
 0x8bc   :  { %4630 = vmatprep.subr.bf16.mxu0 %v6758_v6  ;;  %4694 = vmatprep.subr.bf16.mxu1 %v6759_v14 }
 0x8bf   :  { %4632 = vmatpush1.bf16.msra.mxu0 %v6760_v48  ;;  %4696 = vmatpush1.bf16.msra.mxu1 %v6761_v59 }
 0x935   :  { %v2654_v30 = vpop.f32.mrb[26].mxu0  ;;  %v2725_v62 = vpop.f32.mrb[26].mxu1 }
 0x936   :  { %v2655_v32 = vadd.f32 %v2654_v30, %v6762_v4  ;;  %v2656_v3 = vpop.f32.mrb[27].mxu0  ;;  %v2727_v45 = vpop.f32.mrb[27].mxu1  ;;  %v2726_v22 = vadd.f32 %v2725_v62, %v6763_v18 }
 0x937   :  { %v2657_v9 = vadd.f32 %v2656_v3, %v5483_v42  ;;  %v2728_v26 = vadd.f32 %v2727_v45, %v5491_v61 }
 0x938   :  { %v3154_v13 = vmul.f32 -1.442695, %v2655_v32  ;;  %v3156_v27 = vmul.f32 -1.442695, %v2726_v22 }
 0x939   :  { %v3155_v17 = vmul.f32 -1.442695, %v2657_v9 }
 0x93a   :  { %4860 = vpow2.f32 %v3154_v13 }
 0x93b   :  { %4862 = vpow2.f32 %v3155_v17 }
 0x93c   :  { %4864 = vtanh.f32 %v2728_v26 }
 0x93d   :  { %4866 = vpow2.f32 %v3156_v27 }
 0x944   :  { %v4861_v31 = vpop.eup %4860 }
 0x945   :  { %v2739_v35 = vadd.f32 1.0, %v4861_v31  ;;  %v4863_v39 = vpop.eup %4862 }
 0x946   :  { %v2740_v40 = vadd.f32 1.0, %v4863_v39  ;;  %v4865_v44 = vpop.eup %4864 }
 0x947   :  { %4868 = vrcp.f32 %v2739_v35  ;;  %v4867_v51 = vpop.eup %4866 }
 0x948   :  { %4870 = vrcp.f32 %v2740_v40  ;;  %v2741_v63 = vadd.f32 1.0, %v4867_v51 }
 0x94a   :  { %4872 = vrcp.f32 %v2741_v63 }
 0x951   :  { %v4869_v52 = vpop.eup %4868 }
 0x952   :  { %v2750_v53 = vmul.f32 %v4869_v52, %v4865_v44  ;;  %v4871_v57 = vpop.eup %4870 }
 0x953   :  { %v2749_v1 = vmul.f32 %v4871_v57, %v6055_v47 }
 0x954   :  { %v4873_v47 = vpop.eup %4872 }
 0x955   :  { %v2824_v2 = vpop.f32.mrb[28].mxu0  ;;  %v2895_v7 = vpop.f32.mrb[28].mxu1  ;;  %v6165_v16 = vadd.f32 %v2750_v53, %v2749_v1 }
 0x956   :  { %v2826_v19 = vpop.f32.mrb[29].mxu0  ;;  %v2897_v20 = vpop.f32.mrb[29].mxu1 }
 0x957   :  { %v2904_v25 = vcombine.low %v2824_v2, %v2826_v19  ;;  %v2905_v34 = vcombine.low %v2895_v7, %v2897_v20  ;;  %4874 = vtanh.f32 %v6165_v16 }
 0x959   :  { %v2912_v36 = vrot.slane %v2904_v25, %v5371_v28  ;;  %v2919_v37 = vrot.slane %v2905_v34, %v5371_v28 }
 0x95b   :  { %v2920_v50 = vcombine.low %v2912_v36, %v2919_v37 }
 0x95d   :  { %v2922_v54 = vadd.f32 %v2920_v50, %v2757_v43 }
 0x95f   :  { %v3157_v55 = vmul.f32 -1.442695, %v2922_v54  ;;  %v2930_v23 = vrot.slane %v2922_v54, 6 }
 0x961   :  { %4876 = vpow2.f32 %v3157_v55  ;;  %v4875_v60 = vpop.eup %4874 }
 0x962   :  { %v2753_v10 = vmul.f32 %v4875_v60, %v4873_v47 }
 0x964   :  { %2755 = vst [vmem:[#allocation8 + $0xc] sm:$0x3] %v2753_v10  ;;  %3007 = vmatprep.mubr.f32.mxu0 %v2753_v10  ;;  %3078 = vmatprep.mubr.f32.mxu1 %v2753_v10 }
 0x96b   :  { %v4877_v11 = vpop.eup %4876 }
 0x96c   :  { %v2926_v12 = vadd.f32 1.0, %v4877_v11 }
 0x96e   :  { %4878 = vrcp.f32 %v2926_v12 }
 0x96f   :  { %4880 = vtanh.f32 %v2930_v23 }
 0x978   :  { %v4879_v33 = vpop.eup %4878 }
 0x979   :  { %v2934_v38 = vrot.slane %v4879_v33, 2  ;;  %v4881_v41 = vpop.eup %4880  ;;  %v2940_v8 = vrot.slane %v4879_v33, 4 }
 0x97a   :  { %v2937_v28 = vmul.f32 %v4881_v41, %v4879_v33 }
 0x97b   :  { %v2936_v46 = vmul.f32 %v2934_v38, %v6061_v0 }
 0x97d   :  { %v2938_v49 = vadd.f32 %v2937_v28, %v2936_v46 }
 0x97f   :  { %4882 = vtanh.f32 %v2938_v49 }
 0x989   :  { %v4883_v5 = vpop.eup %4882 }
 0x98a   :  { %v2942_v56 = vmul.f32 %v4883_v5, %v2940_v8 }
 0x98c   :  { %3008 = vmatmul.mubr.f32.vlgmr.msra.gmra.mrb[30].mxu0 %v2942_v56  ;;  %3079 = vmatmul.mubr.f32.vlgmr.msra.gmra.mrb[30].mxu1 %v2942_v56 }
 0xa5f   :  { %v3009_v29 = vpop.f32.mrb[30].mxu0  ;;  %v3080_v21 = vpop.f32.mrb[30].mxu1 }
 0xa60   :  { %v3010_v58 = vadd.f32 %v3009_v29, %v6762_v4  ;;  %v3011_v15 = vpop.f32.mrb[31].mxu0  ;;  %v3082_v24 = vpop.f32.mrb[31].mxu1  ;;  %v3081_v0 = vadd.f32 %v3080_v21, %v6763_v18 }
 0xa61   :  { %v3012_v6 = vadd.f32 %v3011_v15, %v5483_v42  ;;  %v3083_v59 = vadd.f32 %v3082_v24, %v5491_v61 }
 0xa62   :  { %v3158_v14 = vmul.f32 -1.442695, %v3010_v58  ;;  %v3160_v30 = vmul.f32 -1.442695, %v3081_v0 }
 0xa63   :  { %v3159_v48 = vmul.f32 -1.442695, %v3012_v6 }
 0xa64   :  { %4884 = vpow2.f32 %v3158_v14 }
 0xa65   :  { %4886 = vpow2.f32 %v3159_v48 }
 0xa66   :  { %4888 = vtanh.f32 %v3083_v59 }
 0xa67   :  { %4890 = vpow2.f32 %v3160_v30 }
 0xa6e   :  { %v4885_v62 = vpop.eup %4884 }
 0xa6f   :  { %v3094_v32 = vadd.f32 1.0, %v4885_v62  ;;  %v4887_v3 = vpop.eup %4886 }
 0xa70   :  { %v3095_v4 = vadd.f32 1.0, %v4887_v3  ;;  %v4889_v45 = vpop.eup %4888 }
 0xa71   :  { %4892 = vrcp.f32 %v3094_v32  ;;  %v4891_v9 = vpop.eup %4890 }
 0xa72   :  { %4894 = vrcp.f32 %v3095_v4  ;;  %v3096_v22 = vadd.f32 1.0, %v4891_v9 }
 0xa74   :  { %4896 = vrcp.f32 %v3096_v22 }
 0xa7b   :  { %v4893_v42 = vpop.eup %4892 }
 0xa7c   :  { %v3105_v13 = vmul.f32 %v4893_v42, %v4889_v45  ;;  %v4895_v17 = vpop.eup %4894 }
 0xa7d   :  { %v3104_v26 = vmul.f32 %v4895_v17, %v6165_v16 }
 0xa7e   :  { %v4897_v61 = vpop.eup %4896 }
 0xa7f   :  { %v3106_v18 = vadd.f32 %v3105_v13, %v3104_v26 }
 0xa81   :  { %4898 = vtanh.f32 %v3106_v18 }
 0xa8b   :  { %v4899_v27 = vpop.eup %4898 }
 0xa8c   :  { %v3108_v31 = vmul.f32 %v4899_v27, %v4897_v61 }
 0xa8e   :  { %3110 = vst [vmem:[#allocation8 + $0xe] sm:$0x3] %v3108_v31 }
 0xa8f   :  { %4977 = shalt.err (!%p4974_p0)
}
 0xa90   :  { %s4978_s7 = scalar_lea.hbm %s6194_s4, 256 }
 0xa91   :  { %p4979_p1 = scmp.ne.s32.totalorder %s6194_s4, %s4978_s7  ;;  %p4982_p2 = scmp.lt.u32.totalorder %s4978_s7, %s6194_s4 }
 0xa93   :  { %p4984_p3 = pnand %p4982_p2, %p4979_p1 }
 0xa95   :  { %4987 = shalt.err (!%p4984_p3)
}
 0xa96   :  { %s5004_s12 = smov 2  }
 0xa97   :  { %3122 = dma.vmem_to_hbm [thread:$0]  %s3117_s29, 256, %s6194_s4, [#allocation4], %s4996_s26, %s4996_s26, %s5004_s12  }
 0xa98   :  { %4992 = dma.done.wait [#allocation4], 256  }
 0xa99   :  { %4993 = vsyncadd [#allocation4], 4294967040 }
 0xa9a   :  { %3126 = vsyncpa [#allocation3], 1 }
 0xa9b   :  { %3127 = vsyncpa [#allocation6], 1 }
 0xa9c   :  { %3128 = vsyncpa [#allocation4], 1 }

</bundles_post_ra>
